<compile_context>
chip_gen: v7x
topology: tpu7x:2x2x1
jax: 0.10.0
libtpu: 0.0.40
codegen_flags: <defaults>
</compile_context>

<pallas_src>
import jax
import jax.numpy as jnp
from jax.experimental import pallas as pl
from jax.experimental.pallas import tpu as pltpu


def _round_up(n, m):
    return ((n + m - 1) // m) * m


def _pad_axis(a, target, axis):
    pad = target - a.shape[axis]
    if pad == 0:
        return a
    widths = [(0, 0)] * a.ndim
    widths[axis] = (0, pad)
    return jnp.pad(a, widths)


def netbp_kernel(x_ref, w1_ref, b1_ref, w2_ref, b2_ref, o_ref):
    # x_ref/w1_ref/w2_ref are bf16; biases and accumulation are f32.
    x = x_ref[...]
    h = jnp.dot(x, w1_ref[...], preferred_element_type=jnp.float32) + b1_ref[...]
    h = jnp.maximum(h, 0.0)                                  # nn.ReLU() in f32
    h = h.astype(jnp.bfloat16)                               # bf16 operand for 2nd MXU pass
    o = jnp.dot(h, w2_ref[...], preferred_element_type=jnp.float32) + b2_ref[...]
    o_ref[...] = o.astype(o_ref.dtype)


def netbp_forward(x, w1, b1, w2, b2, *, tb=256):
    """Forward pass of NetBP (hid_activate='relu'): y = relu(x @ W1 + b1) @ W2 + b2.

    Weights are stored as (D_in, D_out) (transposed vs. PyTorch's nn.Linear
    weight), biases as (1, D_out).  The wrapper zero-pads batch / hidden /
    output dims to lane-aligned sizes and slices the result back, which is
    numerically exact.
    """
    B, Din = x.shape
    Dh = w1.shape[1]
    Dout = w2.shape[1]

    Dh_p = _round_up(Dh, 128)          # 1000 -> 1024
    Dout_p = _round_up(max(Dout, 128), 128)  # 10 -> 128 (lane-dense output store)
    B_p = _round_up(B, tb)

    # One-time casts / pads in the wrapper (not per grid step).
    x_p = _pad_axis(x, B_p, 0).astype(jnp.bfloat16)
    w1_p = _pad_axis(w1, Dh_p, 1).astype(jnp.bfloat16)
    b1_p = _pad_axis(b1, Dh_p, 1).astype(jnp.float32)
    w2_p = _pad_axis(_pad_axis(w2, Dh_p, 0), Dout_p, 1).astype(jnp.bfloat16)
    b2_p = _pad_axis(b2, Dout_p, 1).astype(jnp.float32)

    flops = 2 * B_p * (Din * Dh_p + Dh_p * Dout_p)
    bytes_accessed = (
        x_p.size * 2 + w1_p.size * 2 + w2_p.size * 2
        + b1_p.size * 4 + b2_p.size * 4 + B_p * Dout_p * 4
    )

    out = pl.pallas_call(
        netbp_kernel,
        out_shape=jax.ShapeDtypeStruct((B_p, Dout_p), jnp.float32),
        grid_spec=pltpu.PrefetchScalarGridSpec(
            num_scalar_prefetch=0,
            grid=(B_p // tb,),
            in_specs=[
                pl.BlockSpec((tb, Din), lambda i: (i, 0)),      # x batch tile (bf16)
                pl.BlockSpec((Din, Dh_p), lambda i: (0, 0)),    # W1 (resident, bf16)
                pl.BlockSpec((1, Dh_p), lambda i: (0, 0)),      # b1 (f32)
                pl.BlockSpec((Dh_p, Dout_p), lambda i: (0, 0)), # W2 (resident, bf16)
                pl.BlockSpec((1, Dout_p), lambda i: (0, 0)),    # b2 (f32)
            ],
            out_specs=pl.BlockSpec((tb, Dout_p), lambda i: (i, 0)),
        ),
        compiler_params=pltpu.CompilerParams(
            dimension_semantics=("parallel",)),
        cost_estimate=pl.CostEstimate(
            flops=flops, transcendentals=0, bytes_accessed=bytes_accessed),
    )(x_p, w1_p, b1_p, w2_p, b2_p)

    # Slice off batch / output padding.
    return out[:B, :Dout]


def init_netbp_params(key, layer_sizes):
    """Deterministic init mimicking PyTorch nn.Linear default (U[-1/sqrt(fan_in), +])."""
    d0, d1, d2 = layer_sizes
    k1, k2, k3, k4 = jax.random.split(key, 4)
    bound1 = 1.0 / jnp.sqrt(jnp.float32(d0))
    bound2 = 1.0 / jnp.sqrt(jnp.float32(d1))
    w1 = jax.random.uniform(k1, (d0, d1), jnp.float32, -bound1, bound1)
    b1 = jax.random.uniform(k2, (1, d1), jnp.float32, -bound1, bound1)
    w2 = jax.random.uniform(k3, (d1, d2), jnp.float32, -bound2, bound2)
    b2 = jax.random.uniform(k4, (1, d2), jnp.float32, -bound2, bound2)
    return w1, b1, w2, b2


if __name__ == "__main__":
    # Shapes consistent with NetBP(layer_sizes=[784, 1000, 10]); small demo batch
    # (the wrapper pads the batch up to one 256-row tile internally).
    layer_sizes = [784, 1000, 10]
    batch = 8

    key = jax.random.PRNGKey(0)
    kx, kp = jax.random.split(key)
    x = jax.random.normal(kx, (batch, layer_sizes[0]), jnp.float32)
    w1, b1, w2, b2 = init_netbp_params(kp, layer_sizes)

    out = jax.block_until_ready(netbp_forward(x, w1, b1, w2, b2, tb=256))

    # Pure-JAX f32 reference; tolerance loosened because matmul operands are bf16.
    ref = jnp.maximum(x @ w1 + b1, 0.0) @ w2 + b2
    assert out.shape == (batch, layer_sizes[2])
    assert jnp.allclose(out, ref, atol=5e-2, rtol=5e-2), "mismatch vs reference"

    # NOTE: get_prediction's optional softmax is not part of forward(); omitted.
    print("KERNEL_OK")
</pallas_src>

<mosaic_0001>
module attributes {stable_mosaic.version = 11 : i64} {
  func.func @netbp_kernel(%arg0: i32, %arg1: memref<256x784xbf16, #tpu.memory_space<vmem>>, %arg2: memref<784x1024xbf16, #tpu.memory_space<vmem>>, %arg3: memref<1x1024xf32, #tpu.memory_space<vmem>>, %arg4: memref<1024x128xbf16, #tpu.memory_space<vmem>>, %arg5: memref<1x128xf32, #tpu.memory_space<vmem>>, %arg6: memref<256x128xf32, #tpu.memory_space<vmem>>) attributes {dimension_semantics = [#tpu.dimension_semantics<parallel>], iteration_bounds = array<i64: 1>, scalar_prefetch = 0 : i64, scratch_operands = 0 : i64, tpu.core_type = #tpu.core_type<tc>, window_params = [{transform_indices = @transform_0, window_bounds = array<i64: 256, 784>}, {pipeline_mode = #tpu.pipeline_mode<synchronous>, transform_indices = @transform_1, window_bounds = array<i64: 784, 1024>}, {pipeline_mode = #tpu.pipeline_mode<synchronous>, transform_indices = @transform_2, window_bounds = array<i64: 1, 1024>}, {pipeline_mode = #tpu.pipeline_mode<synchronous>, transform_indices = @transform_3, window_bounds = array<i64: 1024, 128>}, {pipeline_mode = #tpu.pipeline_mode<synchronous>, transform_indices = @transform_4, window_bounds = array<i64: 1, 128>}, {transform_indices = @transform_5, window_bounds = array<i64: 256, 128>}]} {
    %c0 = arith.constant 0 : index
    %c0_0 = arith.constant 0 : index
    %0 = vector.load %arg1[%c0, %c0_0] : memref<256x784xbf16, #tpu.memory_space<vmem>>, vector<256x784xbf16>
    %c0_1 = arith.constant 0 : index
    %c0_2 = arith.constant 0 : index
    %1 = vector.load %arg2[%c0_1, %c0_2] : memref<784x1024xbf16, #tpu.memory_space<vmem>>, vector<784x1024xbf16>
    %cst = arith.constant dense<0.000000e+00> : vector<256x1024xf32>
    %2 = tpu.matmul %0, %1, %cst {dimension_numbers = #tpu.dot_dimension_numbers<[1], [0], [0], [1], [0, 0, 1, 1], [], []>} : vector<256x784xbf16>, vector<784x1024xbf16>, vector<256x1024xf32> -> vector<256x1024xf32>
    %c0_3 = arith.constant 0 : index
    %c0_4 = arith.constant 0 : index
    %3 = vector.load %arg3[%c0_3, %c0_4] : memref<1x1024xf32, #tpu.memory_space<vmem>>, vector<1x1024xf32>
    %4 = vector.broadcast %3 : vector<1x1024xf32> to vector<256x1024xf32>
    %5 = arith.addf %2, %4 : vector<256x1024xf32>
    %cst_5 = arith.constant 0.000000e+00 : f32
    %6 = vector.broadcast %cst_5 : f32 to vector<256x1024xf32>
    %7 = arith.maximumf %5, %6 : vector<256x1024xf32>
    %8 = arith.truncf %7 : vector<256x1024xf32> to vector<256x1024xbf16>
    %c0_6 = arith.constant 0 : index
    %c0_7 = arith.constant 0 : index
    %9 = vector.load %arg4[%c0_6, %c0_7] : memref<1024x128xbf16, #tpu.memory_space<vmem>>, vector<1024x128xbf16>
    %cst_8 = arith.constant dense<0.000000e+00> : vector<256x128xf32>
    %10 = tpu.matmul %8, %9, %cst_8 {dimension_numbers = #tpu.dot_dimension_numbers<[1], [0], [0], [1], [0, 0, 1, 1], [], []>} : vector<256x1024xbf16>, vector<1024x128xbf16>, vector<256x128xf32> -> vector<256x128xf32>
    %c0_9 = arith.constant 0 : index
    %c0_10 = arith.constant 0 : index
    %11 = vector.load %arg5[%c0_9, %c0_10] : memref<1x128xf32, #tpu.memory_space<vmem>>, vector<1x128xf32>
    %12 = vector.broadcast %11 : vector<1x128xf32> to vector<256x128xf32>
    %13 = arith.addf %10, %12 : vector<256x128xf32>
    %c0_11 = arith.constant 0 : index
    %c0_12 = arith.constant 0 : index
    %14 = vector.load %arg6[%c0_11, %c0_12] : memref<256x128xf32, #tpu.memory_space<vmem>>, vector<256x128xf32>
    tpu.vector_store %arg6[%c0_11, %c0_12], %13 {strides = array<i32>} : memref<256x128xf32, #tpu.memory_space<vmem>>, vector<256x128xf32>,
    return
  }
  func.func @transform_0(%arg0: i32) -> (i32, i32) {
    %c0_i32 = arith.constant 0 : i32
    %c0_i32_0 = arith.constant 0 : i32
    return %arg0, %c0_i32 : i32, i32
  }
  func.func @transform_1(%arg0: i32) -> (i32, i32) {
    %c0_i32 = arith.constant 0 : i32
    %c0_i32_0 = arith.constant 0 : i32
    %c0_i32_1 = arith.constant 0 : i32
    return %c0_i32, %c0_i32_0 : i32, i32
  }
  func.func @transform_2(%arg0: i32) -> (i32, i32) {
    %c0_i32 = arith.constant 0 : i32
    %c0_i32_0 = arith.constant 0 : i32
    %c0_i32_1 = arith.constant 0 : i32
    return %c0_i32, %c0_i32_0 : i32, i32
  }
  func.func @transform_3(%arg0: i32) -> (i32, i32) {
    %c0_i32 = arith.constant 0 : i32
    %c0_i32_0 = arith.constant 0 : i32
    %c0_i32_1 = arith.constant 0 : i32
    return %c0_i32, %c0_i32_0 : i32, i32
  }
  func.func @transform_4(%arg0: i32) -> (i32, i32) {
    %c0_i32 = arith.constant 0 : i32
    %c0_i32_0 = arith.constant 0 : i32
    %c0_i32_1 = arith.constant 0 : i32
    return %c0_i32, %c0_i32_0 : i32, i32
  }
  func.func @transform_5(%arg0: i32) -> (i32, i32) {
    %c0_i32 = arith.constant 0 : i32
    %c0_i32_0 = arith.constant 0 : i32
    return %arg0, %c0_i32 : i32, i32
  }
}

</mosaic_0001>

<bundles_post_ra>
// kernel: tpu_custom_call.1
= control target key start
LH: loop header
LB: loop body
LE: loop exit
PB: predicated region body
PF: predicated region fallthrough
CT: control target
= control target key end

     0   :  { %10 = vsyncpa [#allocation3], 0  ;;  %s12531_s0 = inlined_call_operand.vmem [shape: bf16[256,784], index: 0, kind: input, shape index: {}]   ;;  %s12532_s1 = inlined_call_operand.hbm [shape: bf16[784,1024], index: 1, kind: input, shape index: {}]   ;;  %s12533_s2 = inlined_call_operand.hbm [shape: f32[1,1024], index: 2, kind: input, shape index: {}]   ;;  %s12534_s3 = inlined_call_operand.hbm [shape: bf16[1024,128], index: 3, kind: input, shape index: {}]   ;;  %s12535_s4 = inlined_call_operand.hbm [shape: f32[1,128], index: 4, kind: input, shape index: {}]   ;;  %s12536_s5 = inlined_call_operand.hbm [shape: f32[256,128], index: 5, kind: output, shape index: {}]  }
   0x1   :  { %11 = vsyncpa [#allocation6], 0 }
   0x2   :  { %12 = vsyncpa [#allocation9], 0 }
   0x3   :  { %13 = vsyncpa [#allocation4], 0  ;;  %s10462_s18 = smov [#allocation5]   ;;  %s10463_s20 = smov [#allocation2]  }
   0x4   :  { %s34_s19 = sshll.u32 %s10462_s18, 4  ;;  %s21_s21 = sshll.u32 %s10463_s20, 4  ;;  %s35_s19 = int_to_ptr.vmem [resolvable:$true] %s34_s19  ;;  %s10504_s21 = int_to_ptr.vmem [resolvable:$true] %s21_s21 }
   0x5   :  { %s10344_s24 = scalar_lea.hbm %s12533_s2, 128 }
   0x6   :  { %p10345_p0 = scmp.ne.s32.totalorder %s12533_s2, %s10344_s24  ;;  %p10348_p1 = scmp.lt.u32.totalorder %s10344_s24, %s12533_s2 }
   0x8   :  { %p10350_p2 = pnand %p10348_p1, %p10345_p0 }
   0xa   :  { %10353 = shalt.err (!%p10350_p2)
}
   0xb   :  { %s10354_s29 = scalar_lea.vmem %s35_s19, 128  ;;  %p10359_p4 = scmp.lt.s32.totalorder %s35_s19, %s35_s19 }
   0xc   :  { %p10355_p3 = scmp.ne.s32.totalorder %s35_s19, %s10354_s29  ;;  %p10360_p5 = scmp.lt.s32.totalorder %s10354_s29, %s10354_s29 }
   0xe   :  { %p10361_p6 = por %p10360_p5, %p10359_p4 }
  0x10   :  { %p10362_p7 = pnand %p10361_p6, %p10355_p3 }
  0x12   :  { %10365 = shalt.err (!%p10362_p7)
}
  0x13   :  { %37 = dma.hbm_to_vmem [thread:$0]  %s12533_s2, 128, %s35_s19, [#allocation6]  }
  0x14   :  { %s10366_s9 = scalar_lea.hbm %s12532_s1, 50176 }
  0x15   :  { %p10367_p8 = scmp.ne.s32.totalorder %s12532_s1, %s10366_s9  ;;  %p10370_p9 = scmp.lt.u32.totalorder %s10366_s9, %s12532_s1 }
  0x17   :  { %p10372_p10 = pnand %p10370_p9, %p10367_p8 }
  0x19   :  { %10375 = shalt.err (!%p10372_p10)
}
  0x1a   :  { %s10376_s14 = scalar_lea.vmem %s10504_s21, 50176  ;;  %p10381_p12 = scmp.lt.s32.totalorder %s10504_s21, %s10504_s21 }
  0x1b   :  { %p10377_p11 = scmp.ne.s32.totalorder %s10504_s21, %s10376_s14  ;;  %p10382_p13 = scmp.lt.s32.totalorder %s10376_s14, %s10376_s14 }
  0x1d   :  { %p10383_p0 = por %p10382_p13, %p10381_p12 }
  0x1f   :  { %p10384_p1 = pnand %p10383_p0, %p10377_p11 }
  0x21   :  { %10387 = shalt.err (!%p10384_p1)
}
  0x22   :  { %s10464_s2 = smov 512   ;;  %s10465_s15 = smov 32  }
  0x23   :  { %27 = dma.hbm_to_vmem [thread:$0]  %s12532_s1, 50176, %s10504_s21, [#allocation3], %s10464_s2, %s10464_s2, %s10465_s15  }
  0x24   :  { %s10466_s18 = smov [#allocation7]   ;;  %s10388_s23 = scalar_lea.hbm %s12534_s3, 8192 }
  0x25   :  { %s43_s19 = sshll.u32 %s10466_s18, 4  ;;  %p10389_p2 = scmp.ne.s32.totalorder %s12534_s3, %s10388_s23  ;;  %s44_s19 = int_to_ptr.vmem [resolvable:$true] %s43_s19 }
  0x26   :  { %p10392_p3 = scmp.lt.u32.totalorder %s10388_s23, %s12534_s3 }
  0x28   :  { %p10394_p4 = pnand %p10392_p3, %p10389_p2 }
  0x2a   :  { %10397 = shalt.err (!%p10394_p4)
}
  0x2b   :  { %s10398_s28 = scalar_lea.vmem %s44_s19, 8192  ;;  %p10403_p6 = scmp.lt.s32.totalorder %s44_s19, %s44_s19 }
  0x2c   :  { %p10399_p5 = scmp.ne.s32.totalorder %s44_s19, %s10398_s28  ;;  %p10404_p7 = scmp.lt.s32.totalorder %s10398_s28, %s10398_s28 }
  0x2e   :  { %p10405_p8 = por %p10404_p7, %p10403_p6 }
  0x30   :  { %p10406_p9 = pnand %p10405_p8, %p10399_p5 }
  0x32   :  { %10409 = shalt.err (!%p10406_p9)
}
  0x33   :  { %s10467_s1 = smov 64   ;;  %s10468_s21 = smov 4  }
  0x34   :  { %49 = dma.hbm_to_vmem [thread:$0]  %s12534_s3, 8192, %s44_s19, [#allocation6], %s10467_s1, %s10467_s1, %s10468_s21  }
  0x35   :  { %s10469_s6 = smov [#allocation8]   ;;  %s10410_s10 = scalar_lea.hbm %s12535_s4, 16 }
  0x36   :  { %s56_s7 = sshll.u32 %s10469_s6, 4  ;;  %p10411_p10 = scmp.ne.s32.totalorder %s12535_s4, %s10410_s10  ;;  %s57_s7 = int_to_ptr.vmem [resolvable:$true] %s56_s7 }
  0x37   :  { %p10414_p11 = scmp.lt.u32.totalorder %s10410_s10, %s12535_s4 }
  0x39   :  { %p10416_p12 = pnand %p10414_p11, %p10411_p10 }
  0x3b   :  { %10419 = shalt.err (!%p10416_p12)
}
  0x3c   :  { %s10420_s2 = scalar_lea.vmem %s57_s7, 16  ;;  %s10424_s3 = scalar_lea.vmem %s57_s7, 32 }
  0x3d   :  { %p10421_p13 = scmp.ne.s32.totalorder %s57_s7, %s10420_s2  ;;  %p10425_p0 = scmp.lt.s32.totalorder %s57_s7, %s57_s7 }
  0x3e   :  { %p10426_p1 = scmp.lt.s32.totalorder %s10424_s3, %s10420_s2 }
  0x40   :  { %p10427_p2 = por %p10426_p1, %p10425_p0 }
  0x42   :  { %p10428_p3 = pnand %p10427_p2, %p10421_p13 }
  0x44   :  { %10431 = shalt.err (!%p10428_p3)
}
  0x45   :  { %59 = dma.hbm_to_vmem [thread:$0]  %s12535_s4, 16, %s57_s7, [#allocation9]  }
  0x46   :  { %10454 = dma.done.wait [#allocation3], 50176  }
  0x47   :  { %10455 = vsyncadd [#allocation3], 4294917120 }
  0x48   :  { %10456 = dma.done.wait [#allocation6], 8320  }
  0x49   :  { %10457 = vsyncadd [#allocation6], 4294958976 }
  0x4a   :  { %10458 = dma.done.wait [#allocation9], 16  }
  0x4b   :  { %10459 = vsyncadd [#allocation9], 4294967280  ;;  %v201_v0 = vld [vmem:[#allocation2] sm:$0xff]  ;;  %v202_v2 = vld [vmem:[#allocation2 + $0x8] sm:$0xff]  ;;  %vm3155_vm0 = vcmask 130048  }
  0x4c   :  { %v205_v1 = vld [vmem:[#allocation2 + $0x20] sm:$0xff]  ;;  %v206_v4 = vld [vmem:[#allocation2 + $0x28] sm:$0xff] }
  0x4d   :  { %v8003_v3 = vcombine.high %v201_v0, %v205_v1  ;;  %v8002_v5 = vcombine.low %v201_v0, %v205_v1  ;;  %v209_v6 = vld [vmem:[#allocation2 + $0x40] sm:$0xff]  ;;  %v8005_v8 = vcombine.high %v202_v2, %v206_v4  ;;  %v8004_v9 = vcombine.low %v202_v2, %v206_v4  ;;  %v210_v11 = vld [vmem:[#allocation2 + $0x48] sm:$0xff] }
  0x4e   :  { %v213_v7 = vld [vmem:[#allocation2 + $0x60] sm:$0xff]  ;;  %v214_v12 = vld [vmem:[#allocation2 + $0x68] sm:$0xff] }
  0x4f   :  { %v8011_v10 = vcombine.high %v209_v6, %v213_v7  ;;  %v217_v13 = vld [vmem:[#allocation2 + $0x80] sm:$0xff]  ;;  %3204 = vmatprep.subr.bf16.mxu0 %v8003_v3  ;;  %v8013_v14 = vcombine.high %v210_v11, %v214_v12  ;;  %v218_v16 = vld [vmem:[#allocation2 + $0x88] sm:$0xff]  ;;  %3976 = vmatprep.subr.bf16.mxu1 %v8005_v8  ;;  %v8010_v18 = vcombine.low %v209_v6, %v213_v7 }
  0x50   :  { %v221_v15 = vld [vmem:[#allocation2 + $0xa0] sm:$0xff]  ;;  %v222_v17 = vld [vmem:[#allocation2 + $0xa8] sm:$0xff]  ;;  %3205 = vmatpush1.bf16.msra.mxu0 %v8002_v5  ;;  %3977 = vmatpush1.bf16.msra.mxu1 %v8004_v9  ;;  %v8012_v19 = vcombine.low %v210_v11, %v214_v12 }
  0x51   :  { %3206 = vmatprep.subr.bf16.mxu0 %v8011_v10  ;;  %v8019_v20 = vcombine.high %v217_v13, %v221_v15  ;;  %3978 = vmatprep.subr.bf16.mxu1 %v8013_v14  ;;  %v8021_v21 = vcombine.high %v218_v16, %v222_v17  ;;  %v225_v22 = vld [vmem:[#allocation2 + $0xc0] sm:$0xff]  ;;  %v226_v24 = vld [vmem:[#allocation2 + $0xc8] sm:$0xff]  ;;  %v8018_v26 = vcombine.low %v217_v13, %v221_v15 }
  0x52   :  { %v229_v23 = vld [vmem:[#allocation2 + $0xe0] sm:$0xff]  ;;  %v230_v25 = vld [vmem:[#allocation2 + $0xe8] sm:$0xff]  ;;  %v8020_v27 = vcombine.low %v218_v16, %v222_v17 }
  0x53   :  { %v8027_v28 = vcombine.high %v225_v22, %v229_v23  ;;  %v8029_v29 = vcombine.high %v226_v24, %v230_v25  ;;  %v233_v30 = vld [vmem:[#allocation2 + $0x100] sm:$0xff]  ;;  %v234_v32 = vld [vmem:[#allocation2 + $0x108] sm:$0xff]  ;;  %v8026_v34 = vcombine.low %v225_v22, %v229_v23  ;;  %v8028_v35 = vcombine.low %v226_v24, %v230_v25 }
  0x54   :  { %3207 = vmatpush1.bf16.msra.mxu0 %v8010_v18  ;;  %3979 = vmatpush1.bf16.msra.mxu1 %v8012_v19  ;;  %v237_v31 = vld [vmem:[#allocation2 + $0x120] sm:$0xff]  ;;  %v238_v33 = vld [vmem:[#allocation2 + $0x128] sm:$0xff] }
  0x55   :  { %3208 = vmatprep.subr.bf16.mxu0 %v8019_v20  ;;  %3980 = vmatprep.subr.bf16.mxu1 %v8021_v21  ;;  %v8035_v36 = vcombine.high %v233_v30, %v237_v31  ;;  %v8037_v37 = vcombine.high %v234_v32, %v238_v33  ;;  %v241_v38 = vld [vmem:[#allocation2 + $0x140] sm:$0xff]  ;;  %v242_v40 = vld [vmem:[#allocation2 + $0x148] sm:$0xff]  ;;  %v8034_v42 = vcombine.low %v233_v30, %v237_v31 }
  0x56   :  { %v245_v39 = vld [vmem:[#allocation2 + $0x160] sm:$0xff]  ;;  %v246_v41 = vld [vmem:[#allocation2 + $0x168] sm:$0xff]  ;;  %v8036_v43 = vcombine.low %v234_v32, %v238_v33 }
  0x57   :  { %v8043_v44 = vcombine.high %v241_v38, %v245_v39  ;;  %v8045_v45 = vcombine.high %v242_v40, %v246_v41  ;;  %v249_v46 = vld [vmem:[#allocation2 + $0x180] sm:$0xff]  ;;  %v250_v48 = vld [vmem:[#allocation2 + $0x188] sm:$0xff]  ;;  %v8042_v50 = vcombine.low %v241_v38, %v245_v39  ;;  %v8044_v51 = vcombine.low %v242_v40, %v246_v41 }
  0x58   :  { %3209 = vmatpush1.bf16.msra.mxu0 %v8018_v26  ;;  %3981 = vmatpush1.bf16.msra.mxu1 %v8020_v27  ;;  %v253_v47 = vld [vmem:[#allocation2 + $0x1a0] sm:$0xff]  ;;  %v254_v49 = vld [vmem:[#allocation2 + $0x1a8] sm:$0xff] }
  0x59   :  { %3210 = vmatprep.subr.bf16.mxu0 %v8027_v28  ;;  %3982 = vmatprep.subr.bf16.mxu1 %v8029_v29  ;;  %v8051_v52 = vcombine.high %v249_v46, %v253_v47  ;;  %v8053_v53 = vcombine.high %v250_v48, %v254_v49  ;;  %v257_v54 = vld [vmem:[#allocation2 + $0x1c0] sm:$0xff]  ;;  %v258_v57 = vld [vmem:[#allocation2 + $0x1c8] sm:$0xff]  ;;  %v8050_v59 = vcombine.low %v249_v46, %v253_v47 }
  0x5a   :  { %v261_v55 = vld [vmem:[#allocation2 + $0x1e0] sm:$0xff]  ;;  %v262_v58 = vld [vmem:[#allocation2 + $0x1e8] sm:$0xff]  ;;  %v8052_v60 = vcombine.low %v250_v48, %v254_v49 }
  0x5b   :  { %v10007_v56 = vld [vmem:[%s12531_s0 + $0x4] ss:$28 sps:$4 sm:$0xff]   ;;  %v8059_v61 = vcombine.high %v257_v54, %v261_v55  ;;  %v8061_v62 = vcombine.high %v258_v57, %v262_v58  ;;  %v266_v1 = vld [vmem:[#allocation2 + $0x208] sm:$0xff]  ;;  %v8058_v3 = vcombine.low %v257_v54, %v261_v55  ;;  %v8060_v4 = vcombine.low %v258_v57, %v262_v58 }
  0x5c   :  { %3211 = vmatpush1.bf16.msra.mxu0 %v8026_v34  ;;  %3983 = vmatpush1.bf16.msra.mxu1 %v8028_v35  ;;  %v265_v63 = vld [vmem:[#allocation2 + $0x200] sm:$0xff]  ;;  %v270_v2 = vld [vmem:[#allocation2 + $0x228] sm:$0xff] }
  0x5d   :  { %3212 = vmatprep.subr.bf16.mxu0 %v8035_v36  ;;  %3984 = vmatprep.subr.bf16.mxu1 %v8037_v37  ;;  %v269_v0 = vld [vmem:[#allocation2 + $0x220] sm:$0xff]  ;;  %v8069_v6 = vcombine.high %v266_v1, %v270_v2  ;;  %v274_v9 = vld [vmem:[#allocation2 + $0x248] sm:$0xff]  ;;  %v8068_v12 = vcombine.low %v266_v1, %v270_v2 }
  0x5e   :  { %3236 = vmatprep.mubr.bf16.mxu0 %v10007_v56  ;;  %4008 = vmatprep.mubr.bf16.mxu1 %v10007_v56  ;;  %v8067_v5 = vcombine.high %v265_v63, %v269_v0  ;;  %v273_v7 = vld [vmem:[#allocation2 + $0x240] sm:$0xff]  ;;  %v278_v10 = vld [vmem:[#allocation2 + $0x268] sm:$0xff]  ;;  %v8066_v11 = vcombine.low %v265_v63, %v269_v0 }
  0x5f   :  { %v277_v8 = vld [vmem:[#allocation2 + $0x260] sm:$0xff]  ;;  %v8077_v14 = vcombine.high %v274_v9, %v278_v10  ;;  %v282_v17 = vld [vmem:[#allocation2 + $0x288] sm:$0xff]  ;;  %v8076_v20 = vcombine.low %v274_v9, %v278_v10  ;;  %v10010_v9 = vld [vmem:[%s12531_s0 + $0x3c] ss:$28 sps:$4 sm:$0xff]  }
  0x60   :  { %3213 = vmatpush1.bf16.msra.mxu0 %v8034_v42  ;;  %3985 = vmatpush1.bf16.msra.mxu1 %v8036_v43  ;;  %v8075_v13 = vcombine.high %v273_v7, %v277_v8  ;;  %v281_v15 = vld [vmem:[#allocation2 + $0x280] sm:$0xff]  ;;  %v286_v18 = vld [vmem:[#allocation2 + $0x2a8] sm:$0xff]  ;;  %v8074_v19 = vcombine.low %v273_v7, %v277_v8 }
  0x61   :  { %3214 = vmatprep.subr.bf16.mxu0 %v8043_v44  ;;  %3986 = vmatprep.subr.bf16.mxu1 %v8045_v45  ;;  %v285_v16 = vld [vmem:[#allocation2 + $0x2a0] sm:$0xff]  ;;  %v8085_v22 = vcombine.high %v282_v17, %v286_v18  ;;  %v290_v25 = vld [vmem:[#allocation2 + $0x2c8] sm:$0xff]  ;;  %v8084_v28 = vcombine.low %v282_v17, %v286_v18 }
  0x62   :  { %v8083_v21 = vcombine.high %v281_v15, %v285_v16  ;;  %v289_v23 = vld [vmem:[#allocation2 + $0x2c0] sm:$0xff]  ;;  %v294_v26 = vld [vmem:[#allocation2 + $0x2e8] sm:$0xff]  ;;  %v8082_v27 = vcombine.low %v281_v15, %v285_v16 }
  0x63   :  { %v293_v24 = vld [vmem:[#allocation2 + $0x2e0] sm:$0xff]  ;;  %v8093_v30 = vcombine.high %v290_v25, %v294_v26  ;;  %v298_v33 = vld [vmem:[#allocation2 + $0x308] sm:$0xff]  ;;  %v8092_v36 = vcombine.low %v290_v25, %v294_v26 }
  0x64   :  { %3215 = vmatpush1.bf16.msra.mxu0 %v8042_v50  ;;  %3987 = vmatpush1.bf16.msra.mxu1 %v8044_v51  ;;  %v8091_v29 = vcombine.high %v289_v23, %v293_v24  ;;  %v297_v31 = vld [vmem:[#allocation2 + $0x300] sm:$0xff]  ;;  %v302_v34 = vld [vmem:[#allocation2 + $0x328] sm:$0xff]  ;;  %v8090_v35 = vcombine.low %v289_v23, %v293_v24 }
  0x65   :  { %3216 = vmatprep.subr.bf16.mxu0 %v8051_v52  ;;  %3988 = vmatprep.subr.bf16.mxu1 %v8053_v53  ;;  %v301_v32 = vld [vmem:[#allocation2 + $0x320] sm:$0xff]  ;;  %v8101_v38 = vcombine.high %v298_v33, %v302_v34  ;;  %v306_v41 = vld [vmem:[#allocation2 + $0x348] sm:$0xff]  ;;  %v8100_v44 = vcombine.low %v298_v33, %v302_v34  ;;  %v10013_v33 = vld [vmem:[%s12531_s0 + $0x74] ss:$28 sps:$4 sm:$0xff]  }
  0x66   :  { %v8099_v37 = vcombine.high %v297_v31, %v301_v32  ;;  %v305_v39 = vld [vmem:[#allocation2 + $0x340] sm:$0xff]  ;;  %v310_v42 = vld [vmem:[#allocation2 + $0x368] sm:$0xff]  ;;  %v8098_v43 = vcombine.low %v297_v31, %v301_v32 }
  0x67   :  { %v309_v40 = vld [vmem:[#allocation2 + $0x360] sm:$0xff]  ;;  %v8109_v46 = vcombine.high %v306_v41, %v310_v42  ;;  %v314_v49 = vld [vmem:[#allocation2 + $0x388] sm:$0xff]  ;;  %v8108_v52 = vcombine.low %v306_v41, %v310_v42 }
  0x68   :  { %3217 = vmatpush1.bf16.msra.mxu0 %v8050_v59  ;;  %3989 = vmatpush1.bf16.msra.mxu1 %v8052_v60  ;;  %v8107_v45 = vcombine.high %v305_v39, %v309_v40  ;;  %v313_v47 = vld [vmem:[#allocation2 + $0x380] sm:$0xff]  ;;  %v318_v50 = vld [vmem:[#allocation2 + $0x3a8] sm:$0xff]  ;;  %v8106_v51 = vcombine.low %v305_v39, %v309_v40 }
  0x69   :  { %3218 = vmatprep.subr.bf16.mxu0 %v8059_v61  ;;  %3990 = vmatprep.subr.bf16.mxu1 %v8061_v62  ;;  %v317_v48 = vld [vmem:[#allocation2 + $0x3a0] sm:$0xff]  ;;  %v8117_v54 = vcombine.high %v314_v49, %v318_v50  ;;  %v322_v57 = vld [vmem:[#allocation2 + $0x3c8] sm:$0xff]  ;;  %v8116_v60 = vcombine.low %v314_v49, %v318_v50 }
  0x6a   :  { %v8115_v53 = vcombine.high %v313_v47, %v317_v48  ;;  %v321_v55 = vld [vmem:[#allocation2 + $0x3c0] sm:$0xff]  ;;  %v326_v58 = vld [vmem:[#allocation2 + $0x3e8] sm:$0xff]  ;;  %v8114_v59 = vcombine.low %v313_v47, %v317_v48 }
  0x6b   :  { %v325_v56 = vld [vmem:[#allocation2 + $0x3e0] sm:$0xff]  ;;  %v8125_v62 = vcombine.high %v322_v57, %v326_v58  ;;  %v330_v1 = vld [vmem:[#allocation2 + $0x408] sm:$0xff] }
  0x6c   :  { %3219 = vmatpush1.bf16.msra.mxu0 %v8058_v3  ;;  %3991 = vmatpush1.bf16.msra.mxu1 %v8060_v4  ;;  %v8123_v61 = vcombine.high %v321_v55, %v325_v56  ;;  %v329_v63 = vld [vmem:[#allocation2 + $0x400] sm:$0xff]  ;;  %v334_v2 = vld [vmem:[#allocation2 + $0x428] sm:$0xff]  ;;  %v8122_v3 = vcombine.low %v321_v55, %v325_v56  ;;  %v8124_v4 = vcombine.low %v322_v57, %v326_v58 }
  0x6d   :  { %3220 = vmatprep.subr.bf16.mxu0 %v8067_v5  ;;  %3992 = vmatprep.subr.bf16.mxu1 %v8069_v6  ;;  %v333_v0 = vld [vmem:[#allocation2 + $0x420] sm:$0xff]  ;;  %v8133_v7 = vcombine.high %v330_v1, %v334_v2  ;;  %v8132_v16 = vcombine.low %v330_v1, %v334_v2  ;;  %v346_v17 = vld [vmem:[#allocation2 + $0x488] sm:$0xff] }
  0x6e   :  { %v8131_v5 = vcombine.high %v329_v63, %v333_v0  ;;  %v10009_v6 = vld [vmem:[%s12531_s0] ss:$28 sps:$4 sm:$0xff]   ;;  %v350_v18 = vld [vmem:[#allocation2 + $0x4a8] sm:$0xff] }
  0x6f   :  { %v337_v8 = vld [vmem:[#allocation2 + $0x440] sm:$0xff]  ;;  %v10574_v25 = vld [vmem:[#allocation2 + $0x808] sm:$0xff]  ;;  %v8149_v34 = vcombine.high %v346_v17, %v350_v18 }
  0x70   :  { %3221 = vmatpush1.bf16.msra.mxu0 %v8066_v11  ;;  %3993 = vmatpush1.bf16.msra.mxu1 %v8068_v12  ;;  %v341_v10 = vld [vmem:[#allocation2 + $0x460] sm:$0xff]  ;;  %v338_v11 = vld [vmem:[#allocation2 + $0x448] sm:$0xff] }
  0x71   :  { %3222 = vmatprep.subr.bf16.mxu0 %v8075_v13  ;;  %3994 = vmatprep.subr.bf16.mxu1 %v8077_v14  ;;  %v342_v12 = vld [vmem:[#allocation2 + $0x468] sm:$0xff]  ;;  %v8130_v13 = vcombine.low %v329_v63, %v333_v0  ;;  %v345_v14 = vld [vmem:[#allocation2 + $0x480] sm:$0xff]  ;;  %v8138_v23 = vcombine.low %v337_v8, %v341_v10 }
  0x72   :  { %v349_v15 = vld [vmem:[#allocation2 + $0x4a0] sm:$0xff]  ;;  %v10576_v26 = vld [vmem:[#allocation2 + $0x828] sm:$0xff] }
  0x73   :  { %v357_v31 = vld [vmem:[#allocation2 + $0x4e0] sm:$0xff]  ;;  %v8260_v32 = vcombine.low %v10574_v25, %v10576_v26  ;;  %v10016_v49 = vld [vmem:[%s12531_s0 + $0xac] ss:$28 sps:$4 sm:$0xff]  }
  0x74   :  { %3223 = vmatpush1.bf16.msra.mxu0 %v8074_v19  ;;  %3995 = vmatpush1.bf16.msra.mxu1 %v8076_v20  ;;  %v8139_v19 = vcombine.high %v337_v8, %v341_v10  ;;  %v8141_v20 = vcombine.high %v338_v11, %v342_v12  ;;  %v361_v41 = vld [vmem:[#allocation2 + $0x500] sm:$0xff] }
  0x75   :  { %3224 = vmatprep.subr.bf16.mxu0 %v8083_v21  ;;  %3996 = vmatprep.subr.bf16.mxu1 %v8085_v22  ;;  %v10568_v21 = vld [vmem:[#allocation2 + $0x800] sm:$0xff] }
  0x76   :  { %v10570_v22 = vld [vmem:[#allocation2 + $0x820] sm:$0xff] }
  0x77   :  { %v8258_v24 = vcombine.low %v10568_v21, %v10570_v22  ;;  %v365_v42 = vld [vmem:[#allocation2 + $0x520] sm:$0xff] }
  0x78   :  { %3225 = vmatpush1.bf16.msra.mxu0 %v8082_v27  ;;  %3997 = vmatpush1.bf16.msra.mxu1 %v8084_v28  ;;  %v10012_v27 = vld [vmem:[%s12531_s0 + $0x38] ss:$28 sps:$4 sm:$0xff]   ;;  %v8140_v28 = vcombine.low %v338_v11, %v342_v12  ;;  %v369_v47 = vld [vmem:[#allocation2 + $0x540] sm:$0xff]  ;;  %v8162_v55 = vcombine.low %v361_v41, %v365_v42 }
  0x79   :  { %3226 = vmatprep.subr.bf16.mxu0 %v8091_v29  ;;  %3998 = vmatprep.subr.bf16.mxu1 %v8093_v30  ;;  %v8147_v29 = vcombine.high %v345_v14, %v349_v15  ;;  %v353_v30 = vld [vmem:[#allocation2 + $0x4c0] sm:$0xff] }
  0x7a   :  { %v8155_v39 = vcombine.high %v353_v30, %v357_v31  ;;  %v373_v48 = vld [vmem:[#allocation2 + $0x560] sm:$0xff] }
  0x7b   :  { %v8171_v57 = vcombine.high %v369_v47, %v373_v48  ;;  %v10018_v63 = vld [vmem:[%s12531_s0 + $0xa8] ss:$28 sps:$4 sm:$0xff]   ;;  %v8170_v0 = vcombine.low %v369_v47, %v373_v48 }
  0x7c   :  { %3227 = vmatpush1.bf16.msra.mxu0 %v8090_v35  ;;  %3999 = vmatpush1.bf16.msra.mxu1 %v8092_v36  ;;  %v354_v35 = vld [vmem:[#allocation2 + $0x4c8] sm:$0xff]  ;;  %v385_v1 = vld [vmem:[#allocation2 + $0x5c0] sm:$0xff] }
  0x7d   :  { %3228 = vmatprep.subr.bf16.mxu0 %v8099_v37  ;;  %4000 = vmatprep.subr.bf16.mxu1 %v8101_v38  ;;  %v358_v36 = vld [vmem:[#allocation2 + $0x4e8] sm:$0xff]  ;;  %v8146_v37 = vcombine.low %v345_v14, %v349_v15  ;;  %v8148_v38 = vcombine.low %v346_v17, %v350_v18  ;;  %v389_v2 = vld [vmem:[#allocation2 + $0x5e0] sm:$0xff] }
  0x7e   :  { %v8157_v40 = vcombine.high %v354_v35, %v358_v36  ;;  %v8156_v50 = vcombine.low %v354_v35, %v358_v36  ;;  %v8187_v11 = vcombine.high %v385_v1, %v389_v2  ;;  %v397_v14 = vld [vmem:[#allocation2 + $0x620] sm:$0xff]  ;;  %v394_v15 = vld [vmem:[#allocation2 + $0x608] sm:$0xff]  ;;  %v8186_v18 = vcombine.low %v385_v1, %v389_v2 }
  0x7f   :  { %v10021_v17 = vld [vmem:[%s12531_s0 + $0xe0] ss:$28 sps:$4 sm:$0xff]   ;;  %v418_v48 = vld [vmem:[#allocation2 + $0x6c8] sm:$0xff] }
  0x80   :  { %3229 = vmatpush1.bf16.msra.mxu0 %v8098_v43  ;;  %4001 = vmatpush1.bf16.msra.mxu1 %v8100_v44  ;;  %v362_v43 = vld [vmem:[#allocation2 + $0x508] sm:$0xff] }
  0x81   :  { %3230 = vmatprep.subr.bf16.mxu0 %v8107_v45  ;;  %4002 = vmatprep.subr.bf16.mxu1 %v8109_v46  ;;  %v366_v44 = vld [vmem:[#allocation2 + $0x528] sm:$0xff]  ;;  %v8154_v46 = vcombine.low %v353_v30, %v357_v31 }
  0x82   :  { %v10015_v45 = vld [vmem:[%s12531_s0 + $0x70] ss:$28 sps:$4 sm:$0xff]   ;;  %v8164_v56 = vcombine.low %v362_v43, %v366_v44 }
  0x83   :  { %v406_v30 = vld [vmem:[#allocation2 + $0x668] sm:$0xff] }
  0x84   :  { %3231 = vmatpush1.bf16.msra.mxu0 %v8106_v51  ;;  %4003 = vmatpush1.bf16.msra.mxu1 %v8108_v52  ;;  %v8163_v51 = vcombine.high %v361_v41, %v365_v42  ;;  %v370_v52 = vld [vmem:[#allocation2 + $0x548] sm:$0xff]  ;;  %v10024_v41 = vld [vmem:[%s12531_s0 + $0x118] ss:$28 sps:$4 sm:$0xff]  }
  0x85   :  { %3232 = vmatprep.subr.bf16.mxu0 %v8115_v53  ;;  %4004 = vmatprep.subr.bf16.mxu1 %v8117_v54  ;;  %v374_v53 = vld [vmem:[#allocation2 + $0x568] sm:$0xff]  ;;  %v8165_v54 = vcombine.high %v362_v43, %v366_v44  ;;  %v417_v43 = vld [vmem:[#allocation2 + $0x6c0] sm:$0xff] }
  0x86   :  { %v8173_v58 = vcombine.high %v370_v52, %v374_v53  ;;  %v421_v44 = vld [vmem:[#allocation2 + $0x6e0] sm:$0xff]  ;;  %v434_v2 = vld [vmem:[#allocation2 + $0x748] sm:$0xff] }
  0x88   :  { %3233 = vmatpush1.bf16.msra.mxu0 %v8114_v59  ;;  %4005 = vmatpush1.bf16.msra.mxu1 %v8116_v60  ;;  %v377_v59 = vld [vmem:[#allocation2 + $0x580] sm:$0xff] }
  0x89   :  { %3234 = vmatprep.subr.bf16.mxu0 %v8123_v61  ;;  %4006 = vmatprep.subr.bf16.mxu1 %v8125_v62  ;;  %v381_v60 = vld [vmem:[#allocation2 + $0x5a0] sm:$0xff]  ;;  %v378_v61 = vld [vmem:[#allocation2 + $0x588] sm:$0xff] }
  0x8a   :  { %v382_v62 = vld [vmem:[#allocation2 + $0x5a8] sm:$0xff] }
  0x8b   :  { %v8181_v8 = vcombine.high %v378_v61, %v382_v62  ;;  %v8180_v10 = vcombine.low %v378_v61, %v382_v62  ;;  %v433_v61 = vld [vmem:[#allocation2 + $0x740] sm:$0xff] }
  0x8c   :  { %3235 = vmatpush1.bf16.msra.mxu0 %v8122_v3  ;;  %4007 = vmatpush1.bf16.msra.mxu1 %v8124_v4  ;;  %v10019_v3 = vld [vmem:[%s12531_s0 + $0xe4] ss:$28 sps:$4 sm:$0xff]   ;;  %v8172_v4 = vcombine.low %v370_v52, %v374_v53  ;;  %v8219_v53 = vcombine.high %v417_v43, %v421_v44 }
  0x8d   :  { %3397 = vmatprep.subr.bf16.mxu0 %v8131_v5  ;;  %4169 = vmatprep.subr.bf16.mxu1 %v8133_v7  ;;  %v8179_v5 = vcombine.high %v377_v59, %v381_v60  ;;  %v390_v7 = vld [vmem:[#allocation2 + $0x5e8] sm:$0xff]  ;;  %v437_v62 = vld [vmem:[#allocation2 + $0x760] sm:$0xff] }
  0x8f   :  { %3237 = vmatmul.mubr.bf16.vlgmr.msra.gmra.mrb[0].mxu0 %v10009_v6  ;;  %4009 = vmatmul.mubr.bf16.vlgmr.msra.gmra.mrb[0].mxu1 %v10009_v6  ;;  %v386_v6 = vld [vmem:[#allocation2 + $0x5c8] sm:$0xff] }
  0x90   :  { %3398 = vmatpush1.bf16.msra.mxu0 %v8130_v13  ;;  %4170 = vmatpush1.bf16.msra.mxu1 %v8132_v16  ;;  %v8189_v12 = vcombine.high %v386_v6, %v390_v7  ;;  %v393_v13 = vld [vmem:[#allocation2 + $0x600] sm:$0xff]  ;;  %v398_v16 = vld [vmem:[#allocation2 + $0x628] sm:$0xff] }
  0x91   :  { %3246 = vmatprep.mubr.bf16.mxu0 %v10010_v9  ;;  %4018 = vmatprep.mubr.bf16.mxu1 %v10010_v9  ;;  %v8178_v9 = vcombine.low %v377_v59, %v381_v60  ;;  %v8197_v31 = vcombine.high %v394_v15, %v398_v16  ;;  %v10027_v59 = vld [vmem:[%s12531_s0 + $0x150] ss:$28 sps:$4 sm:$0xff]   ;;  %v8218_v60 = vcombine.low %v417_v43, %v421_v44  ;;  %v10042_v43 = vld [vmem:[%s12531_s0 + $0x268] ss:$28 sps:$4 sm:$0xff]  }
  0x92   :  { %3399 = vmatprep.subr.bf16.mxu0 %v8139_v19  ;;  %4171 = vmatprep.subr.bf16.mxu1 %v8141_v20  ;;  %v401_v19 = vld [vmem:[#allocation2 + $0x640] sm:$0xff] }
  0x93   :  { %v405_v20 = vld [vmem:[#allocation2 + $0x660] sm:$0xff] }
  0x94   :  { %3400 = vmatpush1.bf16.msra.mxu0 %v8138_v23  ;;  %4172 = vmatpush1.bf16.msra.mxu1 %v8140_v28  ;;  %v10022_v23 = vld [vmem:[%s12531_s0 + $0x11c] ss:$28 sps:$4 sm:$0xff]   ;;  %v8195_v28 = vcombine.high %v393_v13, %v397_v14  ;;  %v8203_v35 = vcombine.high %v401_v19, %v405_v20  ;;  %v8202_v42 = vcombine.low %v401_v19, %v405_v20  ;;  %v450_v20 = vld [vmem:[#allocation2 + $0x7c8] sm:$0xff]  ;;  %v10043_v44 = vld [vmem:[%s12531_s0 + $0x2a4] ss:$28 sps:$4 sm:$0xff]  }
  0x95   :  { %3401 = vmatprep.subr.bf16.mxu0 %v8147_v29  ;;  %4173 = vmatprep.subr.bf16.mxu1 %v8149_v34  ;;  %v402_v29 = vld [vmem:[#allocation2 + $0x648] sm:$0xff]  ;;  %v8196_v34 = vcombine.low %v394_v15, %v398_v16  ;;  %v449_v15 = vld [vmem:[#allocation2 + $0x7c0] sm:$0xff] }
  0x96   :  { %v8205_v36 = vcombine.high %v402_v29, %v406_v30  ;;  %v453_v16 = vld [vmem:[#allocation2 + $0x7e0] sm:$0xff] }
  0x97   :  { %3247 = vmatmul.mubr.bf16.gmra.mrb[4].mxu0 %v10012_v27  ;;  %4019 = vmatmul.mubr.bf16.gmra.mrb[4].mxu1 %v10012_v27  ;;  %v8188_v27 = vcombine.low %v386_v6, %v390_v7  ;;  %v8235_v7 = vcombine.high %v433_v61, %v437_v62 }
  0x98   :  { %3256 = vmatprep.mubr.bf16.mxu0 %v10013_v33  ;;  %4028 = vmatprep.mubr.bf16.mxu1 %v10013_v33  ;;  %v8194_v33 = vcombine.low %v393_v13, %v397_v14  ;;  %v10030_v13 = vld [vmem:[%s12531_s0 + $0x188] ss:$28 sps:$4 sm:$0xff]   ;;  %v8234_v14 = vcombine.low %v433_v61, %v437_v62 }
  0x99   :  { %3402 = vmatpush1.bf16.msra.mxu0 %v8146_v37  ;;  %4174 = vmatpush1.bf16.msra.mxu1 %v8148_v38  ;;  %v409_v37 = vld [vmem:[#allocation2 + $0x680] sm:$0xff]  ;;  %v474_v62 = vld [vmem:[#allocation2 + $0x888] sm:$0xff] }
  0x9a   :  { %3403 = vmatprep.subr.bf16.mxu0 %v8155_v39  ;;  %4175 = vmatprep.subr.bf16.mxu1 %v8157_v40  ;;  %v413_v38 = vld [vmem:[#allocation2 + $0x6a0] sm:$0xff]  ;;  %v410_v39 = vld [vmem:[#allocation2 + $0x688] sm:$0xff] }
  0x9b   :  { %v414_v40 = vld [vmem:[#allocation2 + $0x6a8] sm:$0xff]  ;;  %v8211_v47 = vcombine.high %v409_v37, %v413_v38  ;;  %v477_v61 = vld [vmem:[#allocation2 + $0x8a0] sm:$0xff] }
  0x9c   :  { %v8212_v52 = vcombine.low %v410_v39, %v414_v40 }
  0x9d   :  { %3404 = vmatpush1.bf16.msra.mxu0 %v8154_v46  ;;  %4176 = vmatpush1.bf16.msra.mxu1 %v8156_v50  ;;  %v8204_v46 = vcombine.low %v402_v29, %v406_v30  ;;  %v8213_v50 = vcombine.high %v410_v39, %v414_v40  ;;  %v8251_v30 = vcombine.high %v449_v15, %v453_v16  ;;  %v10036_v39 = vld [vmem:[%s12531_s0 + $0x1f8] ss:$28 sps:$4 sm:$0xff]  }
  0x9e   :  { %3405 = vmatprep.subr.bf16.mxu0 %v8163_v51  ;;  %4177 = vmatprep.subr.bf16.mxu1 %v8165_v54  ;;  %v8210_v51 = vcombine.low %v409_v37, %v413_v38  ;;  %v8259_v37 = vcombine.high %v10568_v21, %v10570_v22  ;;  %v8261_v38 = vcombine.high %v10574_v25, %v10576_v26  ;;  %v10037_v40 = vld [vmem:[%s12531_s0 + $0x234] ss:$28 sps:$4 sm:$0xff]   ;;  %v10060_v22 = vld [vmem:[%s12531_s0 + $0x40] ss:$28 sps:$4 sm:$0xff]   ;;  %v482_v26 = vld [vmem:[#allocation2 + $0x8c8] sm:$0xff] }
  0x9f   :  { %3257 = vmatmul.mubr.bf16.gmra.mrb[8].mxu0 %v10015_v45  ;;  %4029 = vmatmul.mubr.bf16.gmra.mrb[8].mxu1 %v10015_v45  ;;  %v10025_v45 = vld [vmem:[%s12531_s0 + $0x154] ss:$28 sps:$4 sm:$0xff]   ;;  %v10061_v25 = vld [vmem:[%s12531_s0 + $0x7c] ss:$28 sps:$4 sm:$0xff]  }
  0xa0   :  { %3266 = vmatprep.mubr.bf16.mxu0 %v10016_v49  ;;  %4038 = vmatprep.mubr.bf16.mxu1 %v10016_v49  ;;  %v422_v49 = vld [vmem:[#allocation2 + $0x6e8] sm:$0xff] }
  0xa1   :  { %3406 = vmatpush1.bf16.msra.mxu0 %v8162_v55  ;;  %4178 = vmatpush1.bf16.msra.mxu1 %v8164_v56  ;;  %v8221_v54 = vcombine.high %v418_v48, %v422_v49  ;;  %v425_v55 = vld [vmem:[#allocation2 + $0x700] sm:$0xff] }
  0xa2   :  { %3407 = vmatprep.subr.bf16.mxu0 %v8171_v57  ;;  %4179 = vmatprep.subr.bf16.mxu1 %v8173_v58  ;;  %v429_v56 = vld [vmem:[#allocation2 + $0x720] sm:$0xff]  ;;  %v426_v57 = vld [vmem:[#allocation2 + $0x708] sm:$0xff] }
  0xa3   :  { %v430_v58 = vld [vmem:[#allocation2 + $0x728] sm:$0xff]  ;;  %v8227_v1 = vcombine.high %v425_v55, %v429_v56 }
  0xa4   :  { %v8228_v6 = vcombine.low %v426_v57, %v430_v58 }
  0xa5   :  { %3408 = vmatpush1.bf16.msra.mxu0 %v8170_v0  ;;  %4180 = vmatpush1.bf16.msra.mxu1 %v8172_v4  ;;  %v8220_v0 = vcombine.low %v418_v48, %v422_v49  ;;  %v8229_v4 = vcombine.high %v426_v57, %v430_v58  ;;  %v10049_v48 = vld [vmem:[%s12531_s0 + $0x314] ss:$28 sps:$4 sm:$0xff]   ;;  %v470_v57 = vld [vmem:[#allocation2 + $0x868] sm:$0xff]  ;;  %v10058_v58 = vld [vmem:[%s12531_s0 + $0x44] ss:$28 sps:$4 sm:$0xff]  }
  0xa6   :  { %3409 = vmatprep.subr.bf16.mxu0 %v8179_v5  ;;  %4181 = vmatprep.subr.bf16.mxu1 %v8181_v8  ;;  %v8226_v5 = vcombine.low %v425_v55, %v429_v56  ;;  %v10051_v49 = vld [vmem:[%s12531_s0 + $0x310] ss:$28 sps:$4 sm:$0xff]   ;;  %v469_v55 = vld [vmem:[#allocation2 + $0x860] sm:$0xff] }
  0xa7   :  { %3267 = vmatmul.mubr.bf16.gmra.mrb[12].mxu0 %v10018_v63  ;;  %4039 = vmatmul.mubr.bf16.gmra.mrb[12].mxu1 %v10018_v63  ;;  %v10028_v63 = vld [vmem:[%s12531_s0 + $0x18c] ss:$28 sps:$4 sm:$0xff]  }
  0xa8   :  { %3276 = vmatprep.mubr.bf16.mxu0 %v10019_v3  ;;  %4048 = vmatprep.mubr.bf16.mxu1 %v10019_v3  ;;  %v438_v3 = vld [vmem:[#allocation2 + $0x768] sm:$0xff] }
  0xa9   :  { %3410 = vmatpush1.bf16.msra.mxu0 %v8178_v9  ;;  %4182 = vmatpush1.bf16.msra.mxu1 %v8180_v10  ;;  %v8237_v8 = vcombine.high %v434_v2, %v438_v3  ;;  %v441_v9 = vld [vmem:[#allocation2 + $0x780] sm:$0xff]  ;;  %v466_v56 = vld [vmem:[#allocation2 + $0x848] sm:$0xff] }
  0xaa   :  { %3411 = vmatprep.subr.bf16.mxu0 %v8187_v11  ;;  %4183 = vmatprep.subr.bf16.mxu1 %v8189_v12  ;;  %v445_v10 = vld [vmem:[#allocation2 + $0x7a0] sm:$0xff]  ;;  %v442_v11 = vld [vmem:[#allocation2 + $0x788] sm:$0xff] }
  0xab   :  { %v446_v12 = vld [vmem:[#allocation2 + $0x7a8] sm:$0xff]  ;;  %v8243_v19 = vcombine.high %v441_v9, %v445_v10 }
  0xac   :  { %v8244_v29 = vcombine.low %v442_v11, %v446_v12 }
  0xad   :  { %3412 = vmatpush1.bf16.msra.mxu0 %v8186_v18  ;;  %4184 = vmatpush1.bf16.msra.mxu1 %v8188_v27  ;;  %v8236_v18 = vcombine.low %v434_v2, %v438_v3  ;;  %v8245_v27 = vcombine.high %v442_v11, %v446_v12  ;;  %v10682_v2 = vld [vmem:[#allocation2 + $0xc20] sm:$0xff] }
  0xae   :  { %3413 = vmatprep.subr.bf16.mxu0 %v8195_v28  ;;  %4185 = vmatprep.subr.bf16.mxu1 %v8197_v31  ;;  %v8242_v28 = vcombine.low %v441_v9, %v445_v10  ;;  %v485_v10 = vld [vmem:[#allocation2 + $0x8e0] sm:$0xff] }
  0xaf   :  { %3277 = vmatmul.mubr.bf16.gmra.mrb[16].mxu0 %v10021_v17  ;;  %4049 = vmatmul.mubr.bf16.gmra.mrb[16].mxu1 %v10021_v17  ;;  %v10031_v17 = vld [vmem:[%s12531_s0 + $0x1c4] ss:$28 sps:$4 sm:$0xff]  }
  0xb0   :  { %3286 = vmatprep.mubr.bf16.mxu0 %v10022_v23  ;;  %4058 = vmatprep.mubr.bf16.mxu1 %v10022_v23  ;;  %v454_v23 = vld [vmem:[#allocation2 + $0x7e8] sm:$0xff] }
  0xb1   :  { %3414 = vmatpush1.bf16.msra.mxu0 %v8194_v33  ;;  %4186 = vmatpush1.bf16.msra.mxu1 %v8196_v34  ;;  %v8253_v31 = vcombine.high %v450_v20, %v454_v23  ;;  %v10033_v33 = vld [vmem:[%s12531_s0 + $0x1c0] ss:$28 sps:$4 sm:$0xff]   ;;  %v8250_v34 = vcombine.low %v449_v15, %v453_v16 }
  0xb2   :  { %3415 = vmatprep.subr.bf16.mxu0 %v8203_v35  ;;  %4187 = vmatprep.subr.bf16.mxu1 %v8205_v36  ;;  %v10034_v35 = vld [vmem:[%s12531_s0 + $0x1fc] ss:$28 sps:$4 sm:$0xff]   ;;  %v8252_v36 = vcombine.low %v450_v20, %v454_v23  ;;  %v489_v15 = vld [vmem:[#allocation2 + $0x900] sm:$0xff] }
  0xb3   :  { %v493_v16 = vld [vmem:[#allocation2 + $0x920] sm:$0xff] }
  0xb4   :  { %v8291_v23 = vcombine.high %v489_v15, %v493_v16 }
  0xb5   :  { %3416 = vmatpush1.bf16.msra.mxu0 %v8202_v42  ;;  %4188 = vmatpush1.bf16.msra.mxu1 %v8204_v46  ;;  %v10040_v42 = vld [vmem:[%s12531_s0 + $0x26c] ss:$28 sps:$4 sm:$0xff]   ;;  %v10046_v46 = vld [vmem:[%s12531_s0 + $0x2dc] ss:$28 sps:$4 sm:$0xff]  }
  0xb6   :  { %3417 = vmatprep.subr.bf16.mxu0 %v8211_v47  ;;  %4189 = vmatprep.subr.bf16.mxu1 %v8213_v50  ;;  %v10048_v47 = vld [vmem:[%s12531_s0 + $0x2d8] ss:$28 sps:$4 sm:$0xff]   ;;  %v10052_v50 = vld [vmem:[%s12531_s0 + $0x34c] ss:$28 sps:$4 sm:$0xff]  }
  0xb7   :  { %3287 = vmatmul.mubr.bf16.gmra.mrb[20].mxu0 %v10024_v41  ;;  %4059 = vmatmul.mubr.bf16.gmra.mrb[20].mxu1 %v10024_v41  ;;  %v10039_v41 = vld [vmem:[%s12531_s0 + $0x230] ss:$28 sps:$4 sm:$0xff]  }
  0xb8   :  { %3296 = vmatprep.mubr.bf16.mxu0 %v10025_v45  ;;  %4068 = vmatprep.mubr.bf16.mxu1 %v10025_v45  ;;  %v10045_v45 = vld [vmem:[%s12531_s0 + $0x2a0] ss:$28 sps:$4 sm:$0xff]  }
  0xb9   :  { %3418 = vmatpush1.bf16.msra.mxu0 %v8210_v51  ;;  %4190 = vmatpush1.bf16.msra.mxu1 %v8212_v52  ;;  %v10054_v51 = vld [vmem:[%s12531_s0 + $0x348] ss:$28 sps:$4 sm:$0xff]  }
  0xba   :  { %3419 = vmatprep.subr.bf16.mxu0 %v8219_v53  ;;  %4191 = vmatprep.subr.bf16.mxu1 %v8221_v54  ;;  %v10057_v52 = vld [vmem:[%s12531_s0 + $0xc] ss:$28 sps:$4 sm:$0xff]   ;;  %v465_v54 = vld [vmem:[#allocation2 + $0x840] sm:$0xff] }
  0xbb   :  { %v10055_v53 = vld [vmem:[%s12531_s0 + $0x8] ss:$28 sps:$4 sm:$0xff]   ;;  %v8266_v3 = vcombine.low %v465_v54, %v469_v55 }
  0xbd   :  { %3420 = vmatpush1.bf16.msra.mxu0 %v8218_v60  ;;  %4192 = vmatpush1.bf16.msra.mxu1 %v8220_v0  ;;  %v473_v60 = vld [vmem:[#allocation2 + $0x880] sm:$0xff]  ;;  %v478_v0 = vld [vmem:[#allocation2 + $0x8a8] sm:$0xff] }
  0xbe   :  { %3421 = vmatprep.subr.bf16.mxu0 %v8227_v1  ;;  %4193 = vmatprep.subr.bf16.mxu1 %v8229_v4  ;;  %v10680_v1 = vld [vmem:[#allocation2 + $0xc00] sm:$0xff]  ;;  %v8277_v21 = vcombine.high %v474_v62, %v478_v0  ;;  %v8274_v11 = vcombine.low %v473_v60, %v477_v61  ;;  %v8276_v12 = vcombine.low %v474_v62, %v478_v0 }
  0xbf   :  { %3297 = vmatmul.mubr.bf16.gmra.mrb[24].mxu0 %v10027_v59  ;;  %4069 = vmatmul.mubr.bf16.gmra.mrb[24].mxu1 %v10027_v59  ;;  %v8267_v59 = vcombine.high %v465_v54, %v469_v55  ;;  %v8386_v4 = vcombine.low %v10680_v1, %v10682_v2  ;;  %v10069_v0 = vld [vmem:[%s12531_s0 + $0xe8] ss:$28 sps:$4 sm:$0xff]  }
  0xc0   :  { %3306 = vmatprep.mubr.bf16.mxu0 %v10028_v63  ;;  %4078 = vmatprep.mubr.bf16.mxu1 %v10028_v63  ;;  %v8269_v63 = vcombine.high %v466_v56, %v470_v57 }
  0xc1   :  { %3422 = vmatpush1.bf16.msra.mxu0 %v8226_v5  ;;  %4194 = vmatpush1.bf16.msra.mxu1 %v8228_v6  ;;  %v10689_v5 = vld [vmem:[#allocation2 + $0xc08] sm:$0xff] }
  0xc2   :  { %3423 = vmatprep.subr.bf16.mxu0 %v8235_v7  ;;  %4195 = vmatprep.subr.bf16.mxu1 %v8237_v8  ;;  %v10691_v6 = vld [vmem:[#allocation2 + $0xc28] sm:$0xff]  ;;  %v8268_v7 = vcombine.low %v466_v56, %v470_v57  ;;  %v8275_v8 = vcombine.high %v473_v60, %v477_v61  ;;  %v521_v57 = vld [vmem:[#allocation2 + $0xa00] sm:$0xff] }
  0xc3   :  { %v8388_v9 = vcombine.low %v10689_v5, %v10691_v6  ;;  %v526_v60 = vld [vmem:[#allocation2 + $0xa28] sm:$0xff] }
  0xc5   :  { %3424 = vmatpush1.bf16.msra.mxu0 %v8234_v14  ;;  %4196 = vmatpush1.bf16.msra.mxu1 %v8236_v18  ;;  %v494_v18 = vld [vmem:[#allocation2 + $0x928] sm:$0xff] }
  0xc6   :  { %3425 = vmatprep.subr.bf16.mxu0 %v8243_v19  ;;  %4197 = vmatprep.subr.bf16.mxu1 %v8245_v27  ;;  %v10063_v27 = vld [vmem:[%s12531_s0 + $0x78] ss:$28 sps:$4 sm:$0xff]  }
  0xc7   :  { %3307 = vmatmul.mubr.bf16.gmra.mrb[28].mxu0 %v10030_v13  ;;  %4079 = vmatmul.mubr.bf16.gmra.mrb[28].mxu1 %v10030_v13 }
  0xc8   :  { %3316 = vmatprep.mubr.bf16.mxu0 %v10031_v17  ;;  %4088 = vmatprep.mubr.bf16.mxu1 %v10031_v17  ;;  %v490_v17 = vld [vmem:[#allocation2 + $0x908] sm:$0xff] }
  0xc9   :  { %3426 = vmatpush1.bf16.msra.mxu0 %v8242_v28  ;;  %4198 = vmatpush1.bf16.msra.mxu1 %v8244_v29  ;;  %v8293_v28 = vcombine.high %v490_v17, %v494_v18  ;;  %v497_v29 = vld [vmem:[#allocation2 + $0x940] sm:$0xff] }
  0xca   :  { %3427 = vmatprep.subr.bf16.mxu0 %v8251_v30  ;;  %4199 = vmatprep.subr.bf16.mxu1 %v8253_v31  ;;  %v501_v30 = vld [vmem:[#allocation2 + $0x960] sm:$0xff]  ;;  %v10064_v31 = vld [vmem:[%s12531_s0 + $0xb4] ss:$28 sps:$4 sm:$0xff]  }
  0xcd   :  { %3428 = vmatpush1.bf16.msra.mxu0 %v8250_v34  ;;  %4200 = vmatpush1.bf16.msra.mxu1 %v8252_v36  ;;  %v502_v34 = vld [vmem:[#allocation2 + $0x968] sm:$0xff]  ;;  %v8292_v36 = vcombine.low %v490_v17, %v494_v18  ;;  %v10072_v18 = vld [vmem:[%s12531_s0 + $0x120] ss:$28 sps:$4 sm:$0xff]  }
  0xce   :  { %3590 = vmatprep.subr.bf16.mxu0 %v8259_v37  ;;  %4362 = vmatprep.subr.bf16.mxu1 %v8261_v38  ;;  %v8299_v37 = vcombine.high %v497_v29, %v501_v30 }
  0xcf   :  { %3317 = vmatmul.mubr.bf16.gmra.mrb[32].mxu0 %v10033_v33  ;;  %4089 = vmatmul.mubr.bf16.gmra.mrb[32].mxu1 %v10033_v33  ;;  %v498_v33 = vld [vmem:[#allocation2 + $0x948] sm:$0xff] }
  0xd0   :  { %3326 = vmatprep.mubr.bf16.mxu0 %v10034_v35  ;;  %4098 = vmatprep.mubr.bf16.mxu1 %v10034_v35  ;;  %v8290_v35 = vcombine.low %v489_v15, %v493_v16  ;;  %v8301_v38 = vcombine.high %v498_v33, %v502_v34 }
  0xd7   :  { %3327 = vmatmul.mubr.bf16.gmra.mrb[36].mxu0 %v10036_v39  ;;  %4099 = vmatmul.mubr.bf16.gmra.mrb[36].mxu1 %v10036_v39  ;;  %v505_v39 = vld [vmem:[#allocation2 + $0x980] sm:$0xff] }
  0xd8   :  { %3336 = vmatprep.mubr.bf16.mxu0 %v10037_v40  ;;  %4108 = vmatprep.mubr.bf16.mxu1 %v10037_v40  ;;  %v509_v40 = vld [vmem:[#allocation2 + $0x9a0] sm:$0xff] }
  0xdf   :  { %3337 = vmatmul.mubr.bf16.gmra.mrb[40].mxu0 %v10039_v41  ;;  %4109 = vmatmul.mubr.bf16.gmra.mrb[40].mxu1 %v10039_v41  ;;  %v506_v41 = vld [vmem:[#allocation2 + $0x988] sm:$0xff] }
  0xe0   :  { %3346 = vmatprep.mubr.bf16.mxu0 %v10040_v42  ;;  %4118 = vmatprep.mubr.bf16.mxu1 %v10040_v42  ;;  %v510_v42 = vld [vmem:[#allocation2 + $0x9a8] sm:$0xff] }
  0xe1   :  { %v8308_v54 = vcombine.low %v506_v41, %v510_v42 }
  0xe7   :  { %3347 = vmatmul.mubr.bf16.gmra.mrb[44].mxu0 %v10042_v43  ;;  %4119 = vmatmul.mubr.bf16.gmra.mrb[44].mxu1 %v10042_v43  ;;  %v8298_v43 = vcombine.low %v497_v29, %v501_v30  ;;  %v550_v29 = vld [vmem:[#allocation2 + $0xae8] sm:$0xff] }
  0xe8   :  { %3356 = vmatprep.mubr.bf16.mxu0 %v10043_v44  ;;  %4128 = vmatprep.mubr.bf16.mxu1 %v10043_v44  ;;  %v8300_v44 = vcombine.low %v498_v33, %v502_v34 }
  0xef   :  { %3357 = vmatmul.mubr.bf16.gmra.mrb[48].mxu0 %v10045_v45  ;;  %4129 = vmatmul.mubr.bf16.gmra.mrb[48].mxu1 %v10045_v45  ;;  %v8307_v45 = vcombine.high %v505_v39, %v509_v40 }
  0xf0   :  { %3366 = vmatprep.mubr.bf16.mxu0 %v10046_v46  ;;  %4138 = vmatprep.mubr.bf16.mxu1 %v10046_v46  ;;  %v10066_v46 = vld [vmem:[%s12531_s0 + $0xb0] ss:$28 sps:$4 sm:$0xff]  }
  0xf7   :  { %3367 = vmatmul.mubr.bf16.gmra.mrb[52].mxu0 %v10048_v47  ;;  %4139 = vmatmul.mubr.bf16.gmra.mrb[52].mxu1 %v10048_v47  ;;  %v8309_v47 = vcombine.high %v506_v41, %v510_v42  ;;  %v10075_v42 = vld [vmem:[%s12531_s0 + $0x158] ss:$28 sps:$4 sm:$0xff]  }
  0xf8   :  { %3376 = vmatprep.mubr.bf16.mxu0 %v10049_v48  ;;  %4148 = vmatprep.mubr.bf16.mxu1 %v10049_v48  ;;  %v513_v48 = vld [vmem:[#allocation2 + $0x9c0] sm:$0xff] }
  0xff   :  { %3377 = vmatmul.mubr.bf16.gmra.mrb[56].mxu0 %v10051_v49  ;;  %4149 = vmatmul.mubr.bf16.gmra.mrb[56].mxu1 %v10051_v49  ;;  %v517_v49 = vld [vmem:[#allocation2 + $0x9e0] sm:$0xff] }
 0x100   :  { %3386 = vmatprep.mubr.bf16.mxu0 %v10052_v50  ;;  %4158 = vmatprep.mubr.bf16.mxu1 %v10052_v50  ;;  %v10067_v50 = vld [vmem:[%s12531_s0 + $0xec] ss:$28 sps:$4 sm:$0xff]   ;;  %v8315_v55 = vcombine.high %v513_v48, %v517_v49  ;;  %v8314_v61 = vcombine.low %v513_v48, %v517_v49 }
 0x101   :  { %v566_v48 = vld [vmem:[#allocation2 + $0xb68] sm:$0xff] }
 0x107   :  { %3387 = vmatmul.mubr.bf16.gmra.mrb[60].mxu0 %v10054_v51  ;;  %4159 = vmatmul.mubr.bf16.gmra.mrb[60].mxu1 %v10054_v51  ;;  %v514_v51 = vld [vmem:[#allocation2 + $0x9c8] sm:$0xff] }
 0x108   :  { %3429 = vmatprep.mubr.bf16.mxu0 %v10057_v52  ;;  %4201 = vmatprep.mubr.bf16.mxu1 %v10057_v52  ;;  %v518_v52 = vld [vmem:[#allocation2 + $0x9e8] sm:$0xff] }
 0x109   :  { %v8317_v56 = vcombine.high %v514_v51, %v518_v52  ;;  %v8316_v62 = vcombine.low %v514_v51, %v518_v52 }
 0x10f   :  { %3430 = vmatmul.mubr.bf16.vlgmr.msra.gmra.mrb[0].mxu0 %v10055_v53  ;;  %4202 = vmatmul.mubr.bf16.vlgmr.msra.gmra.mrb[0].mxu1 %v10055_v53  ;;  %v8306_v53 = vcombine.low %v505_v39, %v509_v40 }
 0x110   :  { %3591 = vmatpush1.bf16.msra.mxu0 %v8258_v24  ;;  %4363 = vmatpush1.bf16.msra.mxu1 %v8260_v32  ;;  %v481_v24 = vld [vmem:[#allocation2 + $0x8c0] sm:$0xff]  ;;  %v486_v32 = vld [vmem:[#allocation2 + $0x8e8] sm:$0xff] }
 0x111   :  { %3439 = vmatprep.mubr.bf16.mxu0 %v10058_v58  ;;  %4211 = vmatprep.mubr.bf16.mxu1 %v10058_v58  ;;  %v8283_v13 = vcombine.high %v481_v24, %v485_v10  ;;  %v8285_v14 = vcombine.high %v482_v26, %v486_v32  ;;  %v8282_v19 = vcombine.low %v481_v24, %v485_v10  ;;  %v525_v58 = vld [vmem:[#allocation2 + $0xa20] sm:$0xff]  ;;  %v534_v24 = vld [vmem:[#allocation2 + $0xa68] sm:$0xff] }
 0x112   :  { %3592 = vmatprep.subr.bf16.mxu0 %v8267_v59  ;;  %4364 = vmatprep.subr.bf16.mxu1 %v8269_v63  ;;  %v8284_v20 = vcombine.low %v482_v26, %v486_v32  ;;  %v522_v59 = vld [vmem:[#allocation2 + $0xa08] sm:$0xff]  ;;  %v8323_v63 = vcombine.high %v521_v57, %v525_v58  ;;  %v8322_v10 = vcombine.low %v521_v57, %v525_v58 }
 0x114   :  { %3593 = vmatpush1.bf16.msra.mxu0 %v8266_v3  ;;  %4365 = vmatpush1.bf16.msra.mxu1 %v8268_v7  ;;  %v8325_v3 = vcombine.high %v522_v59, %v526_v60  ;;  %v529_v7 = vld [vmem:[#allocation2 + $0xa40] sm:$0xff] }
 0x115   :  { %3594 = vmatprep.subr.bf16.mxu0 %v8275_v8  ;;  %4366 = vmatprep.subr.bf16.mxu1 %v8277_v21  ;;  %v533_v8 = vld [vmem:[#allocation2 + $0xa60] sm:$0xff] }
 0x116   :  { %v10070_v21 = vld [vmem:[%s12531_s0 + $0x124] ss:$28 sps:$4 sm:$0xff]   ;;  %v8331_v26 = vcombine.high %v529_v7, %v533_v8  ;;  %v8330_v15 = vcombine.low %v529_v7, %v533_v8  ;;  %v582_v7 = vld [vmem:[#allocation2 + $0xbe8] sm:$0xff] }
 0x117   :  { %3440 = vmatmul.mubr.bf16.gmra.mrb[4].mxu0 %v10060_v22  ;;  %4212 = vmatmul.mubr.bf16.gmra.mrb[4].mxu1 %v10060_v22  ;;  %v530_v22 = vld [vmem:[#allocation2 + $0xa48] sm:$0xff] }
 0x118   :  { %3449 = vmatprep.mubr.bf16.mxu0 %v10061_v25  ;;  %4221 = vmatprep.mubr.bf16.mxu1 %v10061_v25  ;;  %v8324_v25 = vcombine.low %v522_v59, %v526_v60  ;;  %v8333_v32 = vcombine.high %v530_v22, %v534_v24  ;;  %v8332_v16 = vcombine.low %v530_v22, %v534_v24  ;;  %v10078_v60 = vld [vmem:[%s12531_s0 + $0x190] ss:$28 sps:$4 sm:$0xff]  }
 0x119   :  { %3595 = vmatpush1.bf16.msra.mxu0 %v8274_v11  ;;  %4367 = vmatpush1.bf16.msra.mxu1 %v8276_v12  ;;  %v537_v11 = vld [vmem:[#allocation2 + $0xa80] sm:$0xff] }
 0x11a   :  { %3596 = vmatprep.subr.bf16.mxu0 %v8283_v13  ;;  %4368 = vmatprep.subr.bf16.mxu1 %v8285_v14  ;;  %v541_v12 = vld [vmem:[#allocation2 + $0xaa0] sm:$0xff]  ;;  %v538_v13 = vld [vmem:[#allocation2 + $0xa88] sm:$0xff] }
 0x11b   :  { %v542_v14 = vld [vmem:[#allocation2 + $0xaa8] sm:$0xff]  ;;  %v8339_v17 = vcombine.high %v537_v11, %v541_v12  ;;  %v8338_v30 = vcombine.low %v537_v11, %v541_v12  ;;  %v8389_v11 = vcombine.high %v10689_v5, %v10691_v6  ;;  %v10082_v12 = vld [vmem:[%s12531_s0 + $0x204] ss:$28 sps:$4 sm:$0xff]  }
 0x11c   :  { %v10109_v5 = vld [vmem:[%s12531_s0 + $0x84] ss:$28 sps:$4 sm:$0xff]  }
 0x11d   :  { %3597 = vmatpush1.bf16.msra.mxu0 %v8282_v19  ;;  %4369 = vmatpush1.bf16.msra.mxu1 %v8284_v20  ;;  %v8341_v19 = vcombine.high %v538_v13, %v542_v14  ;;  %v545_v20 = vld [vmem:[#allocation2 + $0xac0] sm:$0xff] }
 0x11e   :  { %3598 = vmatprep.subr.bf16.mxu0 %v8291_v23  ;;  %4370 = vmatprep.subr.bf16.mxu1 %v8293_v28  ;;  %v549_v23 = vld [vmem:[#allocation2 + $0xae0] sm:$0xff]  ;;  %v546_v28 = vld [vmem:[#allocation2 + $0xac8] sm:$0xff] }
 0x11f   :  { %3450 = vmatmul.mubr.bf16.gmra.mrb[8].mxu0 %v10063_v27  ;;  %4222 = vmatmul.mubr.bf16.gmra.mrb[8].mxu1 %v10063_v27  ;;  %v10073_v27 = vld [vmem:[%s12531_s0 + $0x15c] ss:$28 sps:$4 sm:$0xff]   ;;  %v8347_v33 = vcombine.high %v545_v20, %v549_v23  ;;  %v8349_v34 = vcombine.high %v546_v28, %v550_v29  ;;  %v8346_v39 = vcombine.low %v545_v20, %v549_v23  ;;  %v10094_v20 = vld [vmem:[%s12531_s0 + $0x2e4] ss:$28 sps:$4 sm:$0xff]  }
 0x120   :  { %3459 = vmatprep.mubr.bf16.mxu0 %v10064_v31  ;;  %4231 = vmatprep.mubr.bf16.mxu1 %v10064_v31  ;;  %v8340_v31 = vcombine.low %v538_v13, %v542_v14  ;;  %v8348_v40 = vcombine.low %v546_v28, %v550_v29  ;;  %v10084_v13 = vld [vmem:[%s12531_s0 + $0x200] ss:$28 sps:$4 sm:$0xff]   ;;  %v10099_v28 = vld [vmem:[%s12531_s0 + $0x318] ss:$28 sps:$4 sm:$0xff]  }
 0x121   :  { %3599 = vmatpush1.bf16.msra.mxu0 %v8290_v35  ;;  %4371 = vmatpush1.bf16.msra.mxu1 %v8292_v36  ;;  %v553_v35 = vld [vmem:[#allocation2 + $0xb00] sm:$0xff]  ;;  %v10085_v14 = vld [vmem:[%s12531_s0 + $0x23c] ss:$28 sps:$4 sm:$0xff]   ;;  %v10100_v29 = vld [vmem:[%s12531_s0 + $0x354] ss:$28 sps:$4 sm:$0xff]  }
 0x122   :  { %3600 = vmatprep.subr.bf16.mxu0 %v8299_v37  ;;  %4372 = vmatprep.subr.bf16.mxu1 %v8301_v38  ;;  %v557_v36 = vld [vmem:[#allocation2 + $0xb20] sm:$0xff]  ;;  %v554_v37 = vld [vmem:[#allocation2 + $0xb08] sm:$0xff] }
 0x123   :  { %v558_v38 = vld [vmem:[#allocation2 + $0xb28] sm:$0xff]  ;;  %v8355_v41 = vcombine.high %v553_v35, %v557_v36  ;;  %v8354_v49 = vcombine.low %v553_v35, %v557_v36  ;;  %v10096_v23 = vld [vmem:[%s12531_s0 + $0x2e0] ss:$28 sps:$4 sm:$0xff]   ;;  %v10801_v35 = vld [vmem:[#allocation2 + $0x10] sm:$0xff] }
 0x124   :  { %v10803_v36 = vld [vmem:[#allocation2 + $0x30] sm:$0xff]  ;;  %v10111_v6 = vld [vmem:[%s12531_s0 + $0x80] ss:$28 sps:$4 sm:$0xff]  }
 0x125   :  { %3601 = vmatpush1.bf16.msra.mxu0 %v8298_v43  ;;  %4373 = vmatpush1.bf16.msra.mxu1 %v8300_v44  ;;  %v8357_v43 = vcombine.high %v554_v37, %v558_v38  ;;  %v561_v44 = vld [vmem:[#allocation2 + $0xb40] sm:$0xff] }
 0x126   :  { %3602 = vmatprep.subr.bf16.mxu0 %v8307_v45  ;;  %4374 = vmatprep.subr.bf16.mxu1 %v8309_v47  ;;  %v565_v45 = vld [vmem:[#allocation2 + $0xb60] sm:$0xff]  ;;  %v562_v47 = vld [vmem:[#allocation2 + $0xb48] sm:$0xff] }
 0x127   :  { %3460 = vmatmul.mubr.bf16.gmra.mrb[12].mxu0 %v10066_v46  ;;  %4232 = vmatmul.mubr.bf16.gmra.mrb[12].mxu1 %v10066_v46  ;;  %v10076_v46 = vld [vmem:[%s12531_s0 + $0x194] ss:$28 sps:$4 sm:$0xff]   ;;  %v8363_v51 = vcombine.high %v561_v44, %v565_v45  ;;  %v8365_v52 = vcombine.high %v562_v47, %v566_v48  ;;  %v8362_v57 = vcombine.low %v561_v44, %v565_v45  ;;  %v10118_v44 = vld [vmem:[%s12531_s0 + $0x12c] ss:$28 sps:$4 sm:$0xff]  }
 0x128   :  { %3469 = vmatprep.mubr.bf16.mxu0 %v10067_v50  ;;  %4241 = vmatprep.mubr.bf16.mxu1 %v10067_v50  ;;  %v8356_v50 = vcombine.low %v554_v37, %v558_v38  ;;  %v8364_v58 = vcombine.low %v562_v47, %v566_v48  ;;  %v10805_v37 = vld [vmem:[#allocation2 + $0x18] sm:$0xff]  ;;  %v8006_v38 = vcombine.low %v10801_v35, %v10803_v36  ;;  %v10120_v45 = vld [vmem:[%s12531_s0 + $0x128] ss:$28 sps:$4 sm:$0xff]  }
 0x129   :  { %3603 = vmatpush1.bf16.msra.mxu0 %v8306_v53  ;;  %4375 = vmatpush1.bf16.msra.mxu1 %v8308_v54  ;;  %v569_v53 = vld [vmem:[#allocation2 + $0xb80] sm:$0xff]  ;;  %v10124_v48 = vld [vmem:[%s12531_s0 + $0x19c] ss:$28 sps:$4 sm:$0xff]  }
 0x12a   :  { %3604 = vmatprep.subr.bf16.mxu0 %v8315_v55  ;;  %4376 = vmatprep.subr.bf16.mxu1 %v8317_v56  ;;  %v573_v54 = vld [vmem:[#allocation2 + $0xba0] sm:$0xff]  ;;  %v570_v55 = vld [vmem:[#allocation2 + $0xb88] sm:$0xff] }
 0x12b   :  { %v574_v56 = vld [vmem:[#allocation2 + $0xba8] sm:$0xff]  ;;  %v8371_v59 = vcombine.high %v569_v53, %v573_v54  ;;  %v8370_v8 = vcombine.low %v569_v53, %v573_v54  ;;  %v10123_v47 = vld [vmem:[%s12531_s0 + $0x160] ss:$28 sps:$4 sm:$0xff]  }
 0x12c   :  { %v10132_v53 = vld [vmem:[%s12531_s0 + $0x208] ss:$28 sps:$4 sm:$0xff]  }
 0x12d   :  { %3605 = vmatpush1.bf16.msra.mxu0 %v8314_v61  ;;  %4377 = vmatpush1.bf16.msra.mxu1 %v8316_v62  ;;  %v8373_v61 = vcombine.high %v570_v55, %v574_v56  ;;  %v577_v62 = vld [vmem:[#allocation2 + $0xbc0] sm:$0xff] }
 0x12e   :  { %3606 = vmatprep.subr.bf16.mxu0 %v8323_v63  ;;  %4378 = vmatprep.subr.bf16.mxu1 %v8325_v3  ;;  %v581_v63 = vld [vmem:[#allocation2 + $0xbe0] sm:$0xff]  ;;  %v578_v3 = vld [vmem:[#allocation2 + $0xbc8] sm:$0xff] }
 0x12f   :  { %3470 = vmatmul.mubr.bf16.gmra.mrb[16].mxu0 %v10069_v0  ;;  %4242 = vmatmul.mubr.bf16.gmra.mrb[16].mxu1 %v10069_v0  ;;  %v10079_v0 = vld [vmem:[%s12531_s0 + $0x1cc] ss:$28 sps:$4 sm:$0xff]   ;;  %v8379_v22 = vcombine.high %v577_v62, %v581_v63  ;;  %v8381_v24 = vcombine.high %v578_v3, %v582_v7  ;;  %v10133_v54 = vld [vmem:[%s12531_s0 + $0x244] ss:$28 sps:$4 sm:$0xff]  }
 0x130   :  { %3479 = vmatprep.mubr.bf16.mxu0 %v10070_v21  ;;  %4251 = vmatprep.mubr.bf16.mxu1 %v10070_v21  ;;  %v8372_v21 = vcombine.low %v570_v55, %v574_v56  ;;  %v10135_v55 = vld [vmem:[%s12531_s0 + $0x240] ss:$28 sps:$4 sm:$0xff]  }
 0x131   :  { %3607 = vmatpush1.bf16.msra.mxu0 %v8322_v10  ;;  %4379 = vmatpush1.bf16.msra.mxu1 %v8324_v25  ;;  %v8378_v10 = vcombine.low %v577_v62, %v581_v63  ;;  %v8380_v25 = vcombine.low %v578_v3, %v582_v7  ;;  %v10136_v56 = vld [vmem:[%s12531_s0 + $0x27c] ss:$28 sps:$4 sm:$0xff]   ;;  %v10145_v62 = vld [vmem:[%s12531_s0 + $0x324] ss:$28 sps:$4 sm:$0xff]   ;;  %v12537_v7 = vmov 0  }
 0x132   :  { %3608 = vmatprep.subr.bf16.mxu0 %v8331_v26  ;;  %4380 = vmatprep.subr.bf16.mxu1 %v8333_v32  ;;  %v8387_v26 = vcombine.high %v10680_v1, %v10682_v2  ;;  %v10081_v32 = vld [vmem:[%s12531_s0 + $0x1c8] ss:$28 sps:$4 sm:$0xff]   ;;  %v10147_v63 = vld [vmem:[%s12531_s0 + $0x320] ss:$28 sps:$4 sm:$0xff]   ;;  %v10150_v3 = vld [vmem:[%s12531_s0 + $0x358] ss:$28 sps:$4 sm:$0xff]  }
 0x135   :  { %3609 = vmatpush1.bf16.msra.mxu0 %v8330_v15  ;;  %4381 = vmatpush1.bf16.msra.mxu1 %v8332_v16  ;;  %v10087_v15 = vld [vmem:[%s12531_s0 + $0x238] ss:$28 sps:$4 sm:$0xff]  }
 0x136   :  { %3610 = vmatprep.subr.bf16.mxu0 %v8339_v17  ;;  %4382 = vmatprep.subr.bf16.mxu1 %v8341_v19  ;;  %v10088_v16 = vld [vmem:[%s12531_s0 + $0x274] ss:$28 sps:$4 sm:$0xff]   ;;  %v10093_v19 = vld [vmem:[%s12531_s0 + $0x2a8] ss:$28 sps:$4 sm:$0xff]  }
 0x137   :  { %3480 = vmatmul.mubr.bf16.gmra.mrb[20].mxu0 %v10072_v18  ;;  %4252 = vmatmul.mubr.bf16.gmra.mrb[20].mxu1 %v10072_v18  ;;  %v10090_v17 = vld [vmem:[%s12531_s0 + $0x270] ss:$28 sps:$4 sm:$0xff]  }
 0x138   :  { %3489 = vmatprep.mubr.bf16.mxu0 %v10073_v27  ;;  %4261 = vmatprep.mubr.bf16.mxu1 %v10073_v27  ;;  %v10091_v18 = vld [vmem:[%s12531_s0 + $0x2ac] ss:$28 sps:$4 sm:$0xff]   ;;  %v10097_v27 = vld [vmem:[%s12531_s0 + $0x31c] ss:$28 sps:$4 sm:$0xff]  }
 0x139   :  { %3611 = vmatpush1.bf16.msra.mxu0 %v8338_v30  ;;  %4383 = vmatpush1.bf16.msra.mxu1 %v8340_v31  ;;  %v10102_v30 = vld [vmem:[%s12531_s0 + $0x350] ss:$28 sps:$4 sm:$0xff]  }
 0x13a   :  { %3612 = vmatprep.subr.bf16.mxu0 %v8347_v33  ;;  %4384 = vmatprep.subr.bf16.mxu1 %v8349_v34  ;;  %v10105_v31 = vld [vmem:[%s12531_s0 + $0x14] ss:$28 sps:$4 sm:$0xff]   ;;  %v10106_v34 = vld [vmem:[%s12531_s0 + $0x4c] ss:$28 sps:$4 sm:$0xff]  }
 0x13b   :  { %v10103_v33 = vld [vmem:[%s12531_s0 + $0x10] ss:$28 sps:$4 sm:$0xff]  }
 0x13d   :  { %3613 = vmatpush1.bf16.msra.mxu0 %v8346_v39  ;;  %4385 = vmatpush1.bf16.msra.mxu1 %v8348_v40  ;;  %v8007_v39 = vcombine.high %v10801_v35, %v10803_v36  ;;  %v10814_v40 = vld [vmem:[#allocation2 + $0x38] sm:$0xff] }
 0x13e   :  { %3614 = vmatprep.subr.bf16.mxu0 %v8355_v41  ;;  %4386 = vmatprep.subr.bf16.mxu1 %v8357_v43  ;;  %v8008_v1 = vcombine.low %v10805_v37, %v10814_v40  ;;  %v8009_v2 = vcombine.high %v10805_v37, %v10814_v40  ;;  %v10114_v41 = vld [vmem:[%s12531_s0 + $0xb8] ss:$28 sps:$4 sm:$0xff]   ;;  %v10117_v43 = vld [vmem:[%s12531_s0 + $0xf0] ss:$28 sps:$4 sm:$0xff]  }
 0x13f   :  { %3490 = vmatmul.mubr.bf16.gmra.mrb[24].mxu0 %v10075_v42  ;;  %4262 = vmatmul.mubr.bf16.gmra.mrb[24].mxu1 %v10075_v42  ;;  %v10115_v42 = vld [vmem:[%s12531_s0 + $0xf4] ss:$28 sps:$4 sm:$0xff]  }
 0x140   :  { %3499 = vmatprep.mubr.bf16.mxu0 %v10076_v46  ;;  %4271 = vmatprep.mubr.bf16.mxu1 %v10076_v46  ;;  %v10121_v46 = vld [vmem:[%s12531_s0 + $0x164] ss:$28 sps:$4 sm:$0xff]   ;;  %v239_v40 = vld [vmem:[#allocation2 + $0x130] sm:$0xff] }
 0x141   :  { %3615 = vmatpush1.bf16.msra.mxu0 %v8354_v49  ;;  %4387 = vmatpush1.bf16.msra.mxu1 %v8356_v50  ;;  %v10126_v49 = vld [vmem:[%s12531_s0 + $0x198] ss:$28 sps:$4 sm:$0xff]  }
 0x142   :  { %3616 = vmatprep.subr.bf16.mxu0 %v8363_v51  ;;  %4388 = vmatprep.subr.bf16.mxu1 %v8365_v52  ;;  %v10127_v50 = vld [vmem:[%s12531_s0 + $0x1d4] ss:$28 sps:$4 sm:$0xff]   ;;  %v10130_v52 = vld [vmem:[%s12531_s0 + $0x20c] ss:$28 sps:$4 sm:$0xff]  }
 0x143   :  { %v10129_v51 = vld [vmem:[%s12531_s0 + $0x1d0] ss:$28 sps:$4 sm:$0xff]  }
 0x145   :  { %3617 = vmatpush1.bf16.msra.mxu0 %v8362_v57  ;;  %4389 = vmatpush1.bf16.msra.mxu1 %v8364_v58  ;;  %v10138_v57 = vld [vmem:[%s12531_s0 + $0x278] ss:$28 sps:$4 sm:$0xff]  }
 0x146   :  { %3618 = vmatprep.subr.bf16.mxu0 %v8371_v59  ;;  %4390 = vmatprep.subr.bf16.mxu1 %v8373_v61  ;;  %v10139_v58 = vld [vmem:[%s12531_s0 + $0x2b4] ss:$28 sps:$4 sm:$0xff]   ;;  %v10144_v61 = vld [vmem:[%s12531_s0 + $0x2e8] ss:$28 sps:$4 sm:$0xff]  }
 0x147   :  { %3500 = vmatmul.mubr.bf16.gmra.mrb[28].mxu0 %v10078_v60  ;;  %4272 = vmatmul.mubr.bf16.gmra.mrb[28].mxu1 %v10078_v60  ;;  %v10141_v59 = vld [vmem:[%s12531_s0 + $0x2b0] ss:$28 sps:$4 sm:$0xff]  }
 0x148   :  { %3509 = vmatprep.mubr.bf16.mxu0 %v10079_v0  ;;  %4281 = vmatprep.mubr.bf16.mxu1 %v10079_v0  ;;  %v10142_v60 = vld [vmem:[%s12531_s0 + $0x2ec] ss:$28 sps:$4 sm:$0xff]   ;;  %v10148_v0 = vld [vmem:[%s12531_s0 + $0x35c] ss:$28 sps:$4 sm:$0xff]  }
 0x149   :  { %3619 = vmatpush1.bf16.msra.mxu0 %v8370_v8  ;;  %4391 = vmatpush1.bf16.msra.mxu1 %v8372_v21  ;;  %v10151_v8 = vld [vmem:[%s12531_s0 + $0x18] ss:$28 sps:$4 sm:$0xff]  }
 0x14a   :  { %3620 = vmatprep.subr.bf16.mxu0 %v8379_v22  ;;  %4392 = vmatprep.subr.bf16.mxu1 %v8381_v24  ;;  %v211_v21 = vld [vmem:[#allocation2 + $0x50] sm:$0xff]  ;;  %v212_v24 = vld [vmem:[#allocation2 + $0x58] sm:$0xff] }
 0x14b   :  { %v215_v22 = vld [vmem:[#allocation2 + $0x70] sm:$0xff] }
 0x14d   :  { %3621 = vmatpush1.bf16.msra.mxu0 %v8378_v10  ;;  %4393 = vmatpush1.bf16.msra.mxu1 %v8380_v25  ;;  %v216_v10 = vld [vmem:[#allocation2 + $0x78] sm:$0xff]  ;;  %v8015_v25 = vcombine.high %v211_v21, %v215_v22 }
 0x14e   :  { %3783 = vmatprep.subr.bf16.mxu0 %v8387_v26  ;;  %4555 = vmatprep.subr.bf16.mxu1 %v8389_v11  ;;  %v219_v26 = vld [vmem:[#allocation2 + $0x90] sm:$0xff]  ;;  %v220_v11 = vld [vmem:[#allocation2 + $0x98] sm:$0xff] }
 0x14f   :  { %3510 = vmatmul.mubr.bf16.gmra.mrb[32].mxu0 %v10081_v32  ;;  %4282 = vmatmul.mubr.bf16.gmra.mrb[32].mxu1 %v10081_v32  ;;  %v223_v32 = vld [vmem:[#allocation2 + $0xb0] sm:$0xff] }
 0x150   :  { %3519 = vmatprep.mubr.bf16.mxu0 %v10082_v12  ;;  %4291 = vmatprep.mubr.bf16.mxu1 %v10082_v12  ;;  %v8017_v12 = vcombine.high %v212_v24, %v216_v10  ;;  %v8022_v35 = vcombine.low %v219_v26, %v223_v32 }
 0x157   :  { %3520 = vmatmul.mubr.bf16.gmra.mrb[36].mxu0 %v10084_v13  ;;  %4292 = vmatmul.mubr.bf16.gmra.mrb[36].mxu1 %v10084_v13  ;;  %v224_v13 = vld [vmem:[#allocation2 + $0xb8] sm:$0xff] }
 0x158   :  { %3529 = vmatprep.mubr.bf16.mxu0 %v10085_v14  ;;  %4301 = vmatprep.mubr.bf16.mxu1 %v10085_v14  ;;  %v10913_v14 = vld [vmem:[#allocation2 + $0x410] sm:$0xff]  ;;  %v8024_v36 = vcombine.low %v220_v11, %v224_v13 }
 0x15f   :  { %3530 = vmatmul.mubr.bf16.gmra.mrb[40].mxu0 %v10087_v15  ;;  %4302 = vmatmul.mubr.bf16.gmra.mrb[40].mxu1 %v10087_v15  ;;  %v10915_v15 = vld [vmem:[#allocation2 + $0x430] sm:$0xff] }
 0x160   :  { %3539 = vmatprep.mubr.bf16.mxu0 %v10088_v16  ;;  %4311 = vmatprep.mubr.bf16.mxu1 %v10088_v16  ;;  %v8014_v16 = vcombine.low %v211_v21, %v215_v22  ;;  %v267_v21 = vld [vmem:[#allocation2 + $0x210] sm:$0xff] }
 0x161   :  { %v271_v22 = vld [vmem:[#allocation2 + $0x230] sm:$0xff] }
 0x167   :  { %3540 = vmatmul.mubr.bf16.gmra.mrb[44].mxu0 %v10090_v17  ;;  %4312 = vmatmul.mubr.bf16.gmra.mrb[44].mxu1 %v10090_v17  ;;  %v8134_v17 = vcombine.low %v10913_v14, %v10915_v15 }
 0x168   :  { %3549 = vmatprep.mubr.bf16.mxu0 %v10091_v18  ;;  %4321 = vmatprep.mubr.bf16.mxu1 %v10091_v18  ;;  %v10923_v18 = vld [vmem:[#allocation2 + $0x418] sm:$0xff] }
 0x16f   :  { %3550 = vmatmul.mubr.bf16.gmra.mrb[48].mxu0 %v10093_v19  ;;  %4322 = vmatmul.mubr.bf16.gmra.mrb[48].mxu1 %v10093_v19  ;;  %v10925_v19 = vld [vmem:[#allocation2 + $0x438] sm:$0xff] }
 0x170   :  { %3559 = vmatprep.mubr.bf16.mxu0 %v10094_v20  ;;  %4331 = vmatprep.mubr.bf16.mxu1 %v10094_v20  ;;  %v8016_v20 = vcombine.low %v212_v24, %v216_v10  ;;  %v268_v24 = vld [vmem:[#allocation2 + $0x218] sm:$0xff] }
 0x171   :  { %v272_v10 = vld [vmem:[#allocation2 + $0x238] sm:$0xff] }
 0x177   :  { %3560 = vmatmul.mubr.bf16.gmra.mrb[52].mxu0 %v10096_v23  ;;  %4332 = vmatmul.mubr.bf16.gmra.mrb[52].mxu1 %v10096_v23  ;;  %v8023_v23 = vcombine.high %v219_v26, %v223_v32  ;;  %v8071_v32 = vcombine.high %v267_v21, %v271_v22 }
 0x178   :  { %3569 = vmatprep.mubr.bf16.mxu0 %v10097_v27  ;;  %4341 = vmatprep.mubr.bf16.mxu1 %v10097_v27  ;;  %v8136_v27 = vcombine.low %v10923_v18, %v10925_v19 }
 0x17f   :  { %3570 = vmatmul.mubr.bf16.gmra.mrb[56].mxu0 %v10099_v28  ;;  %4342 = vmatmul.mubr.bf16.gmra.mrb[56].mxu1 %v10099_v28  ;;  %v8025_v28 = vcombine.high %v220_v11, %v224_v13  ;;  %v10155_v11 = vld [vmem:[%s12531_s0 + $0xf8] ss:$28 sps:$4 sm:$0xff]  }
 0x180   :  { %3579 = vmatprep.mubr.bf16.mxu0 %v10100_v29  ;;  %4351 = vmatprep.mubr.bf16.mxu1 %v10100_v29  ;;  %v10152_v29 = vld [vmem:[%s12531_s0 + $0x50] ss:$28 sps:$4 sm:$0xff]  }
 0x181   :  { %v275_v13 = vld [vmem:[#allocation2 + $0x250] sm:$0xff] }
 0x187   :  { %3580 = vmatmul.mubr.bf16.gmra.mrb[60].mxu0 %v10102_v30  ;;  %4352 = vmatmul.mubr.bf16.gmra.mrb[60].mxu1 %v10102_v30  ;;  %v227_v30 = vld [vmem:[#allocation2 + $0xd0] sm:$0xff] }
 0x188   :  { %3622 = vmatprep.mubr.bf16.mxu0 %v10105_v31  ;;  %4394 = vmatprep.mubr.bf16.mxu1 %v10105_v31  ;;  %v231_v31 = vld [vmem:[#allocation2 + $0xf0] sm:$0xff] }
 0x189   :  { %v8031_v37 = vcombine.high %v227_v30, %v231_v31 }
 0x18f   :  { %3623 = vmatmul.mubr.bf16.vlgmr.msra.gmra.mrb[0].mxu0 %v10103_v33  ;;  %4395 = vmatmul.mubr.bf16.vlgmr.msra.gmra.mrb[0].mxu1 %v10103_v33  ;;  %v228_v33 = vld [vmem:[#allocation2 + $0xd8] sm:$0xff] }
 0x190   :  { %3784 = vmatpush1.bf16.msra.mxu0 %v8386_v4  ;;  %4556 = vmatpush1.bf16.msra.mxu1 %v8388_v9  ;;  %v10108_v4 = vld [vmem:[%s12531_s0 + $0x48] ss:$28 sps:$4 sm:$0xff]   ;;  %v10112_v9 = vld [vmem:[%s12531_s0 + $0xbc] ss:$28 sps:$4 sm:$0xff]  }
 0x191   :  { %3632 = vmatprep.mubr.bf16.mxu0 %v10106_v34  ;;  %4404 = vmatprep.mubr.bf16.mxu1 %v10106_v34  ;;  %v232_v34 = vld [vmem:[#allocation2 + $0xf8] sm:$0xff] }
 0x192   :  { %4748 = vmatprep.subr.bf16.mxu0 %v8007_v39  ;;  %5520 = vmatprep.subr.bf16.mxu1 %v8009_v2  ;;  %v235_v39 = vld [vmem:[#allocation2 + $0x110] sm:$0xff]  ;;  %v240_v2 = vld [vmem:[#allocation2 + $0x138] sm:$0xff] }
 0x197   :  { %3633 = vmatmul.mubr.bf16.gmra.mrb[4].mxu0 %v10108_v4  ;;  %4405 = vmatmul.mubr.bf16.gmra.mrb[4].mxu1 %v10108_v4  ;;  %v8030_v4 = vcombine.low %v227_v30, %v231_v31 }
 0x198   :  { %3642 = vmatprep.mubr.bf16.mxu0 %v10109_v5  ;;  %4414 = vmatprep.mubr.bf16.mxu1 %v10109_v5  ;;  %v8032_v5 = vcombine.low %v228_v33, %v232_v34 }
 0x19f   :  { %3643 = vmatmul.mubr.bf16.gmra.mrb[8].mxu0 %v10111_v6  ;;  %4415 = vmatmul.mubr.bf16.gmra.mrb[8].mxu1 %v10111_v6  ;;  %v8039_v6 = vcombine.high %v235_v39, %v239_v40 }
 0x1a0   :  { %3652 = vmatprep.mubr.bf16.mxu0 %v10112_v9  ;;  %4424 = vmatprep.mubr.bf16.mxu1 %v10112_v9  ;;  %v10153_v9 = vld [vmem:[%s12531_s0 + $0x88] ss:$28 sps:$4 sm:$0xff]  }
 0x1a7   :  { %3653 = vmatmul.mubr.bf16.gmra.mrb[12].mxu0 %v10114_v41  ;;  %4425 = vmatmul.mubr.bf16.gmra.mrb[12].mxu1 %v10114_v41 }
 0x1a8   :  { %3662 = vmatprep.mubr.bf16.mxu0 %v10115_v42  ;;  %4434 = vmatprep.mubr.bf16.mxu1 %v10115_v42  ;;  %v243_v42 = vld [vmem:[#allocation2 + $0x150] sm:$0xff] }
 0x1af   :  { %3663 = vmatmul.mubr.bf16.gmra.mrb[16].mxu0 %v10117_v43  ;;  %4435 = vmatmul.mubr.bf16.gmra.mrb[16].mxu1 %v10117_v43  ;;  %v247_v43 = vld [vmem:[#allocation2 + $0x170] sm:$0xff] }
 0x1b0   :  { %3672 = vmatprep.mubr.bf16.mxu0 %v10118_v44  ;;  %4444 = vmatprep.mubr.bf16.mxu1 %v10118_v44  ;;  %v244_v44 = vld [vmem:[#allocation2 + $0x158] sm:$0xff] }
 0x1b7   :  { %3673 = vmatmul.mubr.bf16.gmra.mrb[20].mxu0 %v10120_v45  ;;  %4445 = vmatmul.mubr.bf16.gmra.mrb[20].mxu1 %v10120_v45  ;;  %v248_v45 = vld [vmem:[#allocation2 + $0x178] sm:$0xff] }
 0x1b8   :  { %3682 = vmatprep.mubr.bf16.mxu0 %v10121_v46  ;;  %4454 = vmatprep.mubr.bf16.mxu1 %v10121_v46  ;;  %v8038_v46 = vcombine.low %v235_v39, %v239_v40  ;;  %v10156_v40 = vld [vmem:[%s12531_s0 + $0x130] ss:$28 sps:$4 sm:$0xff]  }
 0x1bf   :  { %3683 = vmatmul.mubr.bf16.gmra.mrb[24].mxu0 %v10123_v47  ;;  %4455 = vmatmul.mubr.bf16.gmra.mrb[24].mxu1 %v10123_v47 }
 0x1c0   :  { %3692 = vmatprep.mubr.bf16.mxu0 %v10124_v48  ;;  %4464 = vmatprep.mubr.bf16.mxu1 %v10124_v48  ;;  %v8047_v48 = vcombine.high %v243_v42, %v247_v43 }
 0x1c7   :  { %3693 = vmatmul.mubr.bf16.gmra.mrb[28].mxu0 %v10126_v49  ;;  %4465 = vmatmul.mubr.bf16.gmra.mrb[28].mxu1 %v10126_v49  ;;  %v8049_v49 = vcombine.high %v244_v44, %v248_v45 }
 0x1c8   :  { %3702 = vmatprep.mubr.bf16.mxu0 %v10127_v50  ;;  %4474 = vmatprep.mubr.bf16.mxu1 %v10127_v50  ;;  %v251_v50 = vld [vmem:[#allocation2 + $0x190] sm:$0xff] }
 0x1cf   :  { %3703 = vmatmul.mubr.bf16.gmra.mrb[32].mxu0 %v10129_v51  ;;  %4475 = vmatmul.mubr.bf16.gmra.mrb[32].mxu1 %v10129_v51  ;;  %v255_v51 = vld [vmem:[#allocation2 + $0x1b0] sm:$0xff] }
 0x1d0   :  { %3712 = vmatprep.mubr.bf16.mxu0 %v10130_v52  ;;  %4484 = vmatprep.mubr.bf16.mxu1 %v10130_v52  ;;  %v252_v52 = vld [vmem:[#allocation2 + $0x198] sm:$0xff] }
 0x1d7   :  { %3713 = vmatmul.mubr.bf16.gmra.mrb[36].mxu0 %v10132_v53  ;;  %4485 = vmatmul.mubr.bf16.gmra.mrb[36].mxu1 %v10132_v53  ;;  %v256_v53 = vld [vmem:[#allocation2 + $0x1b8] sm:$0xff] }
 0x1d8   :  { %3722 = vmatprep.mubr.bf16.mxu0 %v10133_v54  ;;  %4494 = vmatprep.mubr.bf16.mxu1 %v10133_v54  ;;  %v8046_v54 = vcombine.low %v243_v42, %v247_v43 }
 0x1df   :  { %3723 = vmatmul.mubr.bf16.gmra.mrb[40].mxu0 %v10135_v55  ;;  %4495 = vmatmul.mubr.bf16.gmra.mrb[40].mxu1 %v10135_v55  ;;  %v8048_v55 = vcombine.low %v244_v44, %v248_v45  ;;  %v299_v44 = vld [vmem:[#allocation2 + $0x310] sm:$0xff] }
 0x1e0   :  { %3732 = vmatprep.mubr.bf16.mxu0 %v10136_v56  ;;  %4504 = vmatprep.mubr.bf16.mxu1 %v10136_v56  ;;  %v8055_v56 = vcombine.high %v251_v50, %v255_v51  ;;  %v303_v45 = vld [vmem:[#allocation2 + $0x330] sm:$0xff] }
 0x1e7   :  { %3733 = vmatmul.mubr.bf16.gmra.mrb[44].mxu0 %v10138_v57  ;;  %4505 = vmatmul.mubr.bf16.gmra.mrb[44].mxu1 %v10138_v57  ;;  %v10154_v57 = vld [vmem:[%s12531_s0 + $0xc0] ss:$28 sps:$4 sm:$0xff]  }
 0x1e8   :  { %3742 = vmatprep.mubr.bf16.mxu0 %v10139_v58  ;;  %4514 = vmatprep.mubr.bf16.mxu1 %v10139_v58  ;;  %v8057_v58 = vcombine.high %v252_v52, %v256_v53 }
 0x1ef   :  { %3743 = vmatmul.mubr.bf16.gmra.mrb[48].mxu0 %v10141_v59  ;;  %4515 = vmatmul.mubr.bf16.gmra.mrb[48].mxu1 %v10141_v59  ;;  %v259_v59 = vld [vmem:[#allocation2 + $0x1d0] sm:$0xff] }
 0x1f0   :  { %3752 = vmatprep.mubr.bf16.mxu0 %v10142_v60  ;;  %4524 = vmatprep.mubr.bf16.mxu1 %v10142_v60  ;;  %v263_v60 = vld [vmem:[#allocation2 + $0x1f0] sm:$0xff] }
 0x1f7   :  { %3753 = vmatmul.mubr.bf16.gmra.mrb[52].mxu0 %v10144_v61  ;;  %4525 = vmatmul.mubr.bf16.gmra.mrb[52].mxu1 %v10144_v61  ;;  %v260_v61 = vld [vmem:[#allocation2 + $0x1d8] sm:$0xff] }
 0x1f8   :  { %3762 = vmatprep.mubr.bf16.mxu0 %v10145_v62  ;;  %4534 = vmatprep.mubr.bf16.mxu1 %v10145_v62  ;;  %v264_v62 = vld [vmem:[#allocation2 + $0x1f8] sm:$0xff] }
 0x1f9   :  { %v8064_v26 = vcombine.low %v260_v61, %v264_v62 }
 0x1ff   :  { %3763 = vmatmul.mubr.bf16.gmra.mrb[56].mxu0 %v10147_v63  ;;  %4535 = vmatmul.mubr.bf16.gmra.mrb[56].mxu1 %v10147_v63  ;;  %v8054_v63 = vcombine.low %v251_v50, %v255_v51  ;;  %v8103_v50 = vcombine.high %v299_v44, %v303_v45  ;;  %v10157_v51 = vld [vmem:[%s12531_s0 + $0x168] ss:$28 sps:$4 sm:$0xff]  }
 0x200   :  { %3772 = vmatprep.mubr.bf16.mxu0 %v10148_v0  ;;  %4544 = vmatprep.mubr.bf16.mxu1 %v10148_v0  ;;  %v8056_v0 = vcombine.low %v252_v52, %v256_v53  ;;  %v307_v53 = vld [vmem:[#allocation2 + $0x350] sm:$0xff] }
 0x207   :  { %3773 = vmatmul.mubr.bf16.gmra.mrb[60].mxu0 %v10150_v3  ;;  %4545 = vmatmul.mubr.bf16.gmra.mrb[60].mxu1 %v10150_v3  ;;  %v8063_v3 = vcombine.high %v259_v59, %v263_v60 }
 0x208   :  { %3815 = vmatprep.mubr.bf16.mxu0 %v12537_v7  ;;  %4587 = vmatprep.mubr.bf16.mxu1 %v12537_v7 }
 0x20f   :  { %8394 = vmatmul.mubr.msk.bf16.vlgmr.msra.gmra.mrb[0].mxu0 %vm3155_vm0, %v10151_v8  ;;  %8410 = vmatmul.mubr.msk.bf16.vlgmr.msra.gmra.mrb[0].mxu1 %vm3155_vm0, %v10151_v8  ;;  %v8065_v8 = vcombine.high %v260_v61, %v264_v62  ;;  %v315_v61 = vld [vmem:[#allocation2 + $0x390] sm:$0xff] }
 0x210   :  { %4749 = vmatpush1.bf16.msra.mxu0 %v8006_v38  ;;  %5521 = vmatpush1.bf16.msra.mxu1 %v8008_v1  ;;  %v8033_v38 = vcombine.high %v228_v33, %v232_v34  ;;  %v236_v1 = vld [vmem:[#allocation2 + $0x118] sm:$0xff]  ;;  %v283_v33 = vld [vmem:[#allocation2 + $0x290] sm:$0xff] }
 0x211   :  { %3825 = vmatprep.mubr.bf16.mxu0 %v12537_v7  ;;  %4597 = vmatprep.mubr.bf16.mxu1 %v12537_v7  ;;  %v8041_v41 = vcombine.high %v236_v1, %v240_v2  ;;  %v8040_v47 = vcombine.low %v236_v1, %v240_v2  ;;  %v287_v34 = vld [vmem:[#allocation2 + $0x2b0] sm:$0xff] }
 0x212   :  { %4750 = vmatprep.subr.bf16.mxu0 %v8015_v25  ;;  %5522 = vmatprep.subr.bf16.mxu1 %v8017_v12  ;;  %v8062_v25 = vcombine.low %v259_v59, %v263_v60  ;;  %v8073_v12 = vcombine.high %v268_v24, %v272_v10  ;;  %v8087_v39 = vcombine.high %v283_v33, %v287_v34  ;;  %v291_v2 = vld [vmem:[#allocation2 + $0x2d0] sm:$0xff] }
 0x213   :  { %v319_v62 = vld [vmem:[#allocation2 + $0x3b0] sm:$0xff] }
 0x214   :  { %4751 = vmatpush1.bf16.msra.mxu0 %v8014_v16  ;;  %5523 = vmatpush1.bf16.msra.mxu1 %v8016_v20  ;;  %v279_v16 = vld [vmem:[#allocation2 + $0x270] sm:$0xff]  ;;  %v276_v20 = vld [vmem:[#allocation2 + $0x258] sm:$0xff] }
 0x215   :  { %4752 = vmatprep.subr.bf16.mxu0 %v8023_v23  ;;  %5524 = vmatprep.subr.bf16.mxu1 %v8025_v28  ;;  %v280_v23 = vld [vmem:[#allocation2 + $0x278] sm:$0xff]  ;;  %v8070_v28 = vcombine.low %v267_v21, %v271_v22  ;;  %v8079_v30 = vcombine.high %v275_v13, %v279_v16  ;;  %v8119_v21 = vcombine.high %v315_v61, %v319_v62 }
 0x216   :  { %v8081_v31 = vcombine.high %v276_v20, %v280_v23  ;;  %v10158_v22 = vld [vmem:[%s12531_s0 + $0x1a0] ss:$28 sps:$4 sm:$0xff]  }
 0x217   :  { %8395 = vmatmul.mubr.msk.bf16.gmra.mrb[4].mxu0 %vm3155_vm0, %v10152_v29  ;;  %8411 = vmatmul.mubr.msk.bf16.gmra.mrb[4].mxu1 %vm3155_vm0, %v10152_v29  ;;  %v8072_v29 = vcombine.low %v268_v24, %v272_v10  ;;  %v323_v10 = vld [vmem:[#allocation2 + $0x3d0] sm:$0xff] }
 0x218   :  { %3835 = vmatprep.mubr.bf16.mxu0 %v12537_v7  ;;  %4607 = vmatprep.mubr.bf16.mxu1 %v12537_v7 }
 0x219   :  { %4753 = vmatpush1.bf16.msra.mxu0 %v8022_v35  ;;  %5525 = vmatpush1.bf16.msra.mxu1 %v8024_v36  ;;  %v284_v35 = vld [vmem:[#allocation2 + $0x298] sm:$0xff] }
 0x21a   :  { %4754 = vmatprep.subr.bf16.mxu0 %v8031_v37  ;;  %5526 = vmatprep.subr.bf16.mxu1 %v8033_v38  ;;  %v288_v36 = vld [vmem:[#allocation2 + $0x2b8] sm:$0xff]  ;;  %v8078_v37 = vcombine.low %v275_v13, %v279_v16  ;;  %v8080_v38 = vcombine.low %v276_v20, %v280_v23 }
 0x21b   :  { %v8089_v1 = vcombine.high %v284_v35, %v288_v36 }
 0x21d   :  { %4755 = vmatpush1.bf16.msra.mxu0 %v8030_v4  ;;  %5527 = vmatpush1.bf16.msra.mxu1 %v8032_v5  ;;  %v295_v4 = vld [vmem:[#allocation2 + $0x2f0] sm:$0xff]  ;;  %v292_v5 = vld [vmem:[#allocation2 + $0x2d8] sm:$0xff] }
 0x21e   :  { %4756 = vmatprep.subr.bf16.mxu0 %v8039_v6  ;;  %5528 = vmatprep.subr.bf16.mxu1 %v8041_v41  ;;  %v296_v6 = vld [vmem:[#allocation2 + $0x2f8] sm:$0xff]  ;;  %v8088_v41 = vcombine.low %v284_v35, %v288_v36  ;;  %v8095_v42 = vcombine.high %v291_v2, %v295_v4  ;;  %v10164_v36 = vld [vmem:[%s12531_s0 + $0x2f0] ss:$28 sps:$4 sm:$0xff]  }
 0x21f   :  { %8396 = vmatmul.mubr.msk.bf16.gmra.mrb[8].mxu0 %vm3155_vm0, %v10153_v9  ;;  %8412 = vmatmul.mubr.msk.bf16.gmra.mrb[8].mxu1 %vm3155_vm0, %v10153_v9  ;;  %v8086_v9 = vcombine.low %v283_v33, %v287_v34  ;;  %v8097_v43 = vcombine.high %v292_v5, %v296_v6  ;;  %v10161_v33 = vld [vmem:[%s12531_s0 + $0x248] ss:$28 sps:$4 sm:$0xff]   ;;  %v10162_v34 = vld [vmem:[%s12531_s0 + $0x280] ss:$28 sps:$4 sm:$0xff]   ;;  %v10163_v35 = vld [vmem:[%s12531_s0 + $0x2b8] ss:$28 sps:$4 sm:$0xff]  }
 0x220   :  { %3845 = vmatprep.mubr.bf16.mxu0 %v12537_v7  ;;  %4617 = vmatprep.mubr.bf16.mxu1 %v12537_v7 }
 0x221   :  { %4757 = vmatpush1.bf16.msra.mxu0 %v8038_v46  ;;  %5529 = vmatpush1.bf16.msra.mxu1 %v8040_v47  ;;  %v300_v46 = vld [vmem:[#allocation2 + $0x318] sm:$0xff] }
 0x222   :  { %4758 = vmatprep.subr.bf16.mxu0 %v8047_v48  ;;  %5530 = vmatprep.subr.bf16.mxu1 %v8049_v49  ;;  %v304_v47 = vld [vmem:[#allocation2 + $0x338] sm:$0xff]  ;;  %v8094_v48 = vcombine.low %v291_v2, %v295_v4  ;;  %v8096_v49 = vcombine.low %v292_v5, %v296_v6  ;;  %v347_v6 = vld [vmem:[#allocation2 + $0x490] sm:$0xff] }
 0x223   :  { %v8105_v52 = vcombine.high %v300_v46, %v304_v47  ;;  %v340_v2 = vld [vmem:[#allocation2 + $0x458] sm:$0xff] }
 0x224   :  { %v344_v4 = vld [vmem:[#allocation2 + $0x478] sm:$0xff] }
 0x225   :  { %4759 = vmatpush1.bf16.msra.mxu0 %v8046_v54  ;;  %5531 = vmatpush1.bf16.msra.mxu1 %v8048_v55  ;;  %v311_v54 = vld [vmem:[#allocation2 + $0x370] sm:$0xff]  ;;  %v308_v55 = vld [vmem:[#allocation2 + $0x358] sm:$0xff] }
 0x226   :  { %4760 = vmatprep.subr.bf16.mxu0 %v8055_v56  ;;  %5532 = vmatprep.subr.bf16.mxu1 %v8057_v58  ;;  %v312_v56 = vld [vmem:[#allocation2 + $0x378] sm:$0xff]  ;;  %v8104_v58 = vcombine.low %v300_v46, %v304_v47  ;;  %v8111_v59 = vcombine.high %v307_v53, %v311_v54  ;;  %v8144_v47 = vcombine.low %v340_v2, %v344_v4 }
 0x227   :  { %8397 = vmatmul.mubr.msk.bf16.gmra.mrb[12].mxu0 %vm3155_vm0, %v10154_v57  ;;  %8413 = vmatmul.mubr.msk.bf16.gmra.mrb[12].mxu1 %vm3155_vm0, %v10154_v57  ;;  %v8102_v57 = vcombine.low %v299_v44, %v303_v45  ;;  %v8113_v60 = vcombine.high %v308_v55, %v312_v56  ;;  %v352_v44 = vld [vmem:[#allocation2 + $0x4b8] sm:$0xff] }
 0x228   :  { %3855 = vmatprep.mubr.bf16.mxu0 %v12537_v7  ;;  %4627 = vmatprep.mubr.bf16.mxu1 %v12537_v7  ;;  %v10233_v46 = vld [vmem:[%s12531_s0 + $0x3c] ss:$28 sps:$4 sm:$0xff]  }
 0x229   :  { %4761 = vmatpush1.bf16.msra.mxu0 %v8054_v63  ;;  %5533 = vmatpush1.bf16.msra.mxu1 %v8056_v0  ;;  %v316_v63 = vld [vmem:[#allocation2 + $0x398] sm:$0xff] }
 0x22a   :  { %4762 = vmatprep.subr.bf16.mxu0 %v8063_v3  ;;  %5534 = vmatprep.subr.bf16.mxu1 %v8065_v8  ;;  %v320_v0 = vld [vmem:[#allocation2 + $0x3b8] sm:$0xff]  ;;  %v8110_v3 = vcombine.low %v307_v53, %v311_v54  ;;  %v8112_v8 = vcombine.low %v308_v55, %v312_v56 }
 0x22b   :  { %v8121_v24 = vcombine.high %v316_v63, %v320_v0 }
 0x22d   :  { %4763 = vmatpush1.bf16.msra.mxu0 %v8062_v25  ;;  %5535 = vmatpush1.bf16.msra.mxu1 %v8064_v26  ;;  %v327_v25 = vld [vmem:[#allocation2 + $0x3f0] sm:$0xff]  ;;  %v324_v26 = vld [vmem:[#allocation2 + $0x3d8] sm:$0xff] }
 0x22e   :  { %4764 = vmatprep.subr.bf16.mxu0 %v8071_v32  ;;  %5536 = vmatprep.subr.bf16.mxu1 %v8073_v12  ;;  %v328_v32 = vld [vmem:[#allocation2 + $0x3f8] sm:$0xff]  ;;  %v8120_v12 = vcombine.low %v316_v63, %v320_v0  ;;  %v8127_v13 = vcombine.high %v323_v10, %v327_v25  ;;  %v8126_v20 = vcombine.low %v323_v10, %v327_v25 }
 0x22f   :  { %8398 = vmatmul.mubr.msk.bf16.gmra.mrb[16].mxu0 %vm3155_vm0, %v10155_v11  ;;  %8414 = vmatmul.mubr.msk.bf16.gmra.mrb[16].mxu1 %vm3155_vm0, %v10155_v11  ;;  %v8118_v11 = vcombine.low %v315_v61, %v319_v62  ;;  %v8129_v16 = vcombine.high %v324_v26, %v328_v32  ;;  %v8128_v23 = vcombine.low %v324_v26, %v328_v32  ;;  %v10235_v61 = vld [vmem:[%s12531_s0 + $0x74] ss:$28 sps:$4 sm:$0xff]   ;;  %v364_v62 = vld [vmem:[#allocation2 + $0x518] sm:$0xff] }
 0x230   :  { %3865 = vmatprep.mubr.bf16.mxu0 %v12537_v7  ;;  %4637 = vmatprep.mubr.bf16.mxu1 %v12537_v7  ;;  %v368_v63 = vld [vmem:[#allocation2 + $0x538] sm:$0xff] }
 0x231   :  { %4765 = vmatpush1.bf16.msra.mxu0 %v8070_v28  ;;  %5537 = vmatpush1.bf16.msra.mxu1 %v8072_v29  ;;  %v8135_v28 = vcombine.high %v10913_v14, %v10915_v15  ;;  %v10159_v29 = vld [vmem:[%s12531_s0 + $0x1d8] ss:$28 sps:$4 sm:$0xff]   ;;  %v8168_v32 = vcombine.low %v364_v62, %v368_v63 }
 0x232   :  { %4766 = vmatprep.subr.bf16.mxu0 %v8079_v30  ;;  %5538 = vmatprep.subr.bf16.mxu1 %v8081_v31  ;;  %v8137_v30 = vcombine.high %v10923_v18, %v10925_v19  ;;  %v10160_v31 = vld [vmem:[%s12531_s0 + $0x210] ss:$28 sps:$4 sm:$0xff]   ;;  %v356_v18 = vld [vmem:[#allocation2 + $0x4d8] sm:$0xff] }
 0x233   :  { %v11056_v14 = vld [vmem:[#allocation2 + $0x810] sm:$0xff]  ;;  %v360_v19 = vld [vmem:[#allocation2 + $0x4f8] sm:$0xff] }
 0x234   :  { %v11058_v15 = vld [vmem:[#allocation2 + $0x830] sm:$0xff]  ;;  %v372_v10 = vld [vmem:[#allocation2 + $0x558] sm:$0xff] }
 0x235   :  { %4767 = vmatpush1.bf16.msra.mxu0 %v8078_v37  ;;  %5539 = vmatpush1.bf16.msra.mxu1 %v8080_v38  ;;  %v10165_v37 = vld [vmem:[%s12531_s0 + $0x328] ss:$28 sps:$4 sm:$0xff]   ;;  %v10166_v38 = vld [vmem:[%s12531_s0 + $0x360] ss:$28 sps:$4 sm:$0xff]  }
 0x236   :  { %4768 = vmatprep.subr.bf16.mxu0 %v8087_v39  ;;  %5540 = vmatprep.subr.bf16.mxu1 %v8089_v1  ;;  %v10231_v39 = vld [vmem:[%s12531_s0 + $0x4] ss:$28 sps:$4 sm:$0xff]   ;;  %v343_v1 = vld [vmem:[#allocation2 + $0x470] sm:$0xff]  ;;  %v376_v25 = vld [vmem:[#allocation2 + $0x578] sm:$0xff] }
 0x237   :  { %8399 = vmatmul.mubr.msk.bf16.gmra.mrb[20].mxu0 %vm3155_vm0, %v10156_v40  ;;  %8415 = vmatmul.mubr.msk.bf16.gmra.mrb[20].mxu1 %vm3155_vm0, %v10156_v40  ;;  %v339_v40 = vld [vmem:[#allocation2 + $0x450] sm:$0xff] }
 0x238   :  { %3875 = vmatprep.mubr.bf16.mxu0 %v12537_v7  ;;  %4647 = vmatprep.mubr.bf16.mxu1 %v12537_v7  ;;  %v8143_v5 = vcombine.high %v339_v40, %v343_v1  ;;  %v8142_v45 = vcombine.low %v339_v40, %v343_v1 }
 0x239   :  { %4769 = vmatpush1.bf16.msra.mxu0 %v8086_v9  ;;  %5541 = vmatpush1.bf16.msra.mxu1 %v8088_v41  ;;  %v351_v9 = vld [vmem:[#allocation2 + $0x4b0] sm:$0xff]  ;;  %v10232_v41 = vld [vmem:[%s12531_s0] ss:$28 sps:$4 sm:$0xff]  }
 0x23a   :  { %4770 = vmatprep.subr.bf16.mxu0 %v8095_v42  ;;  %5542 = vmatprep.subr.bf16.mxu1 %v8097_v43  ;;  %v8145_v42 = vcombine.high %v340_v2, %v344_v4  ;;  %v348_v43 = vld [vmem:[#allocation2 + $0x498] sm:$0xff]  ;;  %v8150_v53 = vcombine.low %v347_v6, %v351_v9  ;;  %v10238_v2 = vld [vmem:[%s12531_s0 + $0xa8] ss:$28 sps:$4 sm:$0xff]  }
 0x23b   :  { %v8152_v55 = vcombine.low %v348_v43, %v352_v44 }
 0x23d   :  { %4771 = vmatpush1.bf16.msra.mxu0 %v8094_v48  ;;  %5543 = vmatpush1.bf16.msra.mxu1 %v8096_v49  ;;  %v8151_v48 = vcombine.high %v347_v6, %v351_v9  ;;  %v8153_v49 = vcombine.high %v348_v43, %v352_v44  ;;  %v399_v6 = vld [vmem:[#allocation2 + $0x630] sm:$0xff]  ;;  %v10239_v9 = vld [vmem:[%s12531_s0 + $0xe4] ss:$28 sps:$4 sm:$0xff]  }
 0x23e   :  { %4772 = vmatprep.subr.bf16.mxu0 %v8103_v50  ;;  %5544 = vmatprep.subr.bf16.mxu1 %v8105_v52  ;;  %v355_v50 = vld [vmem:[#allocation2 + $0x4d0] sm:$0xff]  ;;  %v11064_v52 = vld [vmem:[#allocation2 + $0x838] sm:$0xff] }
 0x23f   :  { %8400 = vmatmul.mubr.msk.bf16.gmra.mrb[24].mxu0 %vm3155_vm0, %v10157_v51  ;;  %8416 = vmatmul.mubr.msk.bf16.gmra.mrb[24].mxu1 %vm3155_vm0, %v10157_v51  ;;  %v359_v51 = vld [vmem:[#allocation2 + $0x4f0] sm:$0xff] }
 0x240   :  { %3885 = vmatprep.mubr.bf16.mxu0 %v12537_v7  ;;  %4657 = vmatprep.mubr.bf16.mxu1 %v12537_v7  ;;  %v8159_v56 = vcombine.high %v355_v50, %v359_v51  ;;  %v8158_v0 = vcombine.low %v355_v50, %v359_v51  ;;  %v408_v50 = vld [vmem:[#allocation2 + $0x678] sm:$0xff] }
 0x241   :  { %4773 = vmatpush1.bf16.msra.mxu0 %v8102_v57  ;;  %5545 = vmatpush1.bf16.msra.mxu1 %v8104_v58  ;;  %v10234_v57 = vld [vmem:[%s12531_s0 + $0x38] ss:$28 sps:$4 sm:$0xff]   ;;  %v8161_v58 = vcombine.high %v356_v18, %v360_v19 }
 0x242   :  { %4774 = vmatprep.subr.bf16.mxu0 %v8111_v59  ;;  %5546 = vmatprep.subr.bf16.mxu1 %v8113_v60  ;;  %v363_v59 = vld [vmem:[#allocation2 + $0x510] sm:$0xff] }
 0x243   :  { %v367_v60 = vld [vmem:[#allocation2 + $0x530] sm:$0xff] }
 0x244   :  { %v8166_v26 = vcombine.low %v363_v59, %v367_v60 }
 0x245   :  { %4775 = vmatpush1.bf16.msra.mxu0 %v8110_v3  ;;  %5547 = vmatpush1.bf16.msra.mxu1 %v8112_v8  ;;  %v8160_v3 = vcombine.low %v356_v18, %v360_v19  ;;  %v8167_v8 = vcombine.high %v363_v59, %v367_v60  ;;  %v412_v59 = vld [vmem:[#allocation2 + $0x698] sm:$0xff] }
 0x246   :  { %4776 = vmatprep.subr.bf16.mxu0 %v8119_v21  ;;  %5548 = vmatprep.subr.bf16.mxu1 %v8121_v24  ;;  %v8169_v21 = vcombine.high %v364_v62, %v368_v63  ;;  %v375_v24 = vld [vmem:[#allocation2 + $0x570] sm:$0xff]  ;;  %v416_v60 = vld [vmem:[#allocation2 + $0x6b8] sm:$0xff] }
 0x247   :  { %8401 = vmatmul.mubr.msk.bf16.gmra.mrb[28].mxu0 %vm3155_vm0, %v10158_v22  ;;  %8417 = vmatmul.mubr.msk.bf16.gmra.mrb[28].mxu1 %vm3155_vm0, %v10158_v22  ;;  %v371_v22 = vld [vmem:[#allocation2 + $0x550] sm:$0xff] }
 0x248   :  { %3895 = vmatprep.mubr.bf16.mxu0 %v12537_v7  ;;  %4667 = vmatprep.mubr.bf16.mxu1 %v12537_v7 }
 0x249   :  { %4777 = vmatpush1.bf16.msra.mxu0 %v8118_v11  ;;  %5549 = vmatpush1.bf16.msra.mxu1 %v8120_v12  ;;  %v8175_v11 = vcombine.high %v371_v22, %v375_v24  ;;  %v10236_v12 = vld [vmem:[%s12531_s0 + $0x70] ss:$28 sps:$4 sm:$0xff]  }
 0x24a   :  { %4778 = vmatprep.subr.bf16.mxu0 %v8127_v13  ;;  %5550 = vmatprep.subr.bf16.mxu1 %v8129_v16  ;;  %v8177_v13 = vcombine.high %v372_v10, %v376_v25  ;;  %v379_v16 = vld [vmem:[#allocation2 + $0x590] sm:$0xff] }
 0x24d   :  { %4779 = vmatpush1.bf16.msra.mxu0 %v8126_v20  ;;  %5551 = vmatpush1.bf16.msra.mxu1 %v8128_v23  ;;  %v383_v20 = vld [vmem:[#allocation2 + $0x5b0] sm:$0xff]  ;;  %v10237_v23 = vld [vmem:[%s12531_s0 + $0xac] ss:$28 sps:$4 sm:$0xff]  }
 0x24e   :  { %4941 = vmatprep.subr.bf16.mxu0 %v8135_v28  ;;  %5713 = vmatprep.subr.bf16.mxu1 %v8137_v30  ;;  %v380_v28 = vld [vmem:[#allocation2 + $0x598] sm:$0xff]  ;;  %v8174_v30 = vcombine.low %v371_v22, %v375_v24 }
 0x24f   :  { %8402 = vmatmul.mubr.msk.bf16.gmra.mrb[32].mxu0 %vm3155_vm0, %v10159_v29  ;;  %8418 = vmatmul.mubr.msk.bf16.gmra.mrb[32].mxu1 %vm3155_vm0, %v10159_v29  ;;  %v384_v29 = vld [vmem:[#allocation2 + $0x5b8] sm:$0xff] }
 0x250   :  { %3905 = vmatprep.mubr.bf16.mxu0 %v12537_v7  ;;  %4677 = vmatprep.mubr.bf16.mxu1 %v12537_v7  ;;  %v8184_v40 = vcombine.low %v380_v28, %v384_v29  ;;  %v424_v22 = vld [vmem:[#allocation2 + $0x6f8] sm:$0xff] }
 0x257   :  { %8403 = vmatmul.mubr.msk.bf16.gmra.mrb[36].mxu0 %vm3155_vm0, %v10160_v31  ;;  %8419 = vmatmul.mubr.msk.bf16.gmra.mrb[36].mxu1 %vm3155_vm0, %v10160_v31  ;;  %v8176_v31 = vcombine.low %v372_v10, %v376_v25  ;;  %v8216_v10 = vcombine.low %v412_v59, %v416_v60 }
 0x258   :  { %3915 = vmatprep.mubr.bf16.mxu0 %v12537_v7  ;;  %4687 = vmatprep.mubr.bf16.mxu1 %v12537_v7 }
 0x25f   :  { %8404 = vmatmul.mubr.msk.bf16.gmra.mrb[40].mxu0 %vm3155_vm0, %v10161_v33  ;;  %8420 = vmatmul.mubr.msk.bf16.gmra.mrb[40].mxu1 %vm3155_vm0, %v10161_v33  ;;  %v8183_v33 = vcombine.high %v379_v16, %v383_v20 }
 0x260   :  { %3925 = vmatprep.mubr.bf16.mxu0 %v12537_v7  ;;  %4697 = vmatprep.mubr.bf16.mxu1 %v12537_v7 }
 0x267   :  { %8405 = vmatmul.mubr.msk.bf16.gmra.mrb[44].mxu0 %vm3155_vm0, %v10162_v34  ;;  %8421 = vmatmul.mubr.msk.bf16.gmra.mrb[44].mxu1 %vm3155_vm0, %v10162_v34  ;;  %v8185_v34 = vcombine.high %v380_v28, %v384_v29 }
 0x268   :  { %3935 = vmatprep.mubr.bf16.mxu0 %v12537_v7  ;;  %4707 = vmatprep.mubr.bf16.mxu1 %v12537_v7 }
 0x26f   :  { %8406 = vmatmul.mubr.msk.bf16.gmra.mrb[48].mxu0 %vm3155_vm0, %v10163_v35  ;;  %8422 = vmatmul.mubr.msk.bf16.gmra.mrb[48].mxu1 %vm3155_vm0, %v10163_v35  ;;  %v387_v35 = vld [vmem:[#allocation2 + $0x5d0] sm:$0xff] }
 0x270   :  { %3945 = vmatprep.mubr.bf16.mxu0 %v12537_v7  ;;  %4717 = vmatprep.mubr.bf16.mxu1 %v12537_v7 }
 0x277   :  { %8407 = vmatmul.mubr.msk.bf16.gmra.mrb[52].mxu0 %vm3155_vm0, %v10164_v36  ;;  %8423 = vmatmul.mubr.msk.bf16.gmra.mrb[52].mxu1 %vm3155_vm0, %v10164_v36  ;;  %v391_v36 = vld [vmem:[#allocation2 + $0x5f0] sm:$0xff] }
 0x278   :  { %3955 = vmatprep.mubr.bf16.mxu0 %v12537_v7  ;;  %4727 = vmatprep.mubr.bf16.mxu1 %v12537_v7  ;;  %v8191_v1 = vcombine.high %v387_v35, %v391_v36  ;;  %v8190_v43 = vcombine.low %v387_v35, %v391_v36  ;;  %v440_v35 = vld [vmem:[#allocation2 + $0x778] sm:$0xff] }
 0x27f   :  { %8408 = vmatmul.mubr.msk.bf16.gmra.mrb[56].mxu0 %vm3155_vm0, %v10165_v37  ;;  %8424 = vmatmul.mubr.msk.bf16.gmra.mrb[56].mxu1 %vm3155_vm0, %v10165_v37  ;;  %v388_v37 = vld [vmem:[#allocation2 + $0x5d8] sm:$0xff] }
 0x280   :  { %3965 = vmatprep.mubr.bf16.mxu0 %v12537_v7  ;;  %4737 = vmatprep.mubr.bf16.mxu1 %v12537_v7  ;;  %v11374_v7 = vld [vmem:[#allocation2 + $0x950] sm:$0xff] }
 0x287   :  { %8409 = vmatmul.mubr.msk.bf16.gmra.mrb[60].mxu0 %vm3155_vm0, %v10166_v38  ;;  %8425 = vmatmul.mubr.msk.bf16.gmra.mrb[60].mxu1 %vm3155_vm0, %v10166_v38  ;;  %v392_v38 = vld [vmem:[#allocation2 + $0x5f8] sm:$0xff] }
 0x288   :  { %4780 = vmatprep.mubr.bf16.mxu0 %v10231_v39  ;;  %5552 = vmatprep.mubr.bf16.mxu1 %v10231_v39  ;;  %v8182_v39 = vcombine.low %v379_v16, %v383_v20  ;;  %v8193_v4 = vcombine.high %v388_v37, %v392_v38  ;;  %v8192_v44 = vcombine.low %v388_v37, %v392_v38  ;;  %v428_v16 = vld [vmem:[#allocation2 + $0x718] sm:$0xff] }
 0x289   :  { %v432_v20 = vld [vmem:[#allocation2 + $0x738] sm:$0xff] }
 0x28a   :  { %v8232_v37 = vcombine.low %v428_v16, %v432_v20 }
 0x28f   :  { %4781 = vmatmul.mubr.bf16.vlgmr.msra.gmra.mrb[64].mxu0 %v10232_v41  ;;  %5553 = vmatmul.mubr.bf16.vlgmr.msra.gmra.mrb[64].mxu1 %v10232_v41  ;;  %v396_v41 = vld [vmem:[#allocation2 + $0x618] sm:$0xff] }
 0x290   :  { %4942 = vmatpush1.bf16.msra.mxu0 %v8134_v17  ;;  %5714 = vmatpush1.bf16.msra.mxu1 %v8136_v27  ;;  %v11060_v17 = vld [vmem:[#allocation2 + $0x818] sm:$0xff]  ;;  %v8262_v27 = vcombine.low %v11056_v14, %v11058_v15 }
 0x291   :  { %4790 = vmatprep.mubr.bf16.mxu0 %v10233_v46  ;;  %5562 = vmatprep.mubr.bf16.mxu1 %v10233_v46  ;;  %v8264_v54 = vcombine.low %v11060_v17, %v11064_v52 }
 0x292   :  { %4943 = vmatprep.subr.bf16.mxu0 %v8143_v5  ;;  %5715 = vmatprep.subr.bf16.mxu1 %v8145_v42  ;;  %v395_v5 = vld [vmem:[#allocation2 + $0x610] sm:$0xff]  ;;  %v400_v42 = vld [vmem:[#allocation2 + $0x638] sm:$0xff] }
 0x293   :  { %v8201_v46 = vcombine.high %v396_v41, %v400_v42  ;;  %v8198_v51 = vcombine.low %v395_v5, %v399_v6  ;;  %v8200_v18 = vcombine.low %v396_v41, %v400_v42 }
 0x294   :  { %4944 = vmatpush1.bf16.msra.mxu0 %v8142_v45  ;;  %5716 = vmatpush1.bf16.msra.mxu1 %v8144_v47  ;;  %v8199_v45 = vcombine.high %v395_v5, %v399_v6  ;;  %v403_v47 = vld [vmem:[#allocation2 + $0x650] sm:$0xff]  ;;  %v444_v5 = vld [vmem:[#allocation2 + $0x798] sm:$0xff] }
 0x295   :  { %4945 = vmatprep.subr.bf16.mxu0 %v8151_v48  ;;  %5717 = vmatprep.subr.bf16.mxu1 %v8153_v49  ;;  %v407_v48 = vld [vmem:[#allocation2 + $0x670] sm:$0xff]  ;;  %v404_v49 = vld [vmem:[#allocation2 + $0x658] sm:$0xff] }
 0x296   :  { %v8207_v19 = vcombine.high %v403_v47, %v407_v48  ;;  %v8208_v62 = vcombine.low %v404_v49, %v408_v50  ;;  %v448_v6 = vld [vmem:[#allocation2 + $0x7b8] sm:$0xff] }
 0x297   :  { %4791 = vmatmul.mubr.bf16.gmra.mrb[68].mxu0 %v10234_v57  ;;  %5563 = vmatmul.mubr.bf16.gmra.mrb[68].mxu1 %v10234_v57  ;;  %v415_v57 = vld [vmem:[#allocation2 + $0x6b0] sm:$0xff] }
 0x298   :  { %4800 = vmatprep.mubr.bf16.mxu0 %v10235_v61  ;;  %5572 = vmatprep.mubr.bf16.mxu1 %v10235_v61  ;;  %v8206_v61 = vcombine.low %v403_v47, %v407_v48  ;;  %v456_v47 = vld [vmem:[#allocation2 + $0x7f8] sm:$0xff] }
 0x299   :  { %4946 = vmatpush1.bf16.msra.mxu0 %v8150_v53  ;;  %5718 = vmatpush1.bf16.msra.mxu1 %v8152_v55  ;;  %v10240_v53 = vld [vmem:[%s12531_s0 + $0xe0] ss:$28 sps:$4 sm:$0xff]   ;;  %v8209_v55 = vcombine.high %v404_v49, %v408_v50  ;;  %v8248_v49 = vcombine.low %v444_v5, %v448_v6 }
 0x29a   :  { %4947 = vmatprep.subr.bf16.mxu0 %v8159_v56  ;;  %5719 = vmatprep.subr.bf16.mxu1 %v8161_v58  ;;  %v411_v56 = vld [vmem:[#allocation2 + $0x690] sm:$0xff]  ;;  %v10241_v58 = vld [vmem:[%s12531_s0 + $0x11c] ss:$28 sps:$4 sm:$0xff]  }
 0x29b   :  { %v8215_v63 = vcombine.high %v411_v56, %v415_v57  ;;  %v8214_v24 = vcombine.low %v411_v56, %v415_v57  ;;  %v8263_v56 = vcombine.high %v11056_v14, %v11058_v15  ;;  %v8265_v57 = vcombine.high %v11060_v17, %v11064_v52  ;;  %v10265_v14 = vld [vmem:[%s12531_s0 + $0x44] ss:$28 sps:$4 sm:$0xff]  }
 0x29d   :  { %4948 = vmatpush1.bf16.msra.mxu0 %v8158_v0  ;;  %5720 = vmatpush1.bf16.msra.mxu1 %v8160_v3  ;;  %v8217_v0 = vcombine.high %v412_v59, %v416_v60  ;;  %v419_v3 = vld [vmem:[#allocation2 + $0x6d0] sm:$0xff]  ;;  %v10249_v59 = vld [vmem:[%s12531_s0 + $0x1fc] ss:$28 sps:$4 sm:$0xff]   ;;  %v595_v60 = vlaneseq }
 0x29e   :  { %4949 = vmatprep.subr.bf16.mxu0 %v8167_v8  ;;  %5721 = vmatprep.subr.bf16.mxu1 %v8169_v21  ;;  %v423_v8 = vld [vmem:[#allocation2 + $0x6f0] sm:$0xff]  ;;  %v420_v21 = vld [vmem:[#allocation2 + $0x6d8] sm:$0xff] }
 0x29f   :  { %4801 = vmatmul.mubr.bf16.gmra.mrb[72].mxu0 %v10236_v12  ;;  %5573 = vmatmul.mubr.bf16.gmra.mrb[72].mxu1 %v10236_v12  ;;  %v8223_v25 = vcombine.high %v419_v3, %v423_v8  ;;  %v431_v12 = vld [vmem:[#allocation2 + $0x730] sm:$0xff]  ;;  %v8224_v28 = vcombine.low %v420_v21, %v424_v22 }
 0x2a0   :  { %4810 = vmatprep.mubr.bf16.mxu0 %v10237_v23  ;;  %5582 = vmatprep.mubr.bf16.mxu1 %v10237_v23  ;;  %v8222_v23 = vcombine.low %v419_v3, %v423_v8  ;;  %v593_v3 = vld [vmem:[#allocation5] sm:$0xff] }
 0x2a1   :  { %4950 = vmatpush1.bf16.msra.mxu0 %v8166_v26  ;;  %5722 = vmatpush1.bf16.msra.mxu1 %v8168_v32  ;;  %v10242_v26 = vld [vmem:[%s12531_s0 + $0x118] ss:$28 sps:$4 sm:$0xff]   ;;  %v8225_v32 = vcombine.high %v420_v21, %v424_v22 }
 0x2a2   :  { %4951 = vmatprep.subr.bf16.mxu0 %v8175_v11  ;;  %5723 = vmatprep.subr.bf16.mxu1 %v8177_v13  ;;  %v427_v11 = vld [vmem:[#allocation2 + $0x710] sm:$0xff] }
 0x2a3   :  { %v10243_v13 = vld [vmem:[%s12531_s0 + $0x154] ss:$28 sps:$4 sm:$0xff]   ;;  %v8231_v29 = vcombine.high %v427_v11, %v431_v12  ;;  %v8230_v36 = vcombine.low %v427_v11, %v431_v12 }
 0x2a5   :  { %4952 = vmatpush1.bf16.msra.mxu0 %v8174_v30  ;;  %5724 = vmatpush1.bf16.msra.mxu1 %v8176_v31  ;;  %v8233_v30 = vcombine.high %v428_v16, %v432_v20  ;;  %v435_v31 = vld [vmem:[#allocation2 + $0x750] sm:$0xff] }
 0x2a6   :  { %4953 = vmatprep.subr.bf16.mxu0 %v8183_v33  ;;  %5725 = vmatprep.subr.bf16.mxu1 %v8185_v34  ;;  %v439_v33 = vld [vmem:[#allocation2 + $0x770] sm:$0xff]  ;;  %v436_v34 = vld [vmem:[#allocation2 + $0x758] sm:$0xff] }
 0x2a7   :  { %4811 = vmatmul.mubr.bf16.gmra.mrb[76].mxu0 %v10238_v2  ;;  %5583 = vmatmul.mubr.bf16.gmra.mrb[76].mxu1 %v10238_v2  ;;  %v8239_v38 = vcombine.high %v435_v31, %v439_v33  ;;  %v447_v2 = vld [vmem:[#allocation2 + $0x7b0] sm:$0xff]  ;;  %v8240_v41 = vcombine.low %v436_v34, %v440_v35 }
 0x2a8   :  { %4820 = vmatprep.mubr.bf16.mxu0 %v10239_v9  ;;  %5592 = vmatprep.mubr.bf16.mxu1 %v10239_v9  ;;  %v8238_v9 = vcombine.low %v435_v31, %v439_v33 }
 0x2a9   :  { %4954 = vmatpush1.bf16.msra.mxu0 %v8182_v39  ;;  %5726 = vmatpush1.bf16.msra.mxu1 %v8184_v40  ;;  %v10244_v39 = vld [vmem:[%s12531_s0 + $0x150] ss:$28 sps:$4 sm:$0xff]   ;;  %v8241_v40 = vcombine.high %v436_v34, %v440_v35 }
 0x2aa   :  { %4955 = vmatprep.subr.bf16.mxu0 %v8191_v1  ;;  %5727 = vmatprep.subr.bf16.mxu1 %v8193_v4  ;;  %v443_v1 = vld [vmem:[#allocation2 + $0x790] sm:$0xff]  ;;  %v10245_v4 = vld [vmem:[%s12531_s0 + $0x18c] ss:$28 sps:$4 sm:$0xff]  }
 0x2ab   :  { %v8247_v42 = vcombine.high %v443_v1, %v447_v2  ;;  %v8246_v48 = vcombine.low %v443_v1, %v447_v2  ;;  %v10254_v2 = vld [vmem:[%s12531_s0 + $0x268] ss:$28 sps:$4 sm:$0xff]  }
 0x2ad   :  { %4956 = vmatpush1.bf16.msra.mxu0 %v8190_v43  ;;  %5728 = vmatpush1.bf16.msra.mxu1 %v8192_v44  ;;  %v8249_v43 = vcombine.high %v444_v5, %v448_v6  ;;  %v451_v44 = vld [vmem:[#allocation2 + $0x7d0] sm:$0xff] }
 0x2ae   :  { %4957 = vmatprep.subr.bf16.mxu0 %v8199_v45  ;;  %5729 = vmatprep.subr.bf16.mxu1 %v8201_v46  ;;  %v455_v45 = vld [vmem:[#allocation2 + $0x7f0] sm:$0xff]  ;;  %v452_v46 = vld [vmem:[#allocation2 + $0x7d8] sm:$0xff] }
 0x2af   :  { %4821 = vmatmul.mubr.bf16.gmra.mrb[80].mxu0 %v10240_v53  ;;  %5593 = vmatmul.mubr.bf16.gmra.mrb[80].mxu1 %v10240_v53  ;;  %v8255_v50 = vcombine.high %v451_v44, %v455_v45  ;;  %v8254_v53 = vcombine.low %v451_v44, %v455_v45 }
 0x2b0   :  { %4830 = vmatprep.mubr.bf16.mxu0 %v10241_v58  ;;  %5602 = vmatprep.mubr.bf16.mxu1 %v10241_v58  ;;  %v10248_v58 = vld [vmem:[%s12531_s0 + $0x1c0] ss:$28 sps:$4 sm:$0xff]  }
 0x2b1   :  { %4958 = vmatpush1.bf16.msra.mxu0 %v8198_v51  ;;  %5730 = vmatpush1.bf16.msra.mxu1 %v8200_v18  ;;  %v10246_v51 = vld [vmem:[%s12531_s0 + $0x188] ss:$28 sps:$4 sm:$0xff]   ;;  %v8257_v18 = vcombine.high %v452_v46, %v456_v47 }
 0x2b2   :  { %4959 = vmatprep.subr.bf16.mxu0 %v8207_v19  ;;  %5731 = vmatprep.subr.bf16.mxu1 %v8209_v55  ;;  %v10247_v19 = vld [vmem:[%s12531_s0 + $0x1c4] ss:$28 sps:$4 sm:$0xff]   ;;  %v8256_v55 = vcombine.low %v452_v46, %v456_v47 }
 0x2b5   :  { %4960 = vmatpush1.bf16.msra.mxu0 %v8206_v61  ;;  %5732 = vmatpush1.bf16.msra.mxu1 %v8208_v62  ;;  %v10250_v61 = vld [vmem:[%s12531_s0 + $0x1f8] ss:$28 sps:$4 sm:$0xff]   ;;  %v11123_v62 = vshrl.u32 %v595_v60, 7 }
 0x2b6   :  { %4961 = vmatprep.subr.bf16.mxu0 %v8215_v63  ;;  %5733 = vmatprep.subr.bf16.mxu1 %v8217_v0  ;;  %v10251_v63 = vld [vmem:[%s12531_s0 + $0x234] ss:$28 sps:$4 sm:$0xff]  }
 0x2b7   :  { %4831 = vmatmul.mubr.bf16.gmra.mrb[84].mxu0 %v10242_v26  ;;  %5603 = vmatmul.mubr.bf16.gmra.mrb[84].mxu1 %v10242_v26  ;;  %12541 = vst [vmem:[#allocation15_spill] sm:$0xff] %v11123_v62  ;;  %v597_v0 = vsub.s32 0, %v11123_v62  ;;  %v605_v8 = vsub.s32 2, %v11123_v62  ;;  %v601_v21 = vsub.s32 1, %v11123_v62  ;;  %v609_v22 = vsub.s32 3, %v11123_v62 }
 0x2b8   :  { %4840 = vmatprep.mubr.bf16.mxu0 %v10243_v13  ;;  %5612 = vmatprep.mubr.bf16.mxu1 %v10243_v13 }
 0x2b9   :  { %4962 = vmatpush1.bf16.msra.mxu0 %v8214_v24  ;;  %5734 = vmatpush1.bf16.msra.mxu1 %v8216_v10  ;;  %v10252_v24 = vld [vmem:[%s12531_s0 + $0x230] ss:$28 sps:$4 sm:$0xff]   ;;  %v11135_v10 = vrot.slane %v593_v3, %v597_v0  ;;  %v11139_v26 = vrot.slane %v593_v3, %v601_v21  ;;  %v11144_v11 = vrot.slane %v593_v3, %v609_v22  ;;  %v10256_v21 = vld [vmem:[%s12531_s0 + $0x2a0] ss:$28 sps:$4 sm:$0xff]  }
 0x2ba   :  { %4963 = vmatprep.subr.bf16.mxu0 %v8223_v25  ;;  %5735 = vmatprep.subr.bf16.mxu1 %v8225_v32  ;;  %v11137_v25 = vrot.slane %v593_v3, %v605_v8  ;;  %v10253_v32 = vld [vmem:[%s12531_s0 + $0x26c] ss:$28 sps:$4 sm:$0xff]  }
 0x2bd   :  { %4964 = vmatpush1.bf16.msra.mxu0 %v8222_v23  ;;  %5736 = vmatpush1.bf16.msra.mxu1 %v8224_v28 }
 0x2be   :  { %4965 = vmatprep.subr.bf16.mxu0 %v8231_v29  ;;  %5737 = vmatprep.subr.bf16.mxu1 %v8233_v30 }
 0x2bf   :  { %4841 = vmatmul.mubr.bf16.gmra.mrb[88].mxu0 %v10244_v39  ;;  %5613 = vmatmul.mubr.bf16.gmra.mrb[88].mxu1 %v10244_v39 }
 0x2c0   :  { %4850 = vmatprep.mubr.bf16.mxu0 %v10245_v4  ;;  %5622 = vmatprep.mubr.bf16.mxu1 %v10245_v4 }
 0x2c1   :  { %4966 = vmatpush1.bf16.msra.mxu0 %v8230_v36  ;;  %5738 = vmatpush1.bf16.msra.mxu1 %v8232_v37 }
 0x2c2   :  { %4967 = vmatprep.subr.bf16.mxu0 %v8239_v38  ;;  %5739 = vmatprep.subr.bf16.mxu1 %v8241_v40 }
 0x2c5   :  { %4968 = vmatpush1.bf16.msra.mxu0 %v8238_v9  ;;  %5740 = vmatpush1.bf16.msra.mxu1 %v8240_v41  ;;  %v10255_v41 = vld [vmem:[%s12531_s0 + $0x2a4] ss:$28 sps:$4 sm:$0xff]  }
 0x2c6   :  { %4969 = vmatprep.subr.bf16.mxu0 %v8247_v42  ;;  %5741 = vmatprep.subr.bf16.mxu1 %v8249_v43 }
 0x2c7   :  { %4851 = vmatmul.mubr.bf16.gmra.mrb[92].mxu0 %v10246_v51  ;;  %5623 = vmatmul.mubr.bf16.gmra.mrb[92].mxu1 %v10246_v51 }
 0x2c8   :  { %4860 = vmatprep.mubr.bf16.mxu0 %v10247_v19  ;;  %5632 = vmatprep.mubr.bf16.mxu1 %v10247_v19 }
 0x2c9   :  { %4970 = vmatpush1.bf16.msra.mxu0 %v8246_v48  ;;  %5742 = vmatpush1.bf16.msra.mxu1 %v8248_v49 }
 0x2ca   :  { %4971 = vmatprep.subr.bf16.mxu0 %v8255_v50  ;;  %5743 = vmatprep.subr.bf16.mxu1 %v8257_v18 }
 0x2cd   :  { %4972 = vmatpush1.bf16.msra.mxu0 %v8254_v53  ;;  %5744 = vmatpush1.bf16.msra.mxu1 %v8256_v55 }
 0x2ce   :  { %5134 = vmatprep.subr.bf16.mxu0 %v8263_v56  ;;  %5906 = vmatprep.subr.bf16.mxu1 %v8265_v57 }
 0x2cf   :  { %4861 = vmatmul.mubr.bf16.gmra.mrb[96].mxu0 %v10248_v58  ;;  %5633 = vmatmul.mubr.bf16.gmra.mrb[96].mxu1 %v10248_v58 }
 0x2d0   :  { %4870 = vmatprep.mubr.bf16.mxu0 %v10249_v59  ;;  %5642 = vmatprep.mubr.bf16.mxu1 %v10249_v59 }
 0x2d7   :  { %4871 = vmatmul.mubr.bf16.gmra.mrb[100].mxu0 %v10250_v61  ;;  %5643 = vmatmul.mubr.bf16.gmra.mrb[100].mxu1 %v10250_v61 }
 0x2d8   :  { %4880 = vmatprep.mubr.bf16.mxu0 %v10251_v63  ;;  %5652 = vmatprep.mubr.bf16.mxu1 %v10251_v63 }
 0x2df   :  { %4881 = vmatmul.mubr.bf16.gmra.mrb[104].mxu0 %v10252_v24  ;;  %5653 = vmatmul.mubr.bf16.gmra.mrb[104].mxu1 %v10252_v24 }
 0x2e0   :  { %4890 = vmatprep.mubr.bf16.mxu0 %v10253_v32  ;;  %5662 = vmatprep.mubr.bf16.mxu1 %v10253_v32 }
 0x2e2   :  { %v3817_v12 = vpop.f32.mrb[0].mxu0  ;;  %v4589_v16 = vpop.f32.mrb[0].mxu1 }
 0x2e3   :  { %v8971_v13 = vadd.f32 %v3817_v12, %v11135_v10  ;;  %v3819_v20 = vpop.f32.mrb[1].mxu0  ;;  %v9035_v23 = vadd.f32 %v4589_v16, %v11137_v25  ;;  %v4591_v29 = vpop.f32.mrb[1].mxu1 }
 0x2e4   :  { %v8972_v28 = vadd.f32 %v3819_v20, %v11139_v26  ;;  %v3821_v30 = vpop.f32.mrb[2].mxu0  ;;  %v9036_v31 = vadd.f32 %v4591_v29, %v11144_v11  ;;  %v4593_v34 = vpop.f32.mrb[2].mxu1 }
 0x2e5   :  { %v8973_v33 = vadd.f32 %v3821_v30, %v11135_v10  ;;  %v3823_v35 = vpop.f32.mrb[3].mxu0  ;;  %v9037_v36 = vadd.f32 %v4593_v34, %v11137_v25  ;;  %v4595_v38 = vpop.f32.mrb[3].mxu1  ;;  %v6292_v39 = vmax.f32 %v8971_v13, 0.0  ;;  %v6294_v4 = vmax.f32 %v9035_v23, 0.0  ;;  %v10257_v13 = vld [vmem:[%s12531_s0 + $0x2dc] ss:$28 sps:$4 sm:$0xff]  }
 0x2e6   :  { %v8974_v37 = vadd.f32 %v3823_v35, %v11139_v26  ;;  %v9038_v1 = vadd.f32 %v4595_v38, %v11144_v11  ;;  %v6293_v5 = vmax.f32 %v8972_v28, 0.0  ;;  %v6295_v42 = vmax.f32 %v9036_v31, 0.0 }
 0x2e7   :  { %v6300_v40 = vmax.f32 %v8973_v33, 0.0  ;;  %4891 = vmatmul.mubr.bf16.gmra.mrb[108].mxu0 %v10254_v2  ;;  %v6302_v6 = vmax.f32 %v9037_v36, 0.0  ;;  %5663 = vmatmul.mubr.bf16.gmra.mrb[108].mxu1 %v10254_v2 }
 0x2e8   :  { %v6301_v9 = vmax.f32 %v8974_v37, 0.0  ;;  %4900 = vmatprep.mubr.bf16.mxu0 %v10255_v41  ;;  %v6303_v44 = vmax.f32 %v9038_v1, 0.0  ;;  %5672 = vmatprep.mubr.bf16.mxu1 %v10255_v41 }
 0x2e9   :  { %v11160_v43 = vpack.c.bf16 %v6300_v40, %v6292_v39  ;;  %v11162_v45 = vpack.c.bf16 %v6302_v6, %v6294_v4 }
 0x2ea   :  { %v11164_v46 = vpack.c.bf16 %v6301_v9, %v6293_v5  ;;  %v3827_v47 = vpop.f32.mrb[4].mxu0  ;;  %v11166_v48 = vpack.c.bf16 %v6303_v44, %v6295_v42  ;;  %v4599_v50 = vpop.f32.mrb[4].mxu1 }
 0x2eb   :  { %v8975_v49 = vadd.f32 %v3827_v47, %v11135_v10  ;;  %v3829_v51 = vpop.f32.mrb[5].mxu0  ;;  %v9039_v18 = vadd.f32 %v4599_v50, %v11137_v25  ;;  %v4601_v53 = vpop.f32.mrb[5].mxu1  ;;  %v10258_v47 = vld [vmem:[%s12531_s0 + $0x2d8] ss:$28 sps:$4 sm:$0xff]  }
 0x2ec   :  { %v8976_v19 = vadd.f32 %v3829_v51, %v11139_v26  ;;  %v3831_v55 = vpop.f32.mrb[6].mxu0  ;;  %v9040_v56 = vadd.f32 %v4601_v53, %v11144_v11  ;;  %v4603_v58 = vpop.f32.mrb[6].mxu1 }
 0x2ed   :  { %v8977_v57 = vadd.f32 %v3831_v55, %v11135_v10  ;;  %v3833_v59 = vpop.f32.mrb[7].mxu0  ;;  %v9041_v60 = vadd.f32 %v4603_v58, %v11137_v25  ;;  %v4605_v63 = vpop.f32.mrb[7].mxu1  ;;  %v6308_v0 = vmax.f32 %v8975_v49, 0.0  ;;  %v6310_v22 = vmax.f32 %v9039_v18, 0.0 }
 0x2ee   :  { %v8978_v61 = vadd.f32 %v3833_v59, %v11139_v26  ;;  %v9042_v8 = vadd.f32 %v4605_v63, %v11144_v11  ;;  %v6309_v24 = vmax.f32 %v8976_v19, 0.0  ;;  %v6311_v16 = vmax.f32 %v9040_v56, 0.0  ;;  %v10259_v19 = vld [vmem:[%s12531_s0 + $0x314] ss:$28 sps:$4 sm:$0xff]  }
 0x2ef   :  { %v6316_v3 = vmax.f32 %v8977_v57, 0.0  ;;  %4901 = vmatmul.mubr.bf16.gmra.mrb[112].mxu0 %v10256_v21  ;;  %v6318_v32 = vmax.f32 %v9041_v60, 0.0  ;;  %5673 = vmatmul.mubr.bf16.gmra.mrb[112].mxu1 %v10256_v21 }
 0x2f0   :  { %v6317_v12 = vmax.f32 %v8978_v61, 0.0  ;;  %4910 = vmatprep.mubr.bf16.mxu0 %v10257_v13  ;;  %v6319_v23 = vmax.f32 %v9042_v8, 0.0  ;;  %5682 = vmatprep.mubr.bf16.mxu1 %v10257_v13 }
 0x2f1   :  { %v11182_v20 = vpack.c.bf16 %v6316_v3, %v6308_v0  ;;  %v11184_v28 = vpack.c.bf16 %v6318_v32, %v6310_v22 }
 0x2f2   :  { %v11186_v29 = vpack.c.bf16 %v6317_v12, %v6309_v24  ;;  %v3837_v30 = vpop.f32.mrb[8].mxu0  ;;  %v11188_v31 = vpack.c.bf16 %v6319_v23, %v6311_v16  ;;  %v4609_v34 = vpop.f32.mrb[8].mxu1 }
 0x2f3   :  { %v8979_v33 = vadd.f32 %v3837_v30, %v11135_v10  ;;  %v3839_v35 = vpop.f32.mrb[9].mxu0  ;;  %v9043_v36 = vadd.f32 %v4609_v34, %v11137_v25  ;;  %v4611_v38 = vpop.f32.mrb[9].mxu1 }
 0x2f4   :  { %v8980_v37 = vadd.f32 %v3839_v35, %v11139_v26  ;;  %v3841_v39 = vpop.f32.mrb[10].mxu0  ;;  %v9044_v40 = vadd.f32 %v4611_v38, %v11144_v11  ;;  %v4613_v2 = vpop.f32.mrb[10].mxu1 }
 0x2f5   :  { %v8981_v1 = vadd.f32 %v3841_v39, %v11135_v10  ;;  %v3843_v4 = vpop.f32.mrb[11].mxu0  ;;  %v9045_v5 = vadd.f32 %v4613_v2, %v11137_v25  ;;  %v4615_v9 = vpop.f32.mrb[11].mxu1  ;;  %v6324_v41 = vmax.f32 %v8979_v33, 0.0  ;;  %v6326_v49 = vmax.f32 %v9043_v36, 0.0  ;;  %v10260_v36 = vld [vmem:[%s12531_s0 + $0x310] ss:$28 sps:$4 sm:$0xff]  }
 0x2f6   :  { %v8982_v6 = vadd.f32 %v3843_v4, %v11139_v26  ;;  %v9046_v44 = vadd.f32 %v4615_v9, %v11144_v11  ;;  %v6325_v50 = vmax.f32 %v8980_v37, 0.0  ;;  %v6327_v53 = vmax.f32 %v9044_v40, 0.0 }
 0x2f7   :  { %v6332_v42 = vmax.f32 %v8981_v1, 0.0  ;;  %4911 = vmatmul.mubr.bf16.gmra.mrb[116].mxu0 %v10258_v47  ;;  %v6334_v51 = vmax.f32 %v9045_v5, 0.0  ;;  %5683 = vmatmul.mubr.bf16.gmra.mrb[116].mxu1 %v10258_v47  ;;  %v10261_v1 = vld [vmem:[%s12531_s0 + $0x34c] ss:$28 sps:$4 sm:$0xff]  }
 0x2f8   :  { %v6333_v18 = vmax.f32 %v8982_v6, 0.0  ;;  %4920 = vmatprep.mubr.bf16.mxu0 %v10259_v19  ;;  %v6335_v56 = vmax.f32 %v9046_v44, 0.0  ;;  %5692 = vmatprep.mubr.bf16.mxu1 %v10259_v19 }
 0x2f9   :  { %v11204_v55 = vpack.c.bf16 %v6332_v42, %v6324_v41  ;;  %v11206_v57 = vpack.c.bf16 %v6334_v51, %v6326_v49 }
 0x2fa   :  { %v11208_v58 = vpack.c.bf16 %v6333_v18, %v6325_v50  ;;  %v3847_v59 = vpop.f32.mrb[12].mxu0  ;;  %v11210_v60 = vpack.c.bf16 %v6335_v56, %v6327_v53  ;;  %v4619_v63 = vpop.f32.mrb[12].mxu1 }
 0x2fb   :  { %v8983_v61 = vadd.f32 %v3847_v59, %v11135_v10  ;;  %v3849_v0 = vpop.f32.mrb[13].mxu0  ;;  %v9047_v3 = vadd.f32 %v4619_v63, %v11137_v25  ;;  %v4621_v21 = vpop.f32.mrb[13].mxu1 }
 0x2fc   :  { %v8984_v8 = vadd.f32 %v3849_v0, %v11139_v26  ;;  %v3851_v22 = vpop.f32.mrb[14].mxu0  ;;  %v9048_v24 = vadd.f32 %v4621_v21, %v11144_v11  ;;  %v4623_v12 = vpop.f32.mrb[14].mxu1 }
 0x2fd   :  { %v8985_v32 = vadd.f32 %v3851_v22, %v11135_v10  ;;  %v3853_v13 = vpop.f32.mrb[15].mxu0  ;;  %v9049_v16 = vadd.f32 %v4623_v12, %v11137_v25  ;;  %v4625_v30 = vpop.f32.mrb[15].mxu1  ;;  %v6340_v33 = vmax.f32 %v8983_v61, 0.0  ;;  %v6342_v37 = vmax.f32 %v9047_v3, 0.0 }
 0x2fe   :  { %v8986_v23 = vadd.f32 %v3853_v13, %v11139_v26  ;;  %v9050_v35 = vadd.f32 %v4625_v30, %v11144_v11  ;;  %v6341_v38 = vmax.f32 %v8984_v8, 0.0  ;;  %v6343_v2 = vmax.f32 %v9048_v24, 0.0  ;;  %v10262_v24 = vld [vmem:[%s12531_s0 + $0x348] ss:$28 sps:$4 sm:$0xff]  }
 0x2ff   :  { %v6348_v34 = vmax.f32 %v8985_v32, 0.0  ;;  %4921 = vmatmul.mubr.bf16.gmra.mrb[120].mxu0 %v10260_v36  ;;  %v6350_v39 = vmax.f32 %v9049_v16, 0.0  ;;  %5693 = vmatmul.mubr.bf16.gmra.mrb[120].mxu1 %v10260_v36  ;;  %v11252_v36 = vld [vmem:[#allocation2 + $0x870] sm:$0xff] }
 0x300   :  { %v6349_v40 = vmax.f32 %v8986_v23, 0.0  ;;  %4930 = vmatprep.mubr.bf16.mxu0 %v10261_v1  ;;  %v6351_v5 = vmax.f32 %v9050_v35, 0.0  ;;  %5702 = vmatprep.mubr.bf16.mxu1 %v10261_v1  ;;  %v10263_v23 = vld [vmem:[%s12531_s0 + $0xc] ss:$28 sps:$4 sm:$0xff]   ;;  %v11250_v35 = vld [vmem:[#allocation2 + $0x850] sm:$0xff]  ;;  %v11260_v1 = vld [vmem:[#allocation2 + $0x878] sm:$0xff] }
 0x301   :  { %v11226_v4 = vpack.c.bf16 %v6348_v34, %v6340_v33  ;;  %v11228_v6 = vpack.c.bf16 %v6350_v39, %v6342_v37 }
 0x302   :  { %v11230_v9 = vpack.c.bf16 %v6349_v40, %v6341_v38  ;;  %v3857_v41 = vpop.f32.mrb[16].mxu0  ;;  %v11232_v42 = vpack.c.bf16 %v6351_v5, %v6343_v2  ;;  %v4629_v47 = vpop.f32.mrb[16].mxu1  ;;  %v11258_v40 = vld [vmem:[#allocation2 + $0x858] sm:$0xff] }
 0x303   :  { %v8987_v44 = vadd.f32 %v3857_v41, %v11135_v10  ;;  %v3859_v49 = vpop.f32.mrb[17].mxu0  ;;  %v9051_v50 = vadd.f32 %v4629_v47, %v11137_v25  ;;  %v4631_v18 = vpop.f32.mrb[17].mxu1  ;;  %v11265_v47 = vld [vmem:[#allocation2 + $0x890] sm:$0xff] }
 0x304   :  { %v8988_v51 = vadd.f32 %v3859_v49, %v11139_v26  ;;  %v3861_v19 = vpop.f32.mrb[18].mxu0  ;;  %v9052_v53 = vadd.f32 %v4631_v18, %v11144_v11  ;;  %v4633_v59 = vpop.f32.mrb[18].mxu1  ;;  %v11267_v49 = vld [vmem:[#allocation2 + $0x8b0] sm:$0xff] }
 0x305   :  { %v8989_v56 = vadd.f32 %v3861_v19, %v11135_v10  ;;  %v3863_v61 = vpop.f32.mrb[19].mxu0  ;;  %v9053_v63 = vadd.f32 %v4633_v59, %v11137_v25  ;;  %v4635_v3 = vpop.f32.mrb[19].mxu1  ;;  %v6356_v8 = vmax.f32 %v8987_v44, 0.0  ;;  %v6358_v32 = vmax.f32 %v9051_v50, 0.0 }
 0x306   :  { %v8990_v0 = vadd.f32 %v3863_v61, %v11139_v26  ;;  %v9054_v22 = vadd.f32 %v4635_v3, %v11144_v11  ;;  %v6357_v12 = vmax.f32 %v8988_v51, 0.0  ;;  %v6359_v30 = vmax.f32 %v9052_v53, 0.0 }
 0x307   :  { %v6364_v21 = vmax.f32 %v8989_v56, 0.0  ;;  %4931 = vmatmul.mubr.bf16.gmra.mrb[124].mxu0 %v10262_v24  ;;  %v6366_v13 = vmax.f32 %v9053_v63, 0.0  ;;  %5703 = vmatmul.mubr.bf16.gmra.mrb[124].mxu1 %v10262_v24  ;;  %v8270_v53 = vcombine.low %v11250_v35, %v11252_v36  ;;  %v8272_v3 = vcombine.low %v11258_v40, %v11260_v1 }
 0x308   :  { %v6365_v16 = vmax.f32 %v8990_v0, 0.0  ;;  %4973 = vmatprep.mubr.bf16.mxu0 %v10263_v23  ;;  %v6367_v34 = vmax.f32 %v9054_v22, 0.0  ;;  %5745 = vmatprep.mubr.bf16.mxu1 %v10263_v23  ;;  %v8271_v0 = vcombine.high %v11250_v35, %v11252_v36  ;;  %v8273_v24 = vcombine.high %v11258_v40, %v11260_v1  ;;  %v11291_v35 = vld [vmem:[#allocation2 + $0x8b8] sm:$0xff]  ;;  %v11293_v36 = vld [vmem:[#allocation2 + $0xc10] sm:$0xff] }
 0x309   :  { %v11248_v33 = vpack.c.bf16 %v6364_v21, %v6356_v8  ;;  %v11254_v37 = vpack.c.bf16 %v6366_v13, %v6358_v32  ;;  %v8279_v32 = vcombine.high %v11265_v47, %v11267_v49 }
 0x30a   :  { %v11256_v38 = vpack.c.bf16 %v6365_v16, %v6357_v12  ;;  %v3867_v39 = vpop.f32.mrb[20].mxu0  ;;  %v11262_v2 = vpack.c.bf16 %v6367_v34, %v6359_v30  ;;  %v4639_v41 = vpop.f32.mrb[20].mxu1  ;;  %v11285_v12 = vld [vmem:[#allocation2 + $0x898] sm:$0xff]  ;;  %v10264_v34 = vld [vmem:[%s12531_s0 + $0x8] ss:$28 sps:$4 sm:$0xff]  }
 0x30b   :  { %v8991_v5 = vadd.f32 %v3867_v39, %v11135_v10  ;;  %v3869_v44 = vpop.f32.mrb[21].mxu0  ;;  %v9055_v50 = vadd.f32 %v4639_v41, %v11137_v25  ;;  %v4641_v18 = vpop.f32.mrb[21].mxu1  ;;  %v11295_v39 = vld [vmem:[#allocation2 + $0xc30] sm:$0xff] }
 0x30c   :  { %v8992_v51 = vadd.f32 %v3869_v44, %v11139_v26  ;;  %v3871_v19 = vpop.f32.mrb[22].mxu0  ;;  %v9056_v56 = vadd.f32 %v4641_v18, %v11144_v11  ;;  %v4643_v61 = vpop.f32.mrb[22].mxu1  ;;  %v11302_v44 = vld [vmem:[#allocation2 + $0xc18] sm:$0xff] }
 0x30d   :  { %v8993_v59 = vadd.f32 %v3871_v19, %v11135_v10  ;;  %v3873_v63 = vpop.f32.mrb[23].mxu0  ;;  %v9057_v8 = vadd.f32 %v4643_v61, %v11137_v25  ;;  %v4645_v22 = vpop.f32.mrb[23].mxu1  ;;  %v6372_v13 = vmax.f32 %v8991_v5, 0.0  ;;  %v6374_v16 = vmax.f32 %v9055_v50, 0.0  ;;  %v11304_v50 = vld [vmem:[#allocation2 + $0xc38] sm:$0xff] }
 0x30e   :  { %v8994_v21 = vadd.f32 %v3873_v63, %v11139_v26  ;;  %v9058_v30 = vadd.f32 %v4645_v22, %v11144_v11  ;;  %v6373_v40 = vmax.f32 %v8992_v51, 0.0  ;;  %v6375_v18 = vmax.f32 %v9056_v56, 0.0 }
 0x30f   :  { %v6380_v23 = vmax.f32 %v8993_v59, 0.0  ;;  %4974 = vmatmul.mubr.bf16.vlgmr.msra.gmra.mrb[64].mxu0 %v10264_v34  ;;  %v6382_v1 = vmax.f32 %v9057_v8, 0.0  ;;  %5746 = vmatmul.mubr.bf16.vlgmr.msra.gmra.mrb[64].mxu1 %v10264_v34  ;;  %v8281_v61 = vcombine.high %v11285_v12, %v11291_v35  ;;  %v11325_v8 = vld [vmem:[#allocation2 + $0x8d0] sm:$0xff]  ;;  %v11335_v34 = vld [vmem:[#allocation2 + $0x8f8] sm:$0xff] }
 0x310   :  { %v6381_v41 = vmax.f32 %v8994_v21, 0.0  ;;  %5135 = vmatpush1.bf16.msra.mxu0 %v8262_v27  ;;  %v6383_v59 = vmax.f32 %v9058_v30, 0.0  ;;  %5907 = vmatpush1.bf16.msra.mxu1 %v8264_v54  ;;  %v11327_v21 = vld [vmem:[#allocation2 + $0x8f0] sm:$0xff]  ;;  %v11333_v30 = vld [vmem:[#allocation2 + $0x8d8] sm:$0xff] }
 0x311   :  { %v11306_v19 = vpack.c.bf16 %v6380_v23, %v6372_v13  ;;  %4983 = vmatprep.mubr.bf16.mxu0 %v10265_v14  ;;  %v11316_v27 = vpack.c.bf16 %v6382_v1, %v6374_v16  ;;  %5755 = vmatprep.mubr.bf16.mxu1 %v10265_v14  ;;  %v8278_v23 = vcombine.low %v11265_v47, %v11267_v49 }
 0x312   :  { %v11318_v51 = vpack.c.bf16 %v6381_v41, %v6373_v40  ;;  %v3877_v56 = vpop.f32.mrb[24].mxu0  ;;  %5136 = vmatprep.subr.bf16.mxu0 %v8271_v0  ;;  %v11322_v17 = vpack.c.bf16 %v6383_v59, %v6375_v18  ;;  %v4649_v54 = vpop.f32.mrb[24].mxu1  ;;  %5908 = vmatprep.subr.bf16.mxu1 %v8273_v24  ;;  %v8280_v18 = vcombine.low %v11285_v12, %v11291_v35  ;;  %v11353_v35 = vld [vmem:[#allocation2 + $0x910] sm:$0xff] }
 0x313   :  { %v8995_v52 = vadd.f32 %v3877_v56, %v11135_v10  ;;  %v3879_v63 = vpop.f32.mrb[25].mxu0  ;;  %v9059_v22 = vadd.f32 %v4649_v54, %v11137_v25  ;;  %v4651_v16 = vpop.f32.mrb[25].mxu1  ;;  %v8286_v49 = vcombine.low %v11325_v8, %v11327_v21  ;;  %v8287_v14 = vcombine.high %v11325_v8, %v11327_v21  ;;  %v11360_v21 = vld [vmem:[#allocation2 + $0x918] sm:$0xff] }
 0x314   :  { %v8996_v13 = vadd.f32 %v3879_v63, %v11139_v26  ;;  %v3881_v0 = vpop.f32.mrb[26].mxu0  ;;  %5137 = vmatpush1.bf16.msra.mxu0 %v8270_v53  ;;  %v9060_v24 = vadd.f32 %v4651_v16, %v11144_v11  ;;  %v4653_v1 = vpop.f32.mrb[26].mxu1  ;;  %5909 = vmatpush1.bf16.msra.mxu1 %v8272_v3  ;;  %v8289_v12 = vcombine.high %v11333_v30, %v11335_v34 }
 0x315   :  { %v8997_v40 = vadd.f32 %v3881_v0, %v11135_v10  ;;  %v3883_v41 = vpop.f32.mrb[27].mxu0  ;;  %5138 = vmatprep.subr.bf16.mxu0 %v8279_v32  ;;  %v9061_v53 = vadd.f32 %v4653_v1, %v11137_v25  ;;  %v4655_v47 = vpop.f32.mrb[27].mxu1  ;;  %5910 = vmatprep.subr.bf16.mxu1 %v8281_v61  ;;  %v6388_v56 = vmax.f32 %v8995_v52, 0.0  ;;  %v10266_v32 = vld [vmem:[%s12531_s0 + $0x40] ss:$28 sps:$4 sm:$0xff]   ;;  %v11355_v61 = vld [vmem:[#allocation2 + $0x930] sm:$0xff] }
 0x316   :  { %v8998_v59 = vadd.f32 %v3883_v41, %v11139_v26  ;;  %v9062_v3 = vadd.f32 %v4655_v47, %v11144_v11  ;;  %v6390_v63 = vmax.f32 %v9059_v22, 0.0  ;;  %v6389_v16 = vmax.f32 %v8996_v13, 0.0  ;;  %v10267_v52 = vld [vmem:[%s12531_s0 + $0x7c] ss:$28 sps:$4 sm:$0xff]  }
 0x317   :  { %v6396_v54 = vmax.f32 %v8997_v40, 0.0  ;;  %4984 = vmatmul.mubr.bf16.gmra.mrb[68].mxu0 %v10266_v32  ;;  %v6398_v0 = vmax.f32 %v9061_v53, 0.0  ;;  %5756 = vmatmul.mubr.bf16.gmra.mrb[68].mxu1 %v10266_v32  ;;  %v11362_v40 = vld [vmem:[#allocation2 + $0x938] sm:$0xff]  ;;  %v6391_v1 = vmax.f32 %v9060_v24, 0.0  ;;  %v8288_v22 = vcombine.low %v11333_v30, %v11335_v34  ;;  %v11376_v24 = vld [vmem:[#allocation2 + $0x970] sm:$0xff] }
 0x318   :  { %v6397_v8 = vmax.f32 %v8998_v59, 0.0  ;;  %4993 = vmatprep.mubr.bf16.mxu0 %v10267_v52  ;;  %v6399_v47 = vmax.f32 %v9062_v3, 0.0  ;;  %5765 = vmatprep.mubr.bf16.mxu1 %v10267_v52  ;;  %v8295_v32 = vcombine.high %v11353_v35, %v11355_v61  ;;  %v8297_v34 = vcombine.high %v11360_v21, %v11362_v40 }
 0x319   :  { %v11364_v41 = vpack.c.bf16 %v6396_v54, %v6388_v56  ;;  %5139 = vmatpush1.bf16.msra.mxu0 %v8278_v23  ;;  %v11368_v13 = vpack.c.bf16 %v6398_v0, %v6390_v63  ;;  %5911 = vmatpush1.bf16.msra.mxu1 %v8280_v18  ;;  %v11387_v0 = vld [vmem:[#allocation2 + $0x958] sm:$0xff] }
 0x31a   :  { %v11370_v53 = vpack.c.bf16 %v6397_v8, %v6389_v16  ;;  %v3887_v59 = vpop.f32.mrb[28].mxu0  ;;  %5140 = vmatprep.subr.bf16.mxu0 %v8287_v14  ;;  %v11378_v56 = vpack.c.bf16 %v6399_v47, %v6391_v1  ;;  %v4659_v54 = vpop.f32.mrb[28].mxu1  ;;  %5912 = vmatprep.subr.bf16.mxu1 %v8289_v12  ;;  %v8294_v16 = vcombine.low %v11353_v35, %v11355_v61  ;;  %v11389_v8 = vld [vmem:[#allocation2 + $0x978] sm:$0xff] }
 0x31b   :  { %12542 = vst [vmem:[#allocation16_spill] sm:$0xff] %v11368_v13  ;;  %v8999_v23 = vadd.f32 %v3887_v59, %v11135_v10  ;;  %v3889_v30 = vpop.f32.mrb[29].mxu0  ;;  %v9063_v18 = vadd.f32 %v4659_v54, %v11137_v25  ;;  %v4661_v3 = vpop.f32.mrb[29].mxu1  ;;  %v8296_v59 = vcombine.low %v11360_v21, %v11362_v40  ;;  %v8302_v54 = vcombine.low %v11374_v7, %v11376_v24  ;;  %v10268_v21 = vld [vmem:[%s12531_s0 + $0x78] ss:$28 sps:$4 sm:$0xff]  }
 0x31c   :  { %v9000_v14 = vadd.f32 %v3889_v30, %v11139_v26  ;;  %v3891_v63 = vpop.f32.mrb[30].mxu0  ;;  %v9064_v52 = vadd.f32 %v4661_v3, %v11144_v11  ;;  %v4663_v1 = vpop.f32.mrb[30].mxu1  ;;  %v8303_v3 = vcombine.high %v11374_v7, %v11376_v24  ;;  %v8305_v40 = vcombine.high %v11387_v0, %v11389_v8  ;;  %v11428_v13 = vld [vmem:[#allocation2 + $0x9d0] sm:$0xff] }
 0x31d   :  { %v9001_v12 = vadd.f32 %v3891_v63, %v11135_v10  ;;  %v3893_v47 = vpop.f32.mrb[31].mxu0  ;;  %5141 = vmatpush1.bf16.msra.mxu0 %v8286_v49  ;;  %v9065_v30 = vadd.f32 %v4663_v1, %v11137_v25  ;;  %v4665_v61 = vpop.f32.mrb[31].mxu1  ;;  %5913 = vmatpush1.bf16.msra.mxu1 %v8288_v22  ;;  %v6404_v63 = vmax.f32 %v8999_v23, 0.0  ;;  %v11407_v1 = vld [vmem:[#allocation2 + $0x990] sm:$0xff] }
 0x31e   :  { %v9002_v35 = vadd.f32 %v3893_v47, %v11139_v26  ;;  %5142 = vmatprep.subr.bf16.mxu0 %v8295_v32  ;;  %v9066_v49 = vadd.f32 %v4665_v61, %v11144_v11  ;;  %5914 = vmatprep.subr.bf16.mxu1 %v8297_v34  ;;  %v11409_v22 = vld [vmem:[#allocation2 + $0x9b0] sm:$0xff]  ;;  %v6406_v32 = vmax.f32 %v9063_v18, 0.0  ;;  %v6405_v47 = vmax.f32 %v9000_v14, 0.0  ;;  %v11416_v34 = vld [vmem:[#allocation2 + $0x9b8] sm:$0xff] }
 0x31f   :  { %v6412_v15 = vmax.f32 %v9001_v12, 0.0  ;;  %4994 = vmatmul.mubr.bf16.gmra.mrb[72].mxu0 %v10268_v21  ;;  %v6414_v7 = vmax.f32 %v9065_v30, 0.0  ;;  %5766 = vmatmul.mubr.bf16.gmra.mrb[72].mxu1 %v10268_v21  ;;  %v10269_v23 = vld [vmem:[%s12531_s0 + $0xb4] ss:$28 sps:$4 sm:$0xff]   ;;  %v11414_v12 = vld [vmem:[#allocation2 + $0x998] sm:$0xff]  ;;  %v6407_v61 = vmax.f32 %v9064_v52, 0.0  ;;  %v8304_v18 = vcombine.low %v11387_v0, %v11389_v8 }
 0x320   :  { %v6413_v24 = vmax.f32 %v9002_v35, 0.0  ;;  %5003 = vmatprep.mubr.bf16.mxu0 %v10269_v23  ;;  %v6415_v62 = vmax.f32 %v9066_v49, 0.0  ;;  %5775 = vmatprep.mubr.bf16.mxu1 %v10269_v23  ;;  %v8311_v21 = vcombine.high %v11407_v1, %v11409_v22  ;;  %v8313_v8 = vcombine.high %v11414_v12, %v11416_v34 }
 0x321   :  { %v11418_v5 = vpack.c.bf16 %v6412_v15, %v6404_v63  ;;  %5143 = vmatpush1.bf16.msra.mxu0 %v8294_v16  ;;  %v11422_v14 = vpack.c.bf16 %v6414_v7, %v6406_v32  ;;  %5915 = vmatpush1.bf16.msra.mxu1 %v8296_v59  ;;  %v11430_v15 = vld [vmem:[#allocation2 + $0x9f0] sm:$0xff]  ;;  %v11441_v7 = vld [vmem:[#allocation2 + $0x9d8] sm:$0xff] }
 0x322   :  { %v11424_v30 = vpack.c.bf16 %v6413_v24, %v6405_v47  ;;  %v3897_v35 = vpop.f32.mrb[32].mxu0  ;;  %5144 = vmatprep.subr.bf16.mxu0 %v8303_v3  ;;  %v11432_v52 = vpack.c.bf16 %v6415_v62, %v6407_v61  ;;  %v4669_v63 = vpop.f32.mrb[32].mxu1  ;;  %5916 = vmatprep.subr.bf16.mxu1 %v8305_v40  ;;  %v8310_v47 = vcombine.low %v11407_v1, %v11409_v22  ;;  %v11443_v62 = vld [vmem:[#allocation2 + $0x9f8] sm:$0xff] }
 0x323   :  { %12543 = vst [vmem:[#allocation17_spill] sm:$0xff] %v11418_v5  ;;  %12544 = vst [vmem:[#allocation18_spill] sm:$0xff] %v11422_v14  ;;  %v9003_v16 = vadd.f32 %v3897_v35, %v11135_v10  ;;  %v3899_v0 = vpop.f32.mrb[33].mxu0  ;;  %v9067_v59 = vadd.f32 %v4669_v63, %v11137_v25  ;;  %v4671_v49 = vpop.f32.mrb[33].mxu1  ;;  %v8312_v35 = vcombine.low %v11414_v12, %v11416_v34  ;;  %v10270_v12 = vld [vmem:[%s12531_s0 + $0xb0] ss:$28 sps:$4 sm:$0xff]  }
 0x324   :  { %12545 = vst [vmem:[#allocation19_spill] sm:$0xff] %v11424_v30  ;;  %12546 = vst [vmem:[#allocation20_spill] sm:$0xff] %v11432_v52  ;;  %v9004_v3 = vadd.f32 %v3899_v0, %v11139_v26  ;;  %v3901_v32 = vpop.f32.mrb[34].mxu0  ;;  %v9068_v24 = vadd.f32 %v4671_v49, %v11144_v11  ;;  %v4673_v23 = vpop.f32.mrb[34].mxu1  ;;  %v8318_v63 = vcombine.low %v11428_v13, %v11430_v15  ;;  %v11482_v30 = vld [vmem:[#allocation2 + $0xa50] sm:$0xff] }
 0x325   :  { %v9005_v40 = vadd.f32 %v3901_v32, %v11135_v10  ;;  %v3903_v61 = vpop.f32.mrb[35].mxu0  ;;  %5145 = vmatpush1.bf16.msra.mxu0 %v8302_v54  ;;  %v9069_v0 = vadd.f32 %v4673_v23, %v11137_v25  ;;  %v4675_v22 = vpop.f32.mrb[35].mxu1  ;;  %5917 = vmatpush1.bf16.msra.mxu1 %v8304_v18  ;;  %v8319_v49 = vcombine.high %v11428_v13, %v11430_v15  ;;  %v6420_v32 = vmax.f32 %v9003_v16, 0.0  ;;  %v11461_v23 = vld [vmem:[#allocation2 + $0xa10] sm:$0xff]  ;;  %v10271_v16 = vld [vmem:[%s12531_s0 + $0xec] ss:$28 sps:$4 sm:$0xff]  }
 0x326   :  { %v9006_v1 = vadd.f32 %v3903_v61, %v11139_v26  ;;  %5146 = vmatprep.subr.bf16.mxu0 %v8311_v21  ;;  %v9070_v54 = vadd.f32 %v4675_v22, %v11144_v11  ;;  %5918 = vmatprep.subr.bf16.mxu1 %v8313_v8  ;;  %v8321_v34 = vcombine.high %v11441_v7, %v11443_v62  ;;  %v11463_v18 = vld [vmem:[#allocation2 + $0xa30] sm:$0xff]  ;;  %v6422_v21 = vmax.f32 %v9067_v59, 0.0  ;;  %v11470_v8 = vld [vmem:[#allocation2 + $0xa38] sm:$0xff] }
 0x327   :  { %v6428_v14 = vmax.f32 %v9005_v40, 0.0  ;;  %5004 = vmatmul.mubr.bf16.gmra.mrb[76].mxu0 %v10270_v12  ;;  %v6421_v61 = vmax.f32 %v9004_v3, 0.0  ;;  %v6430_v13 = vmax.f32 %v9069_v0, 0.0  ;;  %5776 = vmatmul.mubr.bf16.gmra.mrb[76].mxu1 %v10270_v12  ;;  %v11468_v40 = vld [vmem:[#allocation2 + $0xa18] sm:$0xff]  ;;  %v6423_v22 = vmax.f32 %v9068_v24, 0.0 }
 0x328   :  { %v6429_v15 = vmax.f32 %v9006_v1, 0.0  ;;  %5013 = vmatprep.mubr.bf16.mxu0 %v10271_v16  ;;  %v6431_v52 = vmax.f32 %v9070_v54, 0.0  ;;  %5785 = vmatprep.mubr.bf16.mxu1 %v10271_v16  ;;  %v8320_v59 = vcombine.low %v11441_v7, %v11443_v62  ;;  %v8327_v12 = vcombine.high %v11461_v23, %v11463_v18 }
 0x329   :  { %v11472_v5 = vpack.c.bf16 %v6428_v14, %v6420_v32  ;;  %5147 = vmatpush1.bf16.msra.mxu0 %v8310_v47  ;;  %v11476_v3 = vpack.c.bf16 %v6430_v13, %v6422_v21  ;;  %5919 = vmatpush1.bf16.msra.mxu1 %v8312_v35  ;;  %v11484_v14 = vld [vmem:[#allocation2 + $0xa70] sm:$0xff]  ;;  %v8329_v62 = vcombine.high %v11468_v40, %v11470_v8  ;;  %v11495_v13 = vld [vmem:[#allocation2 + $0xa58] sm:$0xff] }
 0x32a   :  { %v11478_v0 = vpack.c.bf16 %v6429_v15, %v6421_v61  ;;  %v3907_v1 = vpop.f32.mrb[36].mxu0  ;;  %5148 = vmatprep.subr.bf16.mxu0 %v8319_v49  ;;  %v11486_v24 = vpack.c.bf16 %v6431_v52, %v6423_v22  ;;  %v4679_v32 = vpop.f32.mrb[36].mxu1  ;;  %5920 = vmatprep.subr.bf16.mxu1 %v8321_v34  ;;  %v8326_v61 = vcombine.low %v11461_v23, %v11463_v18  ;;  %v11497_v52 = vld [vmem:[#allocation2 + $0xa78] sm:$0xff] }
 0x32b   :  { %12547 = vst [vmem:[#allocation21_spill] sm:$0xff] %v11472_v5  ;;  %12548 = vst [vmem:[#allocation22_spill] sm:$0xff] %v11476_v3  ;;  %v9007_v47 = vadd.f32 %v3907_v1, %v11135_v10  ;;  %v3909_v7 = vpop.f32.mrb[37].mxu0  ;;  %v9071_v35 = vadd.f32 %v4679_v32, %v11137_v25  ;;  %v4681_v54 = vpop.f32.mrb[37].mxu1  ;;  %v8328_v1 = vcombine.low %v11468_v40, %v11470_v8  ;;  %v10272_v40 = vld [vmem:[%s12531_s0 + $0xe8] ss:$28 sps:$4 sm:$0xff]  }
 0x32c   :  { %12549 = vst [vmem:[#allocation23_spill] sm:$0xff] %v11478_v0  ;;  %12550 = vst [vmem:[#allocation24_spill] sm:$0xff] %v11486_v24  ;;  %v9008_v49 = vadd.f32 %v3909_v7, %v11139_v26  ;;  %v3911_v21 = vpop.f32.mrb[38].mxu0  ;;  %v9072_v15 = vadd.f32 %v4681_v54, %v11144_v11  ;;  %v4683_v16 = vpop.f32.mrb[38].mxu1  ;;  %v8334_v32 = vcombine.low %v11482_v30, %v11484_v14  ;;  %v11536_v0 = vld [vmem:[#allocation2 + $0xad0] sm:$0xff] }
 0x32d   :  { %v9009_v34 = vadd.f32 %v3911_v21, %v11135_v10  ;;  %v3913_v22 = vpop.f32.mrb[39].mxu0  ;;  %5149 = vmatpush1.bf16.msra.mxu0 %v8318_v63  ;;  %v9073_v7 = vadd.f32 %v4683_v16, %v11137_v25  ;;  %v4685_v18 = vpop.f32.mrb[39].mxu1  ;;  %5921 = vmatpush1.bf16.msra.mxu1 %v8320_v59  ;;  %v8335_v54 = vcombine.high %v11482_v30, %v11484_v14  ;;  %v6436_v21 = vmax.f32 %v9007_v47, 0.0  ;;  %v11515_v16 = vld [vmem:[#allocation2 + $0xa90] sm:$0xff]  ;;  %v10273_v47 = vld [vmem:[%s12531_s0 + $0x124] ss:$28 sps:$4 sm:$0xff]  }
 0x32e   :  { %v9010_v23 = vadd.f32 %v3913_v22, %v11139_v26  ;;  %5150 = vmatprep.subr.bf16.mxu0 %v8327_v12  ;;  %v9074_v63 = vadd.f32 %v4685_v18, %v11144_v11  ;;  %5922 = vmatprep.subr.bf16.mxu1 %v8329_v62  ;;  %v8337_v8 = vcombine.high %v11495_v13, %v11497_v52  ;;  %v11517_v59 = vld [vmem:[#allocation2 + $0xab0] sm:$0xff]  ;;  %v6438_v12 = vmax.f32 %v9071_v35, 0.0  ;;  %v11524_v62 = vld [vmem:[#allocation2 + $0xab8] sm:$0xff] }
 0x32f   :  { %v6444_v3 = vmax.f32 %v9009_v34, 0.0  ;;  %5014 = vmatmul.mubr.bf16.gmra.mrb[80].mxu0 %v10272_v40  ;;  %v6437_v22 = vmax.f32 %v9008_v49, 0.0  ;;  %v6446_v30 = vmax.f32 %v9073_v7, 0.0  ;;  %5786 = vmatmul.mubr.bf16.gmra.mrb[80].mxu1 %v10272_v40  ;;  %v11522_v34 = vld [vmem:[#allocation2 + $0xa98] sm:$0xff]  ;;  %v6439_v18 = vmax.f32 %v9072_v15, 0.0 }
 0x330   :  { %v6445_v14 = vmax.f32 %v9010_v23, 0.0  ;;  %5023 = vmatprep.mubr.bf16.mxu0 %v10273_v47  ;;  %v6447_v24 = vmax.f32 %v9074_v63, 0.0  ;;  %5795 = vmatprep.mubr.bf16.mxu1 %v10273_v47  ;;  %v8336_v35 = vcombine.low %v11495_v13, %v11497_v52  ;;  %v8343_v40 = vcombine.high %v11515_v16, %v11517_v59 }
 0x331   :  { %v11526_v5 = vpack.c.bf16 %v6444_v3, %v6436_v21  ;;  %5151 = vmatpush1.bf16.msra.mxu0 %v8326_v61  ;;  %v11530_v49 = vpack.c.bf16 %v6446_v30, %v6438_v12  ;;  %5923 = vmatpush1.bf16.msra.mxu1 %v8328_v1  ;;  %v11538_v3 = vld [vmem:[#allocation2 + $0xaf0] sm:$0xff]  ;;  %v8345_v52 = vcombine.high %v11522_v34, %v11524_v62  ;;  %v11549_v30 = vld [vmem:[#allocation2 + $0xad8] sm:$0xff] }
 0x332   :  { %v11532_v7 = vpack.c.bf16 %v6445_v14, %v6437_v22  ;;  %v3917_v23 = vpop.f32.mrb[40].mxu0  ;;  %5152 = vmatprep.subr.bf16.mxu0 %v8335_v54  ;;  %v11540_v15 = vpack.c.bf16 %v6447_v24, %v6439_v18  ;;  %v4689_v21 = vpop.f32.mrb[40].mxu1  ;;  %5924 = vmatprep.subr.bf16.mxu1 %v8337_v8  ;;  %v8342_v22 = vcombine.low %v11515_v16, %v11517_v59  ;;  %v11551_v24 = vld [vmem:[#allocation2 + $0xaf8] sm:$0xff] }
 0x333   :  { %12551 = vst [vmem:[#allocation25_spill] sm:$0xff] %v11526_v5  ;;  %12552 = vst [vmem:[#allocation26_spill] sm:$0xff] %v11530_v49  ;;  %v9011_v61 = vadd.f32 %v3917_v23, %v11135_v10  ;;  %v3919_v13 = vpop.f32.mrb[41].mxu0  ;;  %v9075_v1 = vadd.f32 %v4689_v21, %v11137_v25  ;;  %v4691_v63 = vpop.f32.mrb[41].mxu1  ;;  %v8344_v23 = vcombine.low %v11522_v34, %v11524_v62  ;;  %v10274_v34 = vld [vmem:[%s12531_s0 + $0x120] ss:$28 sps:$4 sm:$0xff]  }
 0x334   :  { %12553 = vst [vmem:[#allocation27_spill] sm:$0xff] %v11532_v7  ;;  %12554 = vst [vmem:[#allocation28_spill] sm:$0xff] %v11540_v15  ;;  %v9012_v54 = vadd.f32 %v3919_v13, %v11139_v26  ;;  %v3921_v12 = vpop.f32.mrb[42].mxu0  ;;  %v9076_v14 = vadd.f32 %v4691_v63, %v11144_v11  ;;  %v4693_v47 = vpop.f32.mrb[42].mxu1  ;;  %v8350_v21 = vcombine.low %v11536_v0, %v11538_v3  ;;  %v11590_v7 = vld [vmem:[#allocation2 + $0xb50] sm:$0xff] }
 0x335   :  { %v9013_v8 = vadd.f32 %v3921_v12, %v11135_v10  ;;  %v3923_v18 = vpop.f32.mrb[43].mxu0  ;;  %5153 = vmatpush1.bf16.msra.mxu0 %v8334_v32  ;;  %v9077_v13 = vadd.f32 %v4693_v47, %v11137_v25  ;;  %v4695_v59 = vpop.f32.mrb[43].mxu1  ;;  %5925 = vmatpush1.bf16.msra.mxu1 %v8336_v35  ;;  %v8351_v63 = vcombine.high %v11536_v0, %v11538_v3  ;;  %v6452_v12 = vmax.f32 %v9011_v61, 0.0  ;;  %v11569_v47 = vld [vmem:[#allocation2 + $0xb10] sm:$0xff]  ;;  %v10275_v61 = vld [vmem:[%s12531_s0 + $0x15c] ss:$28 sps:$4 sm:$0xff]  }
 0x336   :  { %v9014_v16 = vadd.f32 %v3923_v18, %v11139_v26  ;;  %5154 = vmatprep.subr.bf16.mxu0 %v8343_v40  ;;  %v9078_v32 = vadd.f32 %v4695_v59, %v11144_v11  ;;  %5926 = vmatprep.subr.bf16.mxu1 %v8345_v52  ;;  %v8353_v62 = vcombine.high %v11549_v30, %v11551_v24  ;;  %v11571_v35 = vld [vmem:[#allocation2 + $0xb30] sm:$0xff]  ;;  %v6454_v40 = vmax.f32 %v9075_v1, 0.0  ;;  %v11578_v52 = vld [vmem:[#allocation2 + $0xb38] sm:$0xff] }
 0x337   :  { %v6460_v49 = vmax.f32 %v9013_v8, 0.0  ;;  %5024 = vmatmul.mubr.bf16.gmra.mrb[84].mxu0 %v10274_v34  ;;  %v6453_v18 = vmax.f32 %v9012_v54, 0.0  ;;  %v6462_v0 = vmax.f32 %v9077_v13, 0.0  ;;  %5796 = vmatmul.mubr.bf16.gmra.mrb[84].mxu1 %v10274_v34  ;;  %v11576_v8 = vld [vmem:[#allocation2 + $0xb18] sm:$0xff]  ;;  %v6455_v59 = vmax.f32 %v9076_v14, 0.0 }
 0x338   :  { %v6461_v3 = vmax.f32 %v9014_v16, 0.0  ;;  %5033 = vmatprep.mubr.bf16.mxu0 %v10275_v61  ;;  %v6463_v15 = vmax.f32 %v9078_v32, 0.0  ;;  %5805 = vmatprep.mubr.bf16.mxu1 %v10275_v61  ;;  %v8352_v1 = vcombine.low %v11549_v30, %v11551_v24  ;;  %v8359_v34 = vcombine.high %v11569_v47, %v11571_v35 }
 0x339   :  { %v11580_v5 = vpack.c.bf16 %v6460_v49, %v6452_v12  ;;  %5155 = vmatpush1.bf16.msra.mxu0 %v8342_v22  ;;  %v11584_v54 = vpack.c.bf16 %v6462_v0, %v6454_v40  ;;  %5927 = vmatpush1.bf16.msra.mxu1 %v8344_v23  ;;  %v11592_v49 = vld [vmem:[#allocation2 + $0xb70] sm:$0xff]  ;;  %v8361_v24 = vcombine.high %v11576_v8, %v11578_v52  ;;  %v11603_v0 = vld [vmem:[#allocation2 + $0xb58] sm:$0xff] }
 0x33a   :  { %v11586_v13 = vpack.c.bf16 %v6461_v3, %v6453_v18  ;;  %v3927_v16 = vpop.f32.mrb[44].mxu0  ;;  %5156 = vmatprep.subr.bf16.mxu0 %v8351_v63  ;;  %v11594_v14 = vpack.c.bf16 %v6463_v15, %v6455_v59  ;;  %v4699_v12 = vpop.f32.mrb[44].mxu1  ;;  %5928 = vmatprep.subr.bf16.mxu1 %v8353_v62  ;;  %v8358_v18 = vcombine.low %v11569_v47, %v11571_v35  ;;  %v11605_v15 = vld [vmem:[#allocation2 + $0xb78] sm:$0xff] }
 0x33b   :  { %12555 = vst [vmem:[#allocation29_spill] sm:$0xff] %v11580_v5  ;;  %12556 = vst [vmem:[#allocation30_spill] sm:$0xff] %v11584_v54  ;;  %v9015_v22 = vadd.f32 %v3927_v16, %v11135_v10  ;;  %v3929_v30 = vpop.f32.mrb[45].mxu0  ;;  %v9079_v23 = vadd.f32 %v4699_v12, %v11137_v25  ;;  %v4701_v32 = vpop.f32.mrb[45].mxu1  ;;  %v8360_v16 = vcombine.low %v11576_v8, %v11578_v52  ;;  %v10276_v8 = vld [vmem:[%s12531_s0 + $0x158] ss:$28 sps:$4 sm:$0xff]  }
 0x33c   :  { %12557 = vst [vmem:[#allocation31_spill] sm:$0xff] %v11586_v13  ;;  %12558 = vst [vmem:[#allocation32_spill] sm:$0xff] %v11594_v14  ;;  %v9016_v63 = vadd.f32 %v3929_v30, %v11139_v26  ;;  %v3931_v40 = vpop.f32.mrb[46].mxu0  ;;  %v9080_v3 = vadd.f32 %v4701_v32, %v11144_v11  ;;  %v4703_v61 = vpop.f32.mrb[46].mxu1  ;;  %v8366_v12 = vcombine.low %v11590_v7, %v11592_v49  ;;  %v11644_v13 = vld [vmem:[#allocation2 + $0xbd0] sm:$0xff] }
 0x33d   :  { %v9017_v62 = vadd.f32 %v3931_v40, %v11135_v10  ;;  %v3933_v59 = vpop.f32.mrb[47].mxu0  ;;  %5157 = vmatpush1.bf16.msra.mxu0 %v8350_v21  ;;  %v9081_v30 = vadd.f32 %v4703_v61, %v11137_v25  ;;  %v4705_v35 = vpop.f32.mrb[47].mxu1  ;;  %5929 = vmatpush1.bf16.msra.mxu1 %v8352_v1  ;;  %v8367_v32 = vcombine.high %v11590_v7, %v11592_v49  ;;  %v6468_v40 = vmax.f32 %v9015_v22, 0.0  ;;  %v11623_v61 = vld [vmem:[#allocation2 + $0xb90] sm:$0xff] }
 0x33e   :  { %v9018_v47 = vadd.f32 %v3933_v59, %v11139_v26  ;;  %5158 = vmatprep.subr.bf16.mxu0 %v8359_v34  ;;  %v9082_v21 = vadd.f32 %v4705_v35, %v11144_v11  ;;  %5930 = vmatprep.subr.bf16.mxu1 %v8361_v24  ;;  %v8369_v52 = vcombine.high %v11603_v0, %v11605_v15  ;;  %v11625_v1 = vld [vmem:[#allocation2 + $0xbb0] sm:$0xff]  ;;  %v6470_v34 = vmax.f32 %v9079_v23, 0.0  ;;  %v11632_v24 = vld [vmem:[#allocation2 + $0xbb8] sm:$0xff] }
 0x33f   :  { %v6476_v54 = vmax.f32 %v9017_v62, 0.0  ;;  %5034 = vmatmul.mubr.bf16.gmra.mrb[88].mxu0 %v10276_v8  ;;  %v6469_v59 = vmax.f32 %v9016_v63, 0.0  ;;  %v6478_v7 = vmax.f32 %v9081_v30, 0.0  ;;  %5806 = vmatmul.mubr.bf16.gmra.mrb[88].mxu1 %v10276_v8  ;;  %v10277_v22 = vld [vmem:[%s12531_s0 + $0x194] ss:$28 sps:$4 sm:$0xff]   ;;  %v11630_v62 = vld [vmem:[#allocation2 + $0xb98] sm:$0xff]  ;;  %v8368_v23 = vcombine.low %v11603_v0, %v11605_v15 }
 0x340   :  { %v6477_v49 = vmax.f32 %v9018_v47, 0.0  ;;  %5043 = vmatprep.mubr.bf16.mxu0 %v10277_v22  ;;  %v6471_v35 = vmax.f32 %v9080_v3, 0.0  ;;  %v6479_v14 = vmax.f32 %v9082_v21, 0.0  ;;  %5815 = vmatprep.mubr.bf16.mxu1 %v10277_v22  ;;  %v8375_v8 = vcombine.high %v11623_v61, %v11625_v1 }
 0x341   :  { %v11634_v5 = vpack.c.bf16 %v6476_v54, %v6468_v40  ;;  %5159 = vmatpush1.bf16.msra.mxu0 %v8358_v18  ;;  %v11638_v63 = vpack.c.bf16 %v6478_v7, %v6470_v34  ;;  %5931 = vmatpush1.bf16.msra.mxu1 %v8360_v16  ;;  %v11646_v54 = vld [vmem:[#allocation2 + $0xbf0] sm:$0xff]  ;;  %v8377_v15 = vcombine.high %v11630_v62, %v11632_v24  ;;  %v580_v7 = vld [vmem:[#allocation2 + $0xbd8] sm:$0xff] }
 0x342   :  { %v11640_v30 = vpack.c.bf16 %v6477_v49, %v6469_v59  ;;  %v3937_v47 = vpop.f32.mrb[48].mxu0  ;;  %5160 = vmatprep.subr.bf16.mxu0 %v8367_v32  ;;  %v11648_v3 = vpack.c.bf16 %v6479_v14, %v6471_v35  ;;  %v4709_v40 = vpop.f32.mrb[48].mxu1  ;;  %5932 = vmatprep.subr.bf16.mxu1 %v8369_v52  ;;  %v8374_v59 = vcombine.low %v11623_v61, %v11625_v1  ;;  %v584_v14 = vld [vmem:[#allocation2 + $0xbf8] sm:$0xff] }
 0x343   :  { %12559 = vst [vmem:[#allocation33_spill] sm:$0xff] %v11634_v5  ;;  %12560 = vst [vmem:[#allocation34_spill] sm:$0xff] %v11638_v63  ;;  %v9019_v18 = vadd.f32 %v3937_v47, %v11135_v10  ;;  %v3939_v0 = vpop.f32.mrb[49].mxu0  ;;  %v9083_v16 = vadd.f32 %v4709_v40, %v11137_v25  ;;  %v4711_v21 = vpop.f32.mrb[49].mxu1  ;;  %v8376_v47 = vcombine.low %v11630_v62, %v11632_v24  ;;  %v10278_v62 = vld [vmem:[%s12531_s0 + $0x190] ss:$28 sps:$4 sm:$0xff]  }
 0x344   :  { %12561 = vst [vmem:[#allocation35_spill] sm:$0xff] %v11648_v3  ;;  %v9020_v32 = vadd.f32 %v3939_v0, %v11139_v26  ;;  %v3941_v34 = vpop.f32.mrb[50].mxu0  ;;  %v9084_v49 = vadd.f32 %v4711_v21, %v11144_v11  ;;  %v4713_v35 = vpop.f32.mrb[50].mxu1  ;;  %v8382_v40 = vcombine.low %v11644_v13, %v11646_v54  ;;  %v8383_v1 = vcombine.high %v11644_v13, %v11646_v54  ;;  %v10279_v13 = vld [vmem:[%s12531_s0 + $0x1cc] ss:$28 sps:$4 sm:$0xff]  }
 0x345   :  { %v9021_v22 = vadd.f32 %v3941_v34, %v11135_v10  ;;  %v3943_v52 = vpop.f32.mrb[51].mxu0  ;;  %5161 = vmatpush1.bf16.msra.mxu0 %v8366_v12  ;;  %v9085_v0 = vadd.f32 %v4713_v35, %v11137_v25  ;;  %v4715_v61 = vpop.f32.mrb[51].mxu1  ;;  %5933 = vmatpush1.bf16.msra.mxu1 %v8368_v23  ;;  %v6484_v21 = vmax.f32 %v9019_v18, 0.0  ;;  %v8385_v24 = vcombine.high %v580_v7, %v584_v14 }
 0x346   :  { %v9022_v63 = vadd.f32 %v3943_v52, %v11139_v26  ;;  %5162 = vmatprep.subr.bf16.mxu0 %v8375_v8  ;;  %v9086_v12 = vadd.f32 %v4715_v61, %v11144_v11  ;;  %5934 = vmatprep.subr.bf16.mxu1 %v8377_v15  ;;  %v6486_v35 = vmax.f32 %v9083_v16, 0.0  ;;  %v6485_v5 = vmax.f32 %v9020_v32, 0.0 }
 0x347   :  { %v6492_v34 = vmax.f32 %v9021_v22, 0.0  ;;  %5044 = vmatmul.mubr.bf16.gmra.mrb[92].mxu0 %v10278_v62  ;;  %v6494_v52 = vmax.f32 %v9085_v0, 0.0  ;;  %5816 = vmatmul.mubr.bf16.gmra.mrb[92].mxu1 %v10278_v62  ;;  %v6487_v23 = vmax.f32 %v9084_v49, 0.0  ;;  %v8384_v18 = vcombine.low %v580_v7, %v584_v14 }
 0x348   :  { %v6493_v3 = vmax.f32 %v9022_v63, 0.0  ;;  %5053 = vmatprep.mubr.bf16.mxu0 %v10279_v13  ;;  %v6495_v54 = vmax.f32 %v9086_v12, 0.0  ;;  %5825 = vmatprep.mubr.bf16.mxu1 %v10279_v13  ;;  %v8391_v63 = vcombine.high %v11293_v36, %v11295_v39 }
 0x349   :  { %v11674_v8 = vpack.c.bf16 %v6492_v34, %v6484_v21  ;;  %5163 = vmatpush1.bf16.msra.mxu0 %v8374_v59  ;;  %v11676_v22 = vpack.c.bf16 %v6494_v52, %v6486_v35  ;;  %5935 = vmatpush1.bf16.msra.mxu1 %v8376_v47  ;;  %v8393_v59 = vcombine.high %v11302_v44, %v11304_v50 }
 0x34a   :  { %v11678_v15 = vpack.c.bf16 %v6493_v3, %v6485_v5  ;;  %v3947_v16 = vpop.f32.mrb[52].mxu0  ;;  %5164 = vmatprep.subr.bf16.mxu0 %v8383_v1  ;;  %v11682_v32 = vpack.c.bf16 %v6495_v54, %v6487_v23  ;;  %v4719_v0 = vpop.f32.mrb[52].mxu1  ;;  %5936 = vmatprep.subr.bf16.mxu1 %v8385_v24  ;;  %v10280_v23 = vld [vmem:[%s12531_s0 + $0x1c8] ss:$28 sps:$4 sm:$0xff]  }
 0x34b   :  { %v9023_v49 = vadd.f32 %v3947_v16, %v11135_v10  ;;  %v3949_v61 = vpop.f32.mrb[53].mxu0  ;;  %v9087_v7 = vadd.f32 %v4719_v0, %v11137_v25  ;;  %v4721_v3 = vpop.f32.mrb[53].mxu1 }
 0x34c   :  { %v9024_v5 = vadd.f32 %v3949_v61, %v11139_v26  ;;  %v3951_v14 = vpop.f32.mrb[54].mxu0  ;;  %v9088_v47 = vadd.f32 %v4721_v3, %v11144_v11  ;;  %v4723_v21 = vpop.f32.mrb[54].mxu1 }
 0x34d   :  { %v9025_v1 = vadd.f32 %v3951_v14, %v11135_v10  ;;  %v3953_v34 = vpop.f32.mrb[55].mxu0  ;;  %5165 = vmatpush1.bf16.msra.mxu0 %v8382_v40  ;;  %v9089_v12 = vadd.f32 %v4723_v21, %v11137_v25  ;;  %v4725_v24 = vpop.f32.mrb[55].mxu1  ;;  %5937 = vmatpush1.bf16.msra.mxu1 %v8384_v18  ;;  %v6500_v35 = vmax.f32 %v9023_v49, 0.0  ;;  %v6502_v54 = vmax.f32 %v9087_v7, 0.0  ;;  %v10281_v18 = vld [vmem:[%s12531_s0 + $0x204] ss:$28 sps:$4 sm:$0xff]  }
 0x34e   :  { %v9026_v62 = vadd.f32 %v3953_v34, %v11139_v26  ;;  %5327 = vmatprep.subr.bf16.mxu0 %v8391_v63  ;;  %v9090_v13 = vadd.f32 %v4725_v24, %v11144_v11  ;;  %6099 = vmatprep.subr.bf16.mxu1 %v8393_v59  ;;  %v6501_v16 = vmax.f32 %v9024_v5, 0.0  ;;  %v6503_v63 = vmax.f32 %v9088_v47, 0.0 }
 0x34f   :  { %v6508_v52 = vmax.f32 %v9025_v1, 0.0  ;;  %5054 = vmatmul.mubr.bf16.gmra.mrb[96].mxu0 %v10280_v23  ;;  %v6510_v40 = vmax.f32 %v9089_v12, 0.0  ;;  %5826 = vmatmul.mubr.bf16.gmra.mrb[96].mxu1 %v10280_v23 }
 0x350   :  { %v6509_v0 = vmax.f32 %v9026_v62, 0.0  ;;  %5063 = vmatprep.mubr.bf16.mxu0 %v10281_v18  ;;  %v6511_v61 = vmax.f32 %v9090_v13, 0.0  ;;  %5835 = vmatprep.mubr.bf16.mxu1 %v10281_v18 }
 0x351   :  { %v11700_v49 = vpack.c.bf16 %v6508_v52, %v6500_v35  ;;  %v11702_v3 = vpack.c.bf16 %v6510_v40, %v6502_v54 }
 0x352   :  { %v11704_v14 = vpack.c.bf16 %v6509_v0, %v6501_v16  ;;  %v3957_v59 = vpop.f32.mrb[56].mxu0  ;;  %v11706_v7 = vpack.c.bf16 %v6511_v61, %v6503_v63  ;;  %v4729_v1 = vpop.f32.mrb[56].mxu1  ;;  %v10282_v63 = vld [vmem:[%s12531_s0 + $0x200] ss:$28 sps:$4 sm:$0xff]  }
 0x353   :  { %12562 = vst [vmem:[#allocation36_spill] sm:$0xff] %v11702_v3  ;;  %v9027_v5 = vadd.f32 %v3957_v59, %v11135_v10  ;;  %v3959_v21 = vpop.f32.mrb[57].mxu0  ;;  %v9091_v34 = vadd.f32 %v4729_v1, %v11137_v25  ;;  %v4731_v47 = vpop.f32.mrb[57].mxu1 }
 0x354   :  { %v9028_v12 = vadd.f32 %v3959_v21, %v11139_v26  ;;  %v3961_v62 = vpop.f32.mrb[58].mxu0  ;;  %v9092_v24 = vadd.f32 %v4731_v47, %v11144_v11  ;;  %v4733_v52 = vpop.f32.mrb[58].mxu1  ;;  %v10283_v47 = vld [vmem:[%s12531_s0 + $0x23c] ss:$28 sps:$4 sm:$0xff]  }
 0x355   :  { %v9029_v35 = vadd.f32 %v3961_v62, %v11135_v10  ;;  %v3963_v13 = vpop.f32.mrb[59].mxu0  ;;  %v9093_v23 = vadd.f32 %v4733_v52, %v11137_v25  ;;  %v4735_v16 = vpop.f32.mrb[59].mxu1  ;;  %v6516_v40 = vmax.f32 %v9027_v5, 0.0  ;;  %v6518_v61 = vmax.f32 %v9091_v34, 0.0 }
 0x356   :  { %v9030_v54 = vadd.f32 %v3963_v13, %v11139_v26  ;;  %v9094_v18 = vadd.f32 %v4735_v16, %v11144_v11  ;;  %v6517_v59 = vmax.f32 %v9028_v12, 0.0  ;;  %v6519_v62 = vmax.f32 %v9092_v24, 0.0 }
 0x357   :  { %v6524_v0 = vmax.f32 %v9029_v35, 0.0  ;;  %5064 = vmatmul.mubr.bf16.gmra.mrb[100].mxu0 %v10282_v63  ;;  %v6526_v1 = vmax.f32 %v9093_v23, 0.0  ;;  %5836 = vmatmul.mubr.bf16.gmra.mrb[100].mxu1 %v10282_v63 }
 0x358   :  { %v6525_v21 = vmax.f32 %v9030_v54, 0.0  ;;  %5073 = vmatprep.mubr.bf16.mxu0 %v10283_v47  ;;  %v6527_v35 = vmax.f32 %v9094_v18, 0.0  ;;  %5845 = vmatprep.mubr.bf16.mxu1 %v10283_v47 }
 0x359   :  { %v11722_v5 = vpack.c.bf16 %v6524_v0, %v6516_v40  ;;  %v11724_v52 = vpack.c.bf16 %v6526_v1, %v6518_v61 }
 0x35a   :  { %v11726_v13 = vpack.c.bf16 %v6525_v21, %v6517_v59  ;;  %v3967_v16 = vpop.f32.mrb[60].mxu0  ;;  %v11728_v34 = vpack.c.bf16 %v6527_v35, %v6519_v62  ;;  %v4739_v23 = vpop.f32.mrb[60].mxu1 }
 0x35b   :  { %12563 = vst [vmem:[#allocation37_spill] sm:$0xff] %v11724_v52  ;;  %v9031_v12 = vadd.f32 %v3967_v16, %v11135_v10  ;;  %v3969_v54 = vpop.f32.mrb[61].mxu0  ;;  %v9095_v63 = vadd.f32 %v4739_v23, %v11137_v25  ;;  %v4741_v24 = vpop.f32.mrb[61].mxu1  ;;  %v10284_v23 = vld [vmem:[%s12531_s0 + $0x238] ss:$28 sps:$4 sm:$0xff]  }
 0x35c   :  { %v9032_v3 = vadd.f32 %v3969_v54, %v11139_v26  ;;  %v3971_v40 = vpop.f32.mrb[62].mxu0  ;;  %v9096_v0 = vadd.f32 %v4741_v24, %v11144_v11  ;;  %v4743_v61 = vpop.f32.mrb[62].mxu1 }
 0x35d   :  { %v9033_v18 = vadd.f32 %v3971_v40, %v11135_v10  ;;  %v3973_v59 = vpop.f32.mrb[63].mxu0  ;;  %v9097_v1 = vadd.f32 %v4743_v61, %v11137_v25  ;;  %v4745_v47 = vpop.f32.mrb[63].mxu1  ;;  %v6532_v62 = vmax.f32 %v9031_v12, 0.0  ;;  %v6534_v54 = vmax.f32 %v9095_v63, 0.0  ;;  %v10285_v25 = vld [vmem:[%s12531_s0 + $0x274] ss:$28 sps:$4 sm:$0xff]  }
 0x35e   :  { %v9034_v21 = vadd.f32 %v3973_v59, %v11139_v26  ;;  %v9098_v16 = vadd.f32 %v4745_v47, %v11144_v11  ;;  %v6533_v24 = vmax.f32 %v9032_v3, 0.0  ;;  %v6535_v26 = vmax.f32 %v9096_v0, 0.0  ;;  %v10286_v3 = vld [vmem:[%s12531_s0 + $0x270] ss:$28 sps:$4 sm:$0xff]   ;;  %v10289_v0 = vld [vmem:[%s12531_s0 + $0x2e4] ss:$28 sps:$4 sm:$0xff]  }
 0x35f   :  { %v6540_v35 = vmax.f32 %v9033_v18, 0.0  ;;  %5074 = vmatmul.mubr.bf16.gmra.mrb[104].mxu0 %v10284_v23  ;;  %v6542_v52 = vmax.f32 %v9097_v1, 0.0  ;;  %5846 = vmatmul.mubr.bf16.gmra.mrb[104].mxu1 %v10284_v23  ;;  %v10287_v63 = vld [vmem:[%s12531_s0 + $0x2ac] ss:$28 sps:$4 sm:$0xff]   ;;  %v10290_v59 = vld [vmem:[%s12531_s0 + $0x2e0] ss:$28 sps:$4 sm:$0xff]   ;;  %v12564_v23 = vcombine.low %v11293_v36, %v11295_v39 }
 0x360   :  { %v6541_v10 = vmax.f32 %v9034_v21, 0.0  ;;  %5083 = vmatprep.mubr.bf16.mxu0 %v10285_v25  ;;  %v6543_v40 = vmax.f32 %v9098_v16, 0.0  ;;  %5855 = vmatprep.mubr.bf16.mxu1 %v10285_v25  ;;  %v10291_v1 = vld [vmem:[%s12531_s0 + $0x31c] ss:$28 sps:$4 sm:$0xff]   ;;  %v10293_v47 = vld [vmem:[%s12531_s0 + $0x354] ss:$28 sps:$4 sm:$0xff]  }
 0x361   :  { %v11744_v12 = vpack.c.bf16 %v6540_v35, %v6532_v62  ;;  %v11746_v11 = vpack.c.bf16 %v6542_v52, %v6534_v54  ;;  %v10288_v52 = vld [vmem:[%s12531_s0 + $0x2a8] ss:$28 sps:$4 sm:$0xff]   ;;  %v10292_v21 = vld [vmem:[%s12531_s0 + $0x318] ss:$28 sps:$4 sm:$0xff]   ;;  %v10294_v62 = vld [vmem:[%s12531_s0 + $0x350] ss:$28 sps:$4 sm:$0xff]  }
 0x362   :  { %v11748_v18 = vpack.c.bf16 %v6541_v10, %v6533_v24  ;;  %v11750_v61 = vpack.c.bf16 %v6543_v40, %v6535_v26  ;;  %v10295_v35 = vld [vmem:[%s12531_s0 + $0x14] ss:$28 sps:$4 sm:$0xff]   ;;  %v10167_v54 = vld [vmem:[#allocation7 + $0x40] sm:$0xff]   ;;  %v12565_v10 = vcombine.low %v11302_v44, %v11304_v50  ;;  %v10299_v36 = vld [vmem:[%s12531_s0 + $0x84] ss:$28 sps:$4 sm:$0xff]  }
 0x363   :  { %v10296_v16 = vld [vmem:[%s12531_s0 + $0x10] ss:$28 sps:$4 sm:$0xff]   ;;  %v10298_v26 = vld [vmem:[%s12531_s0 + $0x48] ss:$28 sps:$4 sm:$0xff]   ;;  %v10300_v39 = vld [vmem:[%s12531_s0 + $0x80] ss:$28 sps:$4 sm:$0xff]  }
 0x364   :  { %v10169_v24 = vld [vmem:[#allocation7 + $0xc0] sm:$0xff]   ;;  %v10301_v44 = vld [vmem:[%s12531_s0 + $0xbc] ss:$28 sps:$4 sm:$0xff]   ;;  %v10303_v40 = vld [vmem:[%s12531_s0 + $0xf4] ss:$28 sps:$4 sm:$0xff]  }
 0x365   :  { %v10297_v25 = vld [vmem:[%s12531_s0 + $0x4c] ss:$28 sps:$4 sm:$0xff]   ;;  %v10302_v50 = vld [vmem:[%s12531_s0 + $0xb8] ss:$28 sps:$4 sm:$0xff]  }
 0x367   :  { %5084 = vmatmul.mubr.bf16.gmra.mrb[108].mxu0 %v10286_v3  ;;  %5856 = vmatmul.mubr.bf16.gmra.mrb[108].mxu1 %v10286_v3  ;;  %v10304_v3 = vld [vmem:[%s12531_s0 + $0xf0] ss:$28 sps:$4 sm:$0xff]  }
 0x368   :  { %5093 = vmatprep.mubr.bf16.mxu0 %v10287_v63  ;;  %5865 = vmatprep.mubr.bf16.mxu1 %v10287_v63  ;;  %v10305_v63 = vld [vmem:[%s12531_s0 + $0x12c] ss:$28 sps:$4 sm:$0xff]  }
 0x36f   :  { %5094 = vmatmul.mubr.bf16.gmra.mrb[112].mxu0 %v10288_v52  ;;  %5866 = vmatmul.mubr.bf16.gmra.mrb[112].mxu1 %v10288_v52  ;;  %v10306_v52 = vld [vmem:[%s12531_s0 + $0x128] ss:$28 sps:$4 sm:$0xff]  }
 0x370   :  { %5103 = vmatprep.mubr.bf16.mxu0 %v10289_v0  ;;  %5875 = vmatprep.mubr.bf16.mxu1 %v10289_v0  ;;  %v10307_v0 = vld [vmem:[%s12531_s0 + $0x164] ss:$28 sps:$4 sm:$0xff]  }
 0x377   :  { %5104 = vmatmul.mubr.bf16.gmra.mrb[116].mxu0 %v10290_v59  ;;  %5876 = vmatmul.mubr.bf16.gmra.mrb[116].mxu1 %v10290_v59  ;;  %v10308_v59 = vld [vmem:[%s12531_s0 + $0x160] ss:$28 sps:$4 sm:$0xff]  }
 0x378   :  { %5113 = vmatprep.mubr.bf16.mxu0 %v10291_v1  ;;  %5885 = vmatprep.mubr.bf16.mxu1 %v10291_v1  ;;  %v10309_v1 = vld [vmem:[%s12531_s0 + $0x19c] ss:$28 sps:$4 sm:$0xff]  }
 0x37f   :  { %5114 = vmatmul.mubr.bf16.gmra.mrb[120].mxu0 %v10292_v21  ;;  %5886 = vmatmul.mubr.bf16.gmra.mrb[120].mxu1 %v10292_v21  ;;  %v10310_v21 = vld [vmem:[%s12531_s0 + $0x198] ss:$28 sps:$4 sm:$0xff]  }
 0x380   :  { %5123 = vmatprep.mubr.bf16.mxu0 %v10293_v47  ;;  %5895 = vmatprep.mubr.bf16.mxu1 %v10293_v47  ;;  %v10311_v47 = vld [vmem:[%s12531_s0 + $0x1d4] ss:$28 sps:$4 sm:$0xff]  }
 0x387   :  { %5124 = vmatmul.mubr.bf16.gmra.mrb[124].mxu0 %v10294_v62  ;;  %5896 = vmatmul.mubr.bf16.gmra.mrb[124].mxu1 %v10294_v62  ;;  %v10312_v62 = vld [vmem:[%s12531_s0 + $0x1d0] ss:$28 sps:$4 sm:$0xff]  }
 0x388   :  { %5166 = vmatprep.mubr.bf16.mxu0 %v10295_v35  ;;  %5938 = vmatprep.mubr.bf16.mxu1 %v10295_v35  ;;  %v10313_v35 = vld [vmem:[%s12531_s0 + $0x20c] ss:$28 sps:$4 sm:$0xff]  }
 0x38f   :  { %5167 = vmatmul.mubr.bf16.vlgmr.msra.gmra.mrb[64].mxu0 %v10296_v16  ;;  %5939 = vmatmul.mubr.bf16.vlgmr.msra.gmra.mrb[64].mxu1 %v10296_v16  ;;  %v10314_v16 = vld [vmem:[%s12531_s0 + $0x208] ss:$28 sps:$4 sm:$0xff]  }
 0x390   :  { %5328 = vmatpush1.bf16.msra.mxu0 %v12564_v23  ;;  %6100 = vmatpush1.bf16.msra.mxu1 %v12565_v10  ;;  %v10315_v23 = vld [vmem:[%s12531_s0 + $0x244] ss:$28 sps:$4 sm:$0xff]   ;;  %v10318_v10 = vld [vmem:[%s12531_s0 + $0x278] ss:$28 sps:$4 sm:$0xff]  }
 0x391   :  { %5176 = vmatprep.mubr.bf16.mxu0 %v10297_v25  ;;  %5948 = vmatprep.mubr.bf16.mxu1 %v10297_v25  ;;  %v10319_v25 = vld [vmem:[%s12531_s0 + $0x2b4] ss:$28 sps:$4 sm:$0xff]  }
 0x392   :  { %8523 = vmatprep.subr.bf16.mxu0 %v10167_v54  ;;  %8635 = vmatprep.subr.bf16.mxu1 %v10169_v24  ;;  %v10316_v54 = vld [vmem:[%s12531_s0 + $0x240] ss:$28 sps:$4 sm:$0xff]  }
 0x393   :  { %v10317_v24 = vld [vmem:[%s12531_s0 + $0x27c] ss:$28 sps:$4 sm:$0xff]  }
 0x397   :  { %5177 = vmatmul.mubr.bf16.gmra.mrb[68].mxu0 %v10298_v26  ;;  %5949 = vmatmul.mubr.bf16.gmra.mrb[68].mxu1 %v10298_v26  ;;  %v10320_v26 = vld [vmem:[%s12531_s0 + $0x2b0] ss:$28 sps:$4 sm:$0xff]  }
 0x398   :  { %5186 = vmatprep.mubr.bf16.mxu0 %v10299_v36  ;;  %5958 = vmatprep.mubr.bf16.mxu1 %v10299_v36  ;;  %v10321_v36 = vld [vmem:[%s12531_s0 + $0x2ec] ss:$28 sps:$4 sm:$0xff]  }
 0x39f   :  { %5187 = vmatmul.mubr.bf16.gmra.mrb[72].mxu0 %v10300_v39  ;;  %5959 = vmatmul.mubr.bf16.gmra.mrb[72].mxu1 %v10300_v39  ;;  %v10322_v39 = vld [vmem:[%s12531_s0 + $0x2e8] ss:$28 sps:$4 sm:$0xff]  }
 0x3a0   :  { %5196 = vmatprep.mubr.bf16.mxu0 %v10301_v44  ;;  %5968 = vmatprep.mubr.bf16.mxu1 %v10301_v44  ;;  %v10323_v44 = vld [vmem:[%s12531_s0 + $0x324] ss:$28 sps:$4 sm:$0xff]  }
 0x3a7   :  { %5197 = vmatmul.mubr.bf16.gmra.mrb[76].mxu0 %v10302_v50  ;;  %5969 = vmatmul.mubr.bf16.gmra.mrb[76].mxu1 %v10302_v50  ;;  %v10324_v50 = vld [vmem:[%s12531_s0 + $0x320] ss:$28 sps:$4 sm:$0xff]  }
 0x3a8   :  { %5206 = vmatprep.mubr.bf16.mxu0 %v10303_v40  ;;  %5978 = vmatprep.mubr.bf16.mxu1 %v10303_v40  ;;  %v10325_v40 = vld [vmem:[%s12531_s0 + $0x35c] ss:$28 sps:$4 sm:$0xff]  }
 0x3af   :  { %5207 = vmatmul.mubr.bf16.gmra.mrb[80].mxu0 %v10304_v3  ;;  %5979 = vmatmul.mubr.bf16.gmra.mrb[80].mxu1 %v10304_v3  ;;  %v10326_v3 = vld [vmem:[%s12531_s0 + $0x358] ss:$28 sps:$4 sm:$0xff]  }
 0x3b0   :  { %5216 = vmatprep.mubr.bf16.mxu0 %v10305_v63  ;;  %5988 = vmatprep.mubr.bf16.mxu1 %v10305_v63  ;;  %v12566_v63 = vmov 0  }
 0x3b7   :  { %5217 = vmatmul.mubr.bf16.gmra.mrb[84].mxu0 %v10306_v52  ;;  %5989 = vmatmul.mubr.bf16.gmra.mrb[84].mxu1 %v10306_v52  ;;  %v10168_v52 = vld [vmem:[#allocation7] sm:$0xff]  }
 0x3b8   :  { %5226 = vmatprep.mubr.bf16.mxu0 %v10307_v0  ;;  %5998 = vmatprep.mubr.bf16.mxu1 %v10307_v0  ;;  %v10170_v0 = vld [vmem:[#allocation7 + $0x80] sm:$0xff]  }
 0x3bf   :  { %5227 = vmatmul.mubr.bf16.gmra.mrb[88].mxu0 %v10308_v59  ;;  %5999 = vmatmul.mubr.bf16.gmra.mrb[88].mxu1 %v10308_v59  ;;  %v10171_v59 = vld [vmem:[#allocation7 + $0x48] sm:$0xff]  }
 0x3c0   :  { %5236 = vmatprep.mubr.bf16.mxu0 %v10309_v1  ;;  %6008 = vmatprep.mubr.bf16.mxu1 %v10309_v1  ;;  %v10327_v1 = vld [vmem:[%s12531_s0 + $0x18] ss:$28 sps:$4 sm:$0xff]  }
 0x3c7   :  { %5237 = vmatmul.mubr.bf16.gmra.mrb[92].mxu0 %v10310_v21  ;;  %6009 = vmatmul.mubr.bf16.gmra.mrb[92].mxu1 %v10310_v21  ;;  %v10173_v21 = vld [vmem:[#allocation7 + $0xc8] sm:$0xff]  }
 0x3c8   :  { %5246 = vmatprep.mubr.bf16.mxu0 %v10311_v47  ;;  %6018 = vmatprep.mubr.bf16.mxu1 %v10311_v47  ;;  %v10172_v47 = vld [vmem:[#allocation7 + $0x8] sm:$0xff]  }
 0x3cf   :  { %5247 = vmatmul.mubr.bf16.gmra.mrb[96].mxu0 %v10312_v62  ;;  %6019 = vmatmul.mubr.bf16.gmra.mrb[96].mxu1 %v10312_v62  ;;  %v10174_v62 = vld [vmem:[#allocation7 + $0x88] sm:$0xff]  }
 0x3d0   :  { %5256 = vmatprep.mubr.bf16.mxu0 %v10313_v35  ;;  %6028 = vmatprep.mubr.bf16.mxu1 %v10313_v35  ;;  %v10175_v35 = vld [vmem:[#allocation7 + $0x50] sm:$0xff]  }
 0x3d7   :  { %5257 = vmatmul.mubr.bf16.gmra.mrb[100].mxu0 %v10314_v16  ;;  %6029 = vmatmul.mubr.bf16.gmra.mrb[100].mxu1 %v10314_v16  ;;  %v10177_v16 = vld [vmem:[#allocation7 + $0xd0] sm:$0xff]  }
 0x3d8   :  { %5266 = vmatprep.mubr.bf16.mxu0 %v10315_v23  ;;  %6038 = vmatprep.mubr.bf16.mxu1 %v10315_v23  ;;  %v10176_v23 = vld [vmem:[#allocation7 + $0x10] sm:$0xff]  }
 0x3df   :  { %5267 = vmatmul.mubr.bf16.gmra.mrb[104].mxu0 %v10316_v54  ;;  %6039 = vmatmul.mubr.bf16.gmra.mrb[104].mxu1 %v10316_v54  ;;  %v10178_v54 = vld [vmem:[#allocation7 + $0x90] sm:$0xff]  }
 0x3e0   :  { %5276 = vmatprep.mubr.bf16.mxu0 %v10317_v24  ;;  %6048 = vmatprep.mubr.bf16.mxu1 %v10317_v24  ;;  %v10179_v24 = vld [vmem:[#allocation7 + $0x58] sm:$0xff]  }
 0x3e7   :  { %5277 = vmatmul.mubr.bf16.gmra.mrb[108].mxu0 %v10318_v10  ;;  %6049 = vmatmul.mubr.bf16.gmra.mrb[108].mxu1 %v10318_v10  ;;  %v10328_v10 = vld [vmem:[%s12531_s0 + $0x50] ss:$28 sps:$4 sm:$0xff]  }
 0x3e8   :  { %5286 = vmatprep.mubr.bf16.mxu0 %v10319_v25  ;;  %6058 = vmatprep.mubr.bf16.mxu1 %v10319_v25  ;;  %v10181_v25 = vld [vmem:[#allocation7 + $0xd8] sm:$0xff]  }
 0x3ef   :  { %5287 = vmatmul.mubr.bf16.gmra.mrb[112].mxu0 %v10320_v26  ;;  %6059 = vmatmul.mubr.bf16.gmra.mrb[112].mxu1 %v10320_v26  ;;  %v10180_v26 = vld [vmem:[#allocation7 + $0x18] sm:$0xff]  }
 0x3f0   :  { %5296 = vmatprep.mubr.bf16.mxu0 %v10321_v36  ;;  %6068 = vmatprep.mubr.bf16.mxu1 %v10321_v36  ;;  %v10182_v36 = vld [vmem:[#allocation7 + $0x98] sm:$0xff]  }
 0x3f7   :  { %5297 = vmatmul.mubr.bf16.gmra.mrb[116].mxu0 %v10322_v39  ;;  %6069 = vmatmul.mubr.bf16.gmra.mrb[116].mxu1 %v10322_v39  ;;  %v10183_v39 = vld [vmem:[#allocation7 + $0x60] sm:$0xff]  }
 0x3f8   :  { %5306 = vmatprep.mubr.bf16.mxu0 %v10323_v44  ;;  %6078 = vmatprep.mubr.bf16.mxu1 %v10323_v44  ;;  %v10185_v44 = vld [vmem:[#allocation7 + $0xe0] sm:$0xff]  }
 0x3ff   :  { %5307 = vmatmul.mubr.bf16.gmra.mrb[120].mxu0 %v10324_v50  ;;  %6079 = vmatmul.mubr.bf16.gmra.mrb[120].mxu1 %v10324_v50  ;;  %v10184_v50 = vld [vmem:[#allocation7 + $0x20] sm:$0xff]  }
 0x400   :  { %5316 = vmatprep.mubr.bf16.mxu0 %v10325_v40  ;;  %6088 = vmatprep.mubr.bf16.mxu1 %v10325_v40  ;;  %v10186_v40 = vld [vmem:[#allocation7 + $0xa0] sm:$0xff]  }
 0x407   :  { %5317 = vmatmul.mubr.bf16.gmra.mrb[124].mxu0 %v10326_v3  ;;  %6089 = vmatmul.mubr.bf16.gmra.mrb[124].mxu1 %v10326_v3  ;;  %v10187_v3 = vld [vmem:[#allocation7 + $0x68] sm:$0xff]  }
 0x408   :  { %5359 = vmatprep.mubr.bf16.mxu0 %v12566_v63  ;;  %6131 = vmatprep.mubr.bf16.mxu1 %v12566_v63 }
 0x40f   :  { %8426 = vmatmul.mubr.msk.bf16.vlgmr.msra.gmra.mrb[64].mxu0 %vm3155_vm0, %v10327_v1  ;;  %8442 = vmatmul.mubr.msk.bf16.vlgmr.msra.gmra.mrb[64].mxu1 %vm3155_vm0, %v10327_v1  ;;  %v10190_v1 = vld [vmem:[#allocation7 + $0xa8] sm:$0xff]  }
 0x410   :  { %8524 = vmatpush3.bf16.msra.mxu0 %v10168_v52  ;;  %8636 = vmatpush3.bf16.msra.mxu1 %v10170_v0  ;;  %v10329_v52 = vld [vmem:[%s12531_s0 + $0x88] ss:$28 sps:$4 sm:$0xff]   ;;  %v10189_v0 = vld [vmem:[#allocation7 + $0xe8] sm:$0xff]  }
 0x411   :  { %5369 = vmatprep.mubr.bf16.mxu0 %v12566_v63  ;;  %6141 = vmatprep.mubr.bf16.mxu1 %v12566_v63 }
 0x412   :  { %8525 = vmatprep.subr.bf16.mxu0 %v10171_v59  ;;  %8637 = vmatprep.subr.bf16.mxu1 %v10173_v21  ;;  %v10188_v59 = vld [vmem:[#allocation7 + $0x28] sm:$0xff]   ;;  %v10191_v21 = vld [vmem:[#allocation7 + $0x70] sm:$0xff]  }
 0x414   :  { %8526 = vmatpush3.bf16.msra.mxu0 %v10172_v47  ;;  %8638 = vmatpush3.bf16.msra.mxu1 %v10174_v62  ;;  %v10193_v47 = vld [vmem:[#allocation7 + $0xf0] sm:$0xff]  }
 0x415   :  { %8527 = vmatprep.subr.bf16.mxu0 %v10175_v35  ;;  %8639 = vmatprep.subr.bf16.mxu1 %v10177_v16  ;;  %v10192_v62 = vld [vmem:[#allocation7 + $0x30] sm:$0xff]   ;;  %v10195_v16 = vld [vmem:[#allocation7 + $0x78] sm:$0xff]  }
 0x416   :  { %v10194_v35 = vld [vmem:[#allocation7 + $0xb0] sm:$0xff]  }
 0x417   :  { %8427 = vmatmul.mubr.msk.bf16.gmra.mrb[68].mxu0 %vm3155_vm0, %v10328_v10  ;;  %8443 = vmatmul.mubr.msk.bf16.gmra.mrb[68].mxu1 %vm3155_vm0, %v10328_v10  ;;  %v10198_v10 = vld [vmem:[#allocation7 + $0xb8] sm:$0xff]  }
 0x418   :  { %5379 = vmatprep.mubr.bf16.mxu0 %v12566_v63  ;;  %6151 = vmatprep.mubr.bf16.mxu1 %v12566_v63 }
 0x419   :  { %8528 = vmatpush3.bf16.msra.mxu0 %v10176_v23  ;;  %8640 = vmatpush3.bf16.msra.mxu1 %v10178_v54  ;;  %v10330_v23 = vld [vmem:[%s12531_s0 + $0xc0] ss:$28 sps:$4 sm:$0xff]  }
 0x41a   :  { %8529 = vmatprep.subr.bf16.mxu0 %v10179_v24  ;;  %8641 = vmatprep.subr.bf16.mxu1 %v10181_v25  ;;  %v10197_v54 = vld [vmem:[#allocation7 + $0xf8] sm:$0xff]   ;;  %v10199_v25 = vld [vmem:[#allocation7 + $0x140] sm:$0xff]  }
 0x41b   :  { %v10196_v24 = vld [vmem:[#allocation7 + $0x38] sm:$0xff]  }
 0x41d   :  { %8530 = vmatpush3.bf16.msra.mxu0 %v10180_v26  ;;  %8642 = vmatpush3.bf16.msra.mxu1 %v10182_v36  ;;  %v10201_v26 = vld [vmem:[#allocation7 + $0x1c0] sm:$0xff]   ;;  %v10331_v36 = vld [vmem:[%s12531_s0 + $0xf8] ss:$28 sps:$4 sm:$0xff]  }
 0x41e   :  { %8531 = vmatprep.subr.bf16.mxu0 %v10183_v39  ;;  %8643 = vmatprep.subr.bf16.mxu1 %v10185_v44  ;;  %v10332_v39 = vld [vmem:[%s12531_s0 + $0x130] ss:$28 sps:$4 sm:$0xff]   ;;  %v10333_v44 = vld [vmem:[%s12531_s0 + $0x168] ss:$28 sps:$4 sm:$0xff]  }
 0x41f   :  { %8428 = vmatmul.mubr.msk.bf16.gmra.mrb[72].mxu0 %vm3155_vm0, %v10329_v52  ;;  %8444 = vmatmul.mubr.msk.bf16.gmra.mrb[72].mxu1 %vm3155_vm0, %v10329_v52  ;;  %v10337_v52 = vld [vmem:[%s12531_s0 + $0x248] ss:$28 sps:$4 sm:$0xff]  }
 0x420   :  { %5389 = vmatprep.mubr.bf16.mxu0 %v12566_v63  ;;  %6161 = vmatprep.mubr.bf16.mxu1 %v12566_v63 }
 0x421   :  { %8532 = vmatpush3.bf16.msra.mxu0 %v10184_v50  ;;  %8644 = vmatpush3.bf16.msra.mxu1 %v10186_v40  ;;  %v10334_v50 = vld [vmem:[%s12531_s0 + $0x1a0] ss:$28 sps:$4 sm:$0xff]   ;;  %v10335_v40 = vld [vmem:[%s12531_s0 + $0x1d8] ss:$28 sps:$4 sm:$0xff]  }
 0x422   :  { %8533 = vmatprep.subr.bf16.mxu0 %v10187_v3  ;;  %8645 = vmatprep.subr.bf16.mxu1 %v10189_v0  ;;  %v10336_v3 = vld [vmem:[%s12531_s0 + $0x210] ss:$28 sps:$4 sm:$0xff]   ;;  %v10338_v0 = vld [vmem:[%s12531_s0 + $0x280] ss:$28 sps:$4 sm:$0xff]  }
 0x425   :  { %8534 = vmatpush3.bf16.msra.mxu0 %v10188_v59  ;;  %8646 = vmatpush3.bf16.msra.mxu1 %v10190_v1  ;;  %v10339_v59 = vld [vmem:[%s12531_s0 + $0x2b8] ss:$28 sps:$4 sm:$0xff]   ;;  %v10340_v1 = vld [vmem:[%s12531_s0 + $0x2f0] ss:$28 sps:$4 sm:$0xff]  }
 0x426   :  { %8535 = vmatprep.subr.bf16.mxu0 %v10191_v21  ;;  %8647 = vmatprep.subr.bf16.mxu1 %v10193_v47  ;;  %v10341_v21 = vld [vmem:[%s12531_s0 + $0x328] ss:$28 sps:$4 sm:$0xff]   ;;  %v10342_v47 = vld [vmem:[%s12531_s0 + $0x360] ss:$28 sps:$4 sm:$0xff]   ;;  %s10471_s0 = smov [#allocation10]  }
 0x427   :  { %8429 = vmatmul.mubr.msk.bf16.gmra.mrb[76].mxu0 %vm3155_vm0, %v10330_v23  ;;  %8445 = vmatmul.mubr.msk.bf16.gmra.mrb[76].mxu1 %vm3155_vm0, %v10330_v23  ;;  %v10205_v23 = vld [vmem:[#allocation7 + $0x1c8] sm:$0xff]   ;;  %s7876_s21 = sshll.u32 %s10471_s0, 4  ;;  %s7877_s21 = int_to_ptr.vmem [resolvable:$true] %s7876_s21 }
 0x428   :  { %5399 = vmatprep.mubr.bf16.mxu0 %v12566_v63  ;;  %6171 = vmatprep.mubr.bf16.mxu1 %v12566_v63  ;;  %s10432_s29 = scalar_lea.vmem %s7877_s21, 4096  ;;  %p10437_p5 = scmp.lt.s32.totalorder %s7877_s21, %s7877_s21 }
 0x429   :  { %8536 = vmatpush3.bf16.msra.mxu0 %v10192_v62  ;;  %8648 = vmatpush3.bf16.msra.mxu1 %v10194_v35  ;;  %v10200_v62 = vld [vmem:[#allocation7 + $0x100] sm:$0xff]   ;;  %p10433_p4 = scmp.ne.s32.totalorder %s7877_s21, %s10432_s29  ;;  %p10438_p6 = scmp.lt.s32.totalorder %s10432_s29, %s10432_s29 }
 0x42a   :  { %8537 = vmatprep.subr.bf16.mxu0 %v10195_v16  ;;  %8649 = vmatprep.subr.bf16.mxu1 %v10197_v54  ;;  %v10202_v35 = vld [vmem:[#allocation7 + $0x180] sm:$0xff]   ;;  %v10203_v16 = vld [vmem:[#allocation7 + $0x148] sm:$0xff]  }
 0x42b   :  { %v10206_v54 = vld [vmem:[#allocation7 + $0x188] sm:$0xff]   ;;  %p10439_p7 = por %p10438_p6, %p10437_p5 }
 0x42d   :  { %8538 = vmatpush3.bf16.msra.mxu0 %v10196_v24  ;;  %8650 = vmatpush3.bf16.msra.mxu1 %v10198_v10  ;;  %v10208_v24 = vld [vmem:[#allocation7 + $0x110] sm:$0xff]   ;;  %v10211_v10 = vld [vmem:[#allocation7 + $0x158] sm:$0xff]   ;;  %p10440_p8 = pnand %p10439_p7, %p10433_p4 }
 0x42e   :  { %8747 = vmatprep.subr.bf16.mxu0 %v10199_v25  ;;  %8859 = vmatprep.subr.bf16.mxu1 %v10201_v26  ;;  %v10215_v25 = vld [vmem:[#allocation7 + $0x160] sm:$0xff]  }
 0x42f   :  { %8430 = vmatmul.mubr.msk.bf16.gmra.mrb[80].mxu0 %vm3155_vm0, %v10331_v36  ;;  %8446 = vmatmul.mubr.msk.bf16.gmra.mrb[80].mxu1 %vm3155_vm0, %v10331_v36  ;;  %v10217_v26 = vld [vmem:[#allocation7 + $0x1e0] sm:$0xff]  }
 0x430   :  { %5409 = vmatprep.mubr.bf16.mxu0 %v12566_v63  ;;  %6181 = vmatprep.mubr.bf16.mxu1 %v12566_v63  ;;  %v10216_v36 = vld [vmem:[#allocation7 + $0x120] sm:$0xff]  }
 0x437   :  { %8431 = vmatmul.mubr.msk.bf16.gmra.mrb[84].mxu0 %vm3155_vm0, %v10332_v39  ;;  %8447 = vmatmul.mubr.msk.bf16.gmra.mrb[84].mxu1 %vm3155_vm0, %v10332_v39  ;;  %v10219_v39 = vld [vmem:[#allocation7 + $0x168] sm:$0xff]  }
 0x438   :  { %5419 = vmatprep.mubr.bf16.mxu0 %v12566_v63  ;;  %6191 = vmatprep.mubr.bf16.mxu1 %v12566_v63 }
 0x43f   :  { %8432 = vmatmul.mubr.msk.bf16.gmra.mrb[88].mxu0 %vm3155_vm0, %v10333_v44  ;;  %8448 = vmatmul.mubr.msk.bf16.gmra.mrb[88].mxu1 %vm3155_vm0, %v10333_v44  ;;  %v10223_v44 = vld [vmem:[#allocation7 + $0x170] sm:$0xff]  }
 0x440   :  { %5429 = vmatprep.mubr.bf16.mxu0 %v12566_v63  ;;  %6201 = vmatprep.mubr.bf16.mxu1 %v12566_v63 }
 0x447   :  { %8433 = vmatmul.mubr.msk.bf16.gmra.mrb[92].mxu0 %vm3155_vm0, %v10334_v50  ;;  %8449 = vmatmul.mubr.msk.bf16.gmra.mrb[92].mxu1 %vm3155_vm0, %v10334_v50  ;;  %v10225_v50 = vld [vmem:[#allocation7 + $0x1f0] sm:$0xff]  }
 0x448   :  { %5439 = vmatprep.mubr.bf16.mxu0 %v12566_v63  ;;  %6211 = vmatprep.mubr.bf16.mxu1 %v12566_v63 }
 0x44f   :  { %8434 = vmatmul.mubr.msk.bf16.gmra.mrb[96].mxu0 %vm3155_vm0, %v10335_v40  ;;  %8450 = vmatmul.mubr.msk.bf16.gmra.mrb[96].mxu1 %vm3155_vm0, %v10335_v40  ;;  %v10224_v40 = vld [vmem:[#allocation7 + $0x130] sm:$0xff]  }
 0x450   :  { %5449 = vmatprep.mubr.bf16.mxu0 %v12566_v63  ;;  %6221 = vmatprep.mubr.bf16.mxu1 %v12566_v63 }
 0x457   :  { %8435 = vmatmul.mubr.msk.bf16.gmra.mrb[100].mxu0 %vm3155_vm0, %v10336_v3  ;;  %8451 = vmatmul.mubr.msk.bf16.gmra.mrb[100].mxu1 %vm3155_vm0, %v10336_v3  ;;  %v10227_v3 = vld [vmem:[#allocation7 + $0x178] sm:$0xff]  }
 0x458   :  { %5459 = vmatprep.mubr.bf16.mxu0 %v12566_v63  ;;  %6231 = vmatprep.mubr.bf16.mxu1 %v12566_v63 }
 0x45f   :  { %8436 = vmatmul.mubr.msk.bf16.gmra.mrb[104].mxu0 %vm3155_vm0, %v10337_v52  ;;  %8452 = vmatmul.mubr.msk.bf16.gmra.mrb[104].mxu1 %vm3155_vm0, %v10337_v52  ;;  %v12580_v52 = vld [vmem:[#allocation31_spill] sm:$0xff] }
 0x460   :  { %5469 = vmatprep.mubr.bf16.mxu0 %v12566_v63  ;;  %6241 = vmatprep.mubr.bf16.mxu1 %v12566_v63 }
 0x467   :  { %8437 = vmatmul.mubr.msk.bf16.gmra.mrb[108].mxu0 %vm3155_vm0, %v10338_v0  ;;  %8453 = vmatmul.mubr.msk.bf16.gmra.mrb[108].mxu1 %vm3155_vm0, %v10338_v0  ;;  %v12581_v0 = vld [vmem:[#allocation32_spill] sm:$0xff] }
 0x468   :  { %5479 = vmatprep.mubr.bf16.mxu0 %v12566_v63  ;;  %6251 = vmatprep.mubr.bf16.mxu1 %v12566_v63 }
 0x46f   :  { %8438 = vmatmul.mubr.msk.bf16.gmra.mrb[112].mxu0 %vm3155_vm0, %v10339_v59  ;;  %8454 = vmatmul.mubr.msk.bf16.gmra.mrb[112].mxu1 %vm3155_vm0, %v10339_v59  ;;  %v12582_v59 = vld [vmem:[#allocation15_spill] sm:$0xff] }
 0x470   :  { %5489 = vmatprep.mubr.bf16.mxu0 %v12566_v63  ;;  %6261 = vmatprep.mubr.bf16.mxu1 %v12566_v63 }
 0x477   :  { %8439 = vmatmul.mubr.msk.bf16.gmra.mrb[116].mxu0 %vm3155_vm0, %v10340_v1  ;;  %8455 = vmatmul.mubr.msk.bf16.gmra.mrb[116].mxu1 %vm3155_vm0, %v10340_v1  ;;  %v613_v1 = vsub.s32 4, %v12582_v59 }
 0x478   :  { %5499 = vmatprep.mubr.bf16.mxu0 %v12566_v63  ;;  %6271 = vmatprep.mubr.bf16.mxu1 %v12566_v63 }
 0x47f   :  { %8440 = vmatmul.mubr.msk.bf16.gmra.mrb[120].mxu0 %vm3155_vm0, %v10341_v21  ;;  %8456 = vmatmul.mubr.msk.bf16.gmra.mrb[120].mxu1 %vm3155_vm0, %v10341_v21  ;;  %v621_v21 = vsub.s32 6, %v12582_v59 }
 0x480   :  { %5509 = vmatprep.mubr.bf16.mxu0 %v12566_v63  ;;  %6281 = vmatprep.mubr.bf16.mxu1 %v12566_v63  ;;  %v10204_v63 = vld [vmem:[#allocation7 + $0x108] sm:$0xff]  }
 0x487   :  { %8441 = vmatmul.mubr.msk.bf16.gmra.mrb[124].mxu0 %vm3155_vm0, %v10342_v47  ;;  %8457 = vmatmul.mubr.msk.bf16.gmra.mrb[124].mxu1 %vm3155_vm0, %v10342_v47  ;;  %v617_v47 = vsub.s32 5, %v12582_v59 }
 0x488   :  { %7227 = vmatprep.mubr.bf16.mxu0 %v11164_v46  ;;  %7388 = vmatprep.mubr.bf16.mxu1 %v11166_v48  ;;  %v10207_v46 = vld [vmem:[#allocation7 + $0x150] sm:$0xff]  }
 0x489   :  { %v10209_v48 = vld [vmem:[#allocation7 + $0x1d0] sm:$0xff]  }
 0x48f   :  { %7228 = vmatmul.mubr.bf16.vlgmr.msra.gmra.mrb[128].mxu0 %v11160_v43  ;;  %7389 = vmatmul.mubr.bf16.vlgmr.msra.gmra.mrb[128].mxu1 %v11162_v45  ;;  %v10210_v43 = vld [vmem:[#allocation7 + $0x190] sm:$0xff]   ;;  %v10213_v45 = vld [vmem:[#allocation7 + $0x1d8] sm:$0xff]  }
 0x490   :  { %7235 = vmatprep.mubr.bf16.mxu0 %v11186_v29  ;;  %7396 = vmatprep.mubr.bf16.mxu1 %v11188_v31  ;;  %v10212_v29 = vld [vmem:[#allocation7 + $0x118] sm:$0xff]  }
 0x491   :  { %8748 = vmatpush3.bf16.msra.mxu0 %v10200_v62  ;;  %8860 = vmatpush3.bf16.msra.mxu1 %v10202_v35  ;;  %v10214_v31 = vld [vmem:[#allocation7 + $0x198] sm:$0xff]   ;;  %v625_v62 = vsub.s32 7, %v12582_v59 }
 0x492   :  { %8749 = vmatprep.subr.bf16.mxu0 %v10203_v16  ;;  %8861 = vmatprep.subr.bf16.mxu1 %v10205_v23  ;;  %v12583_v35 = vld [vmem:[#allocation29_spill] sm:$0xff] }
 0x493   :  { %v10343_v16 = vld [vmem:[#allocation5] sm:$0xff] }
 0x494   :  { %v12040_v23 = vrot.slane %v10343_v16, %v613_v1 }
 0x495   :  { %8750 = vmatpush3.bf16.msra.mxu0 %v10204_v63  ;;  %8862 = vmatpush3.bf16.msra.mxu1 %v10206_v54  ;;  %v12584_v63 = vld [vmem:[#allocation30_spill] sm:$0xff]  ;;  %v12044_v54 = vrot.slane %v10343_v16, %v621_v21 }
 0x496   :  { %8751 = vmatprep.subr.bf16.mxu0 %v10207_v46  ;;  %8863 = vmatprep.subr.bf16.mxu1 %v10209_v48  ;;  %v12046_v46 = vrot.slane %v10343_v16, %v617_v47  ;;  %v12585_v48 = vld [vmem:[#allocation35_spill] sm:$0xff] }
 0x497   :  { %7236 = vmatmul.mubr.bf16.gmra.mrb[132].mxu0 %v11182_v20  ;;  %7397 = vmatmul.mubr.bf16.gmra.mrb[132].mxu1 %v11184_v28  ;;  %v10218_v20 = vld [vmem:[#allocation7 + $0x1a0] sm:$0xff]   ;;  %v10221_v28 = vld [vmem:[#allocation7 + $0x1e8] sm:$0xff]  }
 0x498   :  { %7243 = vmatprep.mubr.bf16.mxu0 %v11208_v58  ;;  %7404 = vmatprep.mubr.bf16.mxu1 %v11210_v60  ;;  %v10220_v58 = vld [vmem:[#allocation7 + $0x128] sm:$0xff]  }
 0x499   :  { %8752 = vmatpush3.bf16.msra.mxu0 %v10208_v24  ;;  %8864 = vmatpush3.bf16.msra.mxu1 %v10210_v43  ;;  %v10222_v60 = vld [vmem:[#allocation7 + $0x1a8] sm:$0xff]   ;;  %v12049_v24 = vrot.slane %v10343_v16, %v625_v62 }
 0x49a   :  { %8753 = vmatprep.subr.bf16.mxu0 %v10211_v10  ;;  %8865 = vmatprep.subr.bf16.mxu1 %v10213_v45 }
 0x49d   :  { %8754 = vmatpush3.bf16.msra.mxu0 %v10212_v29  ;;  %8866 = vmatpush3.bf16.msra.mxu1 %v10214_v31 }
 0x49e   :  { %8755 = vmatprep.subr.bf16.mxu0 %v10215_v25  ;;  %8867 = vmatprep.subr.bf16.mxu1 %v10217_v26 }
 0x49f   :  { %7244 = vmatmul.mubr.bf16.gmra.mrb[136].mxu0 %v11204_v55  ;;  %7405 = vmatmul.mubr.bf16.gmra.mrb[136].mxu1 %v11206_v57  ;;  %v10226_v55 = vld [vmem:[#allocation7 + $0x1b0] sm:$0xff]   ;;  %v10229_v57 = vld [vmem:[#allocation7 + $0x1f8] sm:$0xff]  }
 0x4a0   :  { %7251 = vmatprep.mubr.bf16.mxu0 %v11230_v9  ;;  %7412 = vmatprep.mubr.bf16.mxu1 %v11232_v42  ;;  %v10228_v9 = vld [vmem:[#allocation7 + $0x138] sm:$0xff]  }
 0x4a1   :  { %8756 = vmatpush3.bf16.msra.mxu0 %v10216_v36  ;;  %8868 = vmatpush3.bf16.msra.mxu1 %v10218_v20  ;;  %v10230_v42 = vld [vmem:[#allocation7 + $0x1b8] sm:$0xff]  }
 0x4a2   :  { %8757 = vmatprep.subr.bf16.mxu0 %v10219_v39  ;;  %8869 = vmatprep.subr.bf16.mxu1 %v10221_v28 }
 0x4a5   :  { %8758 = vmatpush3.bf16.msra.mxu0 %v10220_v58  ;;  %8870 = vmatpush3.bf16.msra.mxu1 %v10222_v60 }
 0x4a6   :  { %8759 = vmatprep.subr.bf16.mxu0 %v10223_v44  ;;  %8871 = vmatprep.subr.bf16.mxu1 %v10225_v50 }
 0x4a7   :  { %7252 = vmatmul.mubr.bf16.gmra.mrb[140].mxu0 %v11226_v4  ;;  %7413 = vmatmul.mubr.bf16.gmra.mrb[140].mxu1 %v11228_v6  ;;  %v12567_v4 = vld [vmem:[#allocation16_spill] sm:$0xff]  ;;  %v12568_v6 = vld [vmem:[#allocation19_spill] sm:$0xff] }
 0x4a8   :  { %7259 = vmatprep.mubr.bf16.mxu0 %v11256_v38  ;;  %7420 = vmatprep.mubr.bf16.mxu1 %v11262_v2  ;;  %v12571_v38 = vld [vmem:[#allocation18_spill] sm:$0xff]  ;;  %v12572_v2 = vld [vmem:[#allocation23_spill] sm:$0xff] }
 0x4a9   :  { %8760 = vmatpush3.bf16.msra.mxu0 %v10224_v40  ;;  %8872 = vmatpush3.bf16.msra.mxu1 %v10226_v55 }
 0x4aa   :  { %8761 = vmatprep.subr.bf16.mxu0 %v10227_v3  ;;  %8873 = vmatprep.subr.bf16.mxu1 %v10229_v57  ;;  %v12586_v3 = vld [vmem:[#allocation33_spill] sm:$0xff] }
 0x4ad   :  { %8762 = vmatpush3.bf16.msra.mxu0 %v10228_v9  ;;  %8874 = vmatpush3.bf16.msra.mxu1 %v10230_v42 }
 0x4af   :  { %7260 = vmatmul.mubr.bf16.gmra.mrb[144].mxu0 %v11248_v33  ;;  %7421 = vmatmul.mubr.bf16.gmra.mrb[144].mxu1 %v11254_v37  ;;  %v12569_v33 = vld [vmem:[#allocation20_spill] sm:$0xff]  ;;  %v12570_v37 = vld [vmem:[#allocation17_spill] sm:$0xff] }
 0x4b0   :  { %7267 = vmatprep.mubr.bf16.mxu0 %v11318_v51  ;;  %7428 = vmatprep.mubr.bf16.mxu1 %v11322_v17  ;;  %v12575_v51 = vld [vmem:[#allocation22_spill] sm:$0xff]  ;;  %v12576_v17 = vld [vmem:[#allocation27_spill] sm:$0xff] }
 0x4b7   :  { %7268 = vmatmul.mubr.bf16.gmra.mrb[148].mxu0 %v11306_v19  ;;  %7429 = vmatmul.mubr.bf16.gmra.mrb[148].mxu1 %v11316_v27  ;;  %v12573_v19 = vld [vmem:[#allocation24_spill] sm:$0xff]  ;;  %v12574_v27 = vld [vmem:[#allocation21_spill] sm:$0xff] }
 0x4b8   :  { %7275 = vmatprep.mubr.bf16.mxu0 %v11370_v53  ;;  %7436 = vmatprep.mubr.bf16.mxu1 %v11378_v56  ;;  %v12578_v53 = vld [vmem:[#allocation25_spill] sm:$0xff]  ;;  %v12579_v56 = vld [vmem:[#allocation26_spill] sm:$0xff] }
 0x4bf   :  { %7276 = vmatmul.mubr.bf16.gmra.mrb[152].mxu0 %v11364_v41  ;;  %7437 = vmatmul.mubr.bf16.gmra.mrb[152].mxu1 %v12567_v4  ;;  %v12577_v41 = vld [vmem:[#allocation28_spill] sm:$0xff] }
 0x4c0   :  { %7283 = vmatprep.mubr.bf16.mxu0 %v12568_v6  ;;  %7444 = vmatprep.mubr.bf16.mxu1 %v12569_v33  ;;  %v12587_v6 = vld [vmem:[#allocation34_spill] sm:$0xff] }
 0x4c7   :  { %7284 = vmatmul.mubr.bf16.gmra.mrb[156].mxu0 %v12570_v37  ;;  %7445 = vmatmul.mubr.bf16.gmra.mrb[156].mxu1 %v12571_v38 }
 0x4c8   :  { %7291 = vmatprep.mubr.bf16.mxu0 %v12572_v2  ;;  %7452 = vmatprep.mubr.bf16.mxu1 %v12573_v19 }
 0x4cf   :  { %7292 = vmatmul.mubr.bf16.gmra.mrb[160].mxu0 %v12574_v27  ;;  %7453 = vmatmul.mubr.bf16.gmra.mrb[160].mxu1 %v12575_v51 }
 0x4d0   :  { %7299 = vmatprep.mubr.bf16.mxu0 %v12576_v17  ;;  %7460 = vmatprep.mubr.bf16.mxu1 %v12577_v41 }
 0x4d7   :  { %7300 = vmatmul.mubr.bf16.gmra.mrb[164].mxu0 %v12578_v53  ;;  %7461 = vmatmul.mubr.bf16.gmra.mrb[164].mxu1 %v12579_v56 }
 0x4d8   :  { %7307 = vmatprep.mubr.bf16.mxu0 %v12580_v52  ;;  %7468 = vmatprep.mubr.bf16.mxu1 %v12581_v0 }
 0x4df   :  { %7308 = vmatmul.mubr.bf16.gmra.mrb[168].mxu0 %v12583_v35  ;;  %7469 = vmatmul.mubr.bf16.gmra.mrb[168].mxu1 %v12584_v63 }
 0x4e0   :  { %7315 = vmatprep.mubr.bf16.mxu0 %v11640_v30  ;;  %7476 = vmatprep.mubr.bf16.mxu1 %v12585_v48 }
 0x4e2   :  { %v5361_v43 = vpop.f32.mrb[64].mxu0  ;;  %v6133_v45 = vpop.f32.mrb[64].mxu1 }
 0x4e3   :  { %v9099_v10 = vadd.f32 %v5361_v43, %v12040_v23  ;;  %v5363_v29 = vpop.f32.mrb[65].mxu0  ;;  %v9163_v31 = vadd.f32 %v6133_v45, %v12044_v54  ;;  %v6135_v26 = vpop.f32.mrb[65].mxu1 }
 0x4e4   :  { %v9100_v25 = vadd.f32 %v5363_v29, %v12046_v46  ;;  %v5365_v36 = vpop.f32.mrb[66].mxu0  ;;  %v9164_v30 = vadd.f32 %v6135_v26, %v12049_v24  ;;  %v6137_v39 = vpop.f32.mrb[66].mxu1 }
 0x4e5   :  { %v9101_v20 = vadd.f32 %v5365_v36, %v12040_v23  ;;  %v5367_v28 = vpop.f32.mrb[67].mxu0  ;;  %v9165_v58 = vadd.f32 %v6137_v39, %v12044_v54  ;;  %v6139_v44 = vpop.f32.mrb[67].mxu1  ;;  %v6296_v50 = vmax.f32 %v9099_v10, 0.0  ;;  %v6298_v57 = vmax.f32 %v9163_v31, 0.0 }
 0x4e6   :  { %v9102_v60 = vadd.f32 %v5367_v28, %v12046_v46  ;;  %v9166_v55 = vadd.f32 %v6139_v44, %v12049_v24  ;;  %v6297_v9 = vmax.f32 %v9100_v25, 0.0  ;;  %v6299_v33 = vmax.f32 %v9164_v30, 0.0 }
 0x4e7   :  { %v6304_v40 = vmax.f32 %v9101_v20, 0.0  ;;  %7316 = vmatmul.mubr.bf16.gmra.mrb[172].mxu0 %v12586_v3  ;;  %v6306_v42 = vmax.f32 %v9165_v58, 0.0  ;;  %7477 = vmatmul.mubr.bf16.gmra.mrb[172].mxu1 %v12587_v6 }
 0x4e8   :  { %v6305_v4 = vmax.f32 %v9102_v60, 0.0  ;;  %7323 = vmatprep.mubr.bf16.mxu0 %v11678_v15  ;;  %v6307_v38 = vmax.f32 %v9166_v55, 0.0  ;;  %7484 = vmatprep.mubr.bf16.mxu1 %v11682_v32 }
 0x4e9   :  { %v12062_v37 = vpack.c.bf16 %v6304_v40, %v6296_v50  ;;  %v12065_v2 = vpack.c.bf16 %v6306_v42, %v6298_v57 }
 0x4ea   :  { %v12067_v19 = vpack.c.bf16 %v6305_v4, %v6297_v9  ;;  %v5371_v27 = vpop.f32.mrb[68].mxu0  ;;  %v12069_v51 = vpack.c.bf16 %v6307_v38, %v6299_v33  ;;  %v6143_v41 = vpop.f32.mrb[68].mxu1 }
 0x4eb   :  { %v9103_v17 = vadd.f32 %v5371_v27, %v12040_v23  ;;  %v5373_v53 = vpop.f32.mrb[69].mxu0  ;;  %v9167_v56 = vadd.f32 %v6143_v41, %v12044_v54  ;;  %v6145_v52 = vpop.f32.mrb[69].mxu1  ;;  %v12588_v41 = vld [vmem:[#allocation36_spill] sm:$0xff] }
 0x4ec   :  { %v9104_v15 = vadd.f32 %v5373_v53, %v12046_v46  ;;  %v5375_v0 = vpop.f32.mrb[70].mxu0  ;;  %v9168_v59 = vadd.f32 %v6145_v52, %v12049_v24  ;;  %v6147_v1 = vpop.f32.mrb[70].mxu1 }
 0x4ed   :  { %v9105_v32 = vadd.f32 %v5375_v0, %v12040_v23  ;;  %v5377_v21 = vpop.f32.mrb[71].mxu0  ;;  %v9169_v47 = vadd.f32 %v6147_v1, %v12044_v54  ;;  %v6149_v35 = vpop.f32.mrb[71].mxu1  ;;  %v6312_v16 = vmax.f32 %v9103_v17, 0.0  ;;  %v6314_v43 = vmax.f32 %v9167_v56, 0.0 }
 0x4ee   :  { %v9106_v62 = vadd.f32 %v5377_v21, %v12046_v46  ;;  %v9170_v48 = vadd.f32 %v6149_v35, %v12049_v24  ;;  %v6313_v10 = vmax.f32 %v9104_v15, 0.0  ;;  %v6315_v31 = vmax.f32 %v9168_v59, 0.0 }
 0x4ef   :  { %v6320_v63 = vmax.f32 %v9105_v32, 0.0  ;;  %7324 = vmatmul.mubr.bf16.gmra.mrb[176].mxu0 %v11674_v8  ;;  %v6322_v45 = vmax.f32 %v9169_v47, 0.0  ;;  %7485 = vmatmul.mubr.bf16.gmra.mrb[176].mxu1 %v11676_v22 }
 0x4f0   :  { %v6321_v29 = vmax.f32 %v9106_v62, 0.0  ;;  %7331 = vmatprep.mubr.bf16.mxu0 %v11704_v14  ;;  %v6323_v26 = vmax.f32 %v9170_v48, 0.0  ;;  %7492 = vmatprep.mubr.bf16.mxu1 %v11706_v7 }
 0x4f1   :  { %v12082_v25 = vpack.c.bf16 %v6320_v63, %v6312_v16  ;;  %v12085_v36 = vpack.c.bf16 %v6322_v45, %v6314_v43 }
 0x4f2   :  { %v12087_v30 = vpack.c.bf16 %v6321_v29, %v6313_v10  ;;  %v5381_v20 = vpop.f32.mrb[72].mxu0  ;;  %v12089_v8 = vpack.c.bf16 %v6323_v26, %v6315_v31  ;;  %v6153_v28 = vpop.f32.mrb[72].mxu1 }
 0x4f3   :  { %v9107_v39 = vadd.f32 %v5381_v20, %v12040_v23  ;;  %v5383_v58 = vpop.f32.mrb[73].mxu0  ;;  %v9171_v22 = vadd.f32 %v6153_v28, %v12044_v54  ;;  %v6155_v60 = vpop.f32.mrb[73].mxu1 }
 0x4f4   :  { %v9108_v14 = vadd.f32 %v5383_v58, %v12046_v46  ;;  %v5385_v44 = vpop.f32.mrb[74].mxu0  ;;  %v9172_v50 = vadd.f32 %v6155_v60, %v12049_v24  ;;  %v6157_v40 = vpop.f32.mrb[74].mxu1 }
 0x4f5   :  { %v9109_v7 = vadd.f32 %v5385_v44, %v12040_v23  ;;  %v5387_v55 = vpop.f32.mrb[75].mxu0  ;;  %v9173_v3 = vadd.f32 %v6157_v40, %v12044_v54  ;;  %v6159_v9 = vpop.f32.mrb[75].mxu1  ;;  %v6328_v42 = vmax.f32 %v9107_v39, 0.0  ;;  %v6330_v33 = vmax.f32 %v9171_v22, 0.0  ;;  %v12589_v22 = vld [vmem:[#allocation37_spill] sm:$0xff] }
 0x4f6   :  { %v9110_v57 = vadd.f32 %v5387_v55, %v12046_v46  ;;  %v9174_v6 = vadd.f32 %v6159_v9, %v12049_v24  ;;  %v6329_v38 = vmax.f32 %v9108_v14, 0.0  ;;  %v6331_v53 = vmax.f32 %v9172_v50, 0.0 }
 0x4f7   :  { %v6336_v4 = vmax.f32 %v9109_v7, 0.0  ;;  %7332 = vmatmul.mubr.bf16.gmra.mrb[180].mxu0 %v11700_v49  ;;  %v6338_v27 = vmax.f32 %v9173_v3, 0.0  ;;  %7493 = vmatmul.mubr.bf16.gmra.mrb[180].mxu1 %v12588_v41 }
 0x4f8   :  { %v6337_v17 = vmax.f32 %v9110_v57, 0.0  ;;  %7339 = vmatprep.mubr.bf16.mxu0 %v11726_v13  ;;  %v6339_v15 = vmax.f32 %v9174_v6, 0.0  ;;  %7500 = vmatprep.mubr.bf16.mxu1 %v11728_v34 }
 0x4f9   :  { %v12102_v56 = vpack.c.bf16 %v6336_v4, %v6328_v42  ;;  %v12105_v52 = vpack.c.bf16 %v6338_v27, %v6330_v33 }
 0x4fa   :  { %v12107_v0 = vpack.c.bf16 %v6337_v17, %v6329_v38  ;;  %v5391_v59 = vpop.f32.mrb[76].mxu0  ;;  %v12109_v49 = vpack.c.bf16 %v6339_v15, %v6331_v53  ;;  %v6163_v1 = vpop.f32.mrb[76].mxu1 }
 0x4fb   :  { %v9111_v32 = vadd.f32 %v5391_v59, %v12040_v23  ;;  %v5393_v21 = vpop.f32.mrb[77].mxu0  ;;  %v9175_v47 = vadd.f32 %v6163_v1, %v12044_v54  ;;  %v6165_v62 = vpop.f32.mrb[77].mxu1 }
 0x4fc   :  { %v9112_v13 = vadd.f32 %v5393_v21, %v12046_v46  ;;  %v5395_v35 = vpop.f32.mrb[78].mxu0  ;;  %v9176_v16 = vadd.f32 %v6165_v62, %v12049_v24  ;;  %v6167_v63 = vpop.f32.mrb[78].mxu1 }
 0x4fd   :  { %v9113_v34 = vadd.f32 %v5395_v35, %v12040_v23  ;;  %v5397_v48 = vpop.f32.mrb[79].mxu0  ;;  %v9177_v43 = vadd.f32 %v6167_v63, %v12044_v54  ;;  %v6169_v45 = vpop.f32.mrb[79].mxu1  ;;  %v6344_v29 = vmax.f32 %v9111_v32, 0.0  ;;  %v6346_v20 = vmax.f32 %v9175_v47, 0.0 }
 0x4fe   :  { %v9114_v10 = vadd.f32 %v5397_v48, %v12046_v46  ;;  %v9178_v26 = vadd.f32 %v6169_v45, %v12049_v24  ;;  %v6345_v39 = vmax.f32 %v9112_v13, 0.0  ;;  %v6347_v14 = vmax.f32 %v9176_v16, 0.0 }
 0x4ff   :  { %v6352_v31 = vmax.f32 %v9113_v34, 0.0  ;;  %7340 = vmatmul.mubr.bf16.gmra.mrb[184].mxu0 %v11722_v5  ;;  %v6354_v28 = vmax.f32 %v9177_v43, 0.0  ;;  %7501 = vmatmul.mubr.bf16.gmra.mrb[184].mxu1 %v12589_v22 }
 0x500   :  { %v6353_v58 = vmax.f32 %v9114_v10, 0.0  ;;  %7347 = vmatprep.mubr.bf16.mxu0 %v11748_v18  ;;  %v6355_v44 = vmax.f32 %v9178_v26, 0.0  ;;  %7508 = vmatprep.mubr.bf16.mxu1 %v11750_v61 }
 0x501   :  { %v12122_v60 = vpack.c.bf16 %v6352_v31, %v6344_v29  ;;  %v12125_v50 = vpack.c.bf16 %v6354_v28, %v6346_v20 }
 0x502   :  { %v12127_v7 = vpack.c.bf16 %v6353_v58, %v6345_v39  ;;  %v5401_v40 = vpop.f32.mrb[80].mxu0  ;;  %v12129_v5 = vpack.c.bf16 %v6355_v44, %v6347_v14  ;;  %v6173_v3 = vpop.f32.mrb[80].mxu1 }
 0x503   :  { %v9115_v55 = vadd.f32 %v5401_v40, %v12040_v23  ;;  %v5403_v57 = vpop.f32.mrb[81].mxu0  ;;  %v9179_v9 = vadd.f32 %v6173_v3, %v12044_v54  ;;  %v6175_v42 = vpop.f32.mrb[81].mxu1 }
 0x504   :  { %v9116_v18 = vadd.f32 %v5403_v57, %v12046_v46  ;;  %v5405_v4 = vpop.f32.mrb[82].mxu0  ;;  %v9180_v6 = vadd.f32 %v6175_v42, %v12049_v24  ;;  %v6177_v33 = vpop.f32.mrb[82].mxu1 }
 0x505   :  { %v9117_v61 = vadd.f32 %v5405_v4, %v12040_v23  ;;  %v5407_v38 = vpop.f32.mrb[83].mxu0  ;;  %v9181_v27 = vadd.f32 %v6177_v33, %v12044_v54  ;;  %v6179_v41 = vpop.f32.mrb[83].mxu1  ;;  %v6360_v53 = vmax.f32 %v9115_v55, 0.0  ;;  %v6362_v32 = vmax.f32 %v9179_v9, 0.0 }
 0x506   :  { %v9118_v17 = vadd.f32 %v5407_v38, %v12046_v46  ;;  %v9182_v59 = vadd.f32 %v6179_v41, %v12049_v24  ;;  %v6361_v1 = vmax.f32 %v9116_v18, 0.0  ;;  %v6363_v13 = vmax.f32 %v9180_v6, 0.0 }
 0x507   :  { %v6368_v15 = vmax.f32 %v9117_v61, 0.0  ;;  %7348 = vmatmul.mubr.bf16.gmra.mrb[188].mxu0 %v11744_v12  ;;  %v6370_v21 = vmax.f32 %v9181_v27, 0.0  ;;  %7509 = vmatmul.mubr.bf16.gmra.mrb[188].mxu1 %v11746_v11 }
 0x508   :  { %v6369_v47 = vmax.f32 %v9118_v17, 0.0  ;;  %7549 = vmatprep.mubr.bf16.mxu0 %v12067_v19  ;;  %v6371_v35 = vmax.f32 %v9182_v59, 0.0  ;;  %7710 = vmatprep.mubr.bf16.mxu1 %v12069_v51 }
 0x509   :  { %v12142_v62 = vpack.c.bf16 %v6368_v15, %v6360_v53  ;;  %v12145_v16 = vpack.c.bf16 %v6370_v21, %v6362_v32 }
 0x50a   :  { %v12147_v34 = vpack.c.bf16 %v6369_v47, %v6361_v1  ;;  %v5411_v63 = vpop.f32.mrb[84].mxu0  ;;  %v12149_v12 = vpack.c.bf16 %v6371_v35, %v6363_v13  ;;  %v6183_v43 = vpop.f32.mrb[84].mxu1 }
 0x50b   :  { %v9119_v48 = vadd.f32 %v5411_v63, %v12040_v23  ;;  %v5413_v10 = vpop.f32.mrb[85].mxu0  ;;  %v9183_v11 = vadd.f32 %v6183_v43, %v12044_v54  ;;  %v6185_v45 = vpop.f32.mrb[85].mxu1 }
 0x50c   :  { %v9120_v19 = vadd.f32 %v5413_v10, %v12046_v46  ;;  %v5415_v29 = vpop.f32.mrb[86].mxu0  ;;  %v9184_v31 = vadd.f32 %v6185_v45, %v12049_v24  ;;  %v6187_v26 = vpop.f32.mrb[86].mxu1 }
 0x50d   :  { %v9121_v51 = vadd.f32 %v5415_v29, %v12040_v23  ;;  %v5417_v20 = vpop.f32.mrb[87].mxu0  ;;  %v9185_v39 = vadd.f32 %v6187_v26, %v12044_v54  ;;  %v6189_v58 = vpop.f32.mrb[87].mxu1  ;;  %v6376_v22 = vmax.f32 %v9119_v48, 0.0  ;;  %v6378_v40 = vmax.f32 %v9183_v11, 0.0 }
 0x50e   :  { %v9122_v28 = vadd.f32 %v5417_v20, %v12046_v46  ;;  %v9186_v44 = vadd.f32 %v6189_v58, %v12049_v24  ;;  %v6377_v55 = vmax.f32 %v9120_v19, 0.0  ;;  %v6379_v9 = vmax.f32 %v9184_v31, 0.0 }
 0x50f   :  { %v6384_v14 = vmax.f32 %v9121_v51, 0.0  ;;  %7550 = vmatmul.mubr.bf16.vlgmr.msra.gmra.mrb[192].mxu0 %v12062_v37  ;;  %v6386_v3 = vmax.f32 %v9185_v39, 0.0  ;;  %7711 = vmatmul.mubr.bf16.vlgmr.msra.gmra.mrb[192].mxu1 %v12065_v2 }
 0x510   :  { %v6385_v57 = vmax.f32 %v9122_v28, 0.0  ;;  %7557 = vmatprep.mubr.bf16.mxu0 %v12087_v30  ;;  %v6387_v42 = vmax.f32 %v9186_v44, 0.0  ;;  %7718 = vmatprep.mubr.bf16.mxu1 %v12089_v8 }
 0x511   :  { %v12162_v18 = vpack.c.bf16 %v6384_v14, %v6376_v22  ;;  %v12165_v4 = vpack.c.bf16 %v6386_v3, %v6378_v40 }
 0x512   :  { %v12167_v6 = vpack.c.bf16 %v6385_v57, %v6377_v55  ;;  %v5421_v61 = vpop.f32.mrb[88].mxu0  ;;  %v12169_v37 = vpack.c.bf16 %v6387_v42, %v6379_v9  ;;  %v6193_v38 = vpop.f32.mrb[88].mxu1 }
 0x513   :  { %v9123_v33 = vadd.f32 %v5421_v61, %v12040_v23  ;;  %v5423_v27 = vpop.f32.mrb[89].mxu0  ;;  %v9187_v2 = vadd.f32 %v6193_v38, %v12044_v54  ;;  %v6195_v17 = vpop.f32.mrb[89].mxu1 }
 0x514   :  { %v9124_v30 = vadd.f32 %v5423_v27, %v12046_v46  ;;  %v5425_v41 = vpop.f32.mrb[90].mxu0  ;;  %v9188_v53 = vadd.f32 %v6195_v17, %v12049_v24  ;;  %v6197_v15 = vpop.f32.mrb[90].mxu1 }
 0x515   :  { %v9125_v8 = vadd.f32 %v5425_v41, %v12040_v23  ;;  %v5427_v59 = vpop.f32.mrb[91].mxu0  ;;  %v9189_v32 = vadd.f32 %v6197_v15, %v12044_v54  ;;  %v6199_v21 = vpop.f32.mrb[91].mxu1  ;;  %v6392_v47 = vmax.f32 %v9123_v33, 0.0  ;;  %v6394_v63 = vmax.f32 %v9187_v2, 0.0 }
 0x516   :  { %v9126_v1 = vadd.f32 %v5427_v59, %v12046_v46  ;;  %v9190_v35 = vadd.f32 %v6199_v21, %v12049_v24  ;;  %v6393_v48 = vmax.f32 %v9124_v30, 0.0  ;;  %v6395_v11 = vmax.f32 %v9188_v53, 0.0 }
 0x517   :  { %v6400_v13 = vmax.f32 %v9125_v8, 0.0  ;;  %7558 = vmatmul.mubr.bf16.gmra.mrb[196].mxu0 %v12082_v25  ;;  %v6402_v43 = vmax.f32 %v9189_v32, 0.0  ;;  %7719 = vmatmul.mubr.bf16.gmra.mrb[196].mxu1 %v12085_v36 }
 0x518   :  { %v6401_v10 = vmax.f32 %v9126_v1, 0.0  ;;  %7565 = vmatprep.mubr.bf16.mxu0 %v12107_v0  ;;  %v6403_v45 = vmax.f32 %v9190_v35, 0.0  ;;  %7726 = vmatprep.mubr.bf16.mxu1 %v12109_v49 }
 0x519   :  { %v12182_v19 = vpack.c.bf16 %v6400_v13, %v6392_v47  ;;  %v12185_v29 = vpack.c.bf16 %v6402_v43, %v6394_v63 }
 0x51a   :  { %v12187_v31 = vpack.c.bf16 %v6401_v10, %v6393_v48  ;;  %v5431_v51 = vpop.f32.mrb[92].mxu0  ;;  %v12189_v25 = vpack.c.bf16 %v6403_v45, %v6395_v11  ;;  %v6203_v20 = vpop.f32.mrb[92].mxu1 }
 0x51b   :  { %v9127_v26 = vadd.f32 %v5431_v51, %v12040_v23  ;;  %v5433_v39 = vpop.f32.mrb[93].mxu0  ;;  %v9191_v36 = vadd.f32 %v6203_v20, %v12044_v54  ;;  %v6205_v28 = vpop.f32.mrb[93].mxu1 }
 0x51c   :  { %v9128_v0 = vadd.f32 %v5433_v39, %v12046_v46  ;;  %v5435_v58 = vpop.f32.mrb[94].mxu0  ;;  %v9192_v22 = vadd.f32 %v6205_v28, %v12049_v24  ;;  %v6207_v14 = vpop.f32.mrb[94].mxu1 }
 0x51d   :  { %v9129_v49 = vadd.f32 %v5435_v58, %v12040_v23  ;;  %v5437_v44 = vpop.f32.mrb[95].mxu0  ;;  %v9193_v40 = vadd.f32 %v6207_v14, %v12044_v54  ;;  %v6209_v3 = vpop.f32.mrb[95].mxu1  ;;  %v6408_v57 = vmax.f32 %v9127_v26, 0.0  ;;  %v6410_v61 = vmax.f32 %v9191_v36, 0.0 }
 0x51e   :  { %v9130_v55 = vadd.f32 %v5437_v44, %v12046_v46  ;;  %v9194_v42 = vadd.f32 %v6209_v3, %v12049_v24  ;;  %v6409_v33 = vmax.f32 %v9128_v0, 0.0  ;;  %v6411_v2 = vmax.f32 %v9192_v22, 0.0 }
 0x51f   :  { %v6416_v9 = vmax.f32 %v9129_v49, 0.0  ;;  %7566 = vmatmul.mubr.bf16.gmra.mrb[200].mxu0 %v12102_v56  ;;  %v6418_v38 = vmax.f32 %v9193_v40, 0.0  ;;  %7727 = vmatmul.mubr.bf16.gmra.mrb[200].mxu1 %v12105_v52 }
 0x520   :  { %v6417_v27 = vmax.f32 %v9130_v55, 0.0  ;;  %7573 = vmatprep.mubr.bf16.mxu0 %v12127_v7  ;;  %v6419_v17 = vmax.f32 %v9194_v42, 0.0  ;;  %7734 = vmatprep.mubr.bf16.mxu1 %v12129_v5 }
 0x521   :  { %v12202_v30 = vpack.c.bf16 %v6416_v9, %v6408_v57  ;;  %v12205_v41 = vpack.c.bf16 %v6418_v38, %v6410_v61 }
 0x522   :  { %v12207_v53 = vpack.c.bf16 %v6417_v27, %v6409_v33  ;;  %v5441_v8 = vpop.f32.mrb[96].mxu0  ;;  %v12209_v56 = vpack.c.bf16 %v6419_v17, %v6411_v2  ;;  %v6213_v59 = vpop.f32.mrb[96].mxu1 }
 0x523   :  { %v9131_v15 = vadd.f32 %v5441_v8, %v12040_v23  ;;  %v5443_v32 = vpop.f32.mrb[97].mxu0  ;;  %v9195_v52 = vadd.f32 %v6213_v59, %v12044_v54  ;;  %v6215_v1 = vpop.f32.mrb[97].mxu1 }
 0x524   :  { %v9132_v7 = vadd.f32 %v5443_v32, %v12046_v46  ;;  %v5445_v21 = vpop.f32.mrb[98].mxu0  ;;  %v9196_v47 = vadd.f32 %v6215_v1, %v12049_v24  ;;  %v6217_v13 = vpop.f32.mrb[98].mxu1 }
 0x525   :  { %v9133_v5 = vadd.f32 %v5445_v21, %v12040_v23  ;;  %v5447_v35 = vpop.f32.mrb[99].mxu0  ;;  %v9197_v63 = vadd.f32 %v6217_v13, %v12044_v54  ;;  %v6219_v43 = vpop.f32.mrb[99].mxu1  ;;  %v6424_v10 = vmax.f32 %v9131_v15, 0.0  ;;  %v6426_v51 = vmax.f32 %v9195_v52, 0.0 }
 0x526   :  { %v9134_v48 = vadd.f32 %v5447_v35, %v12046_v46  ;;  %v9198_v45 = vadd.f32 %v6219_v43, %v12049_v24  ;;  %v6425_v26 = vmax.f32 %v9132_v7, 0.0  ;;  %v6427_v36 = vmax.f32 %v9196_v47, 0.0 }
 0x527   :  { %v6432_v11 = vmax.f32 %v9133_v5, 0.0  ;;  %7574 = vmatmul.mubr.bf16.gmra.mrb[204].mxu0 %v12122_v60  ;;  %v6434_v20 = vmax.f32 %v9197_v63, 0.0  ;;  %7735 = vmatmul.mubr.bf16.gmra.mrb[204].mxu1 %v12125_v50 }
 0x528   :  { %v6433_v39 = vmax.f32 %v9134_v48, 0.0  ;;  %7581 = vmatprep.mubr.bf16.mxu0 %v12147_v34  ;;  %v6435_v28 = vmax.f32 %v9198_v45, 0.0  ;;  %7742 = vmatprep.mubr.bf16.mxu1 %v12149_v12 }
 0x529   :  { %v12222_v0 = vpack.c.bf16 %v6432_v11, %v6424_v10  ;;  %v12225_v58 = vpack.c.bf16 %v6434_v20, %v6426_v51 }
 0x52a   :  { %v12227_v22 = vpack.c.bf16 %v6433_v39, %v6425_v26  ;;  %v5451_v49 = vpop.f32.mrb[100].mxu0  ;;  %v12229_v60 = vpack.c.bf16 %v6435_v28, %v6427_v36  ;;  %v6223_v44 = vpop.f32.mrb[100].mxu1 }
 0x52b   :  { %v9135_v14 = vadd.f32 %v5451_v49, %v12040_v23  ;;  %v5453_v40 = vpop.f32.mrb[101].mxu0  ;;  %v9199_v50 = vadd.f32 %v6223_v44, %v12044_v54  ;;  %v6225_v55 = vpop.f32.mrb[101].mxu1 }
 0x52c   :  { %v9136_v34 = vadd.f32 %v5453_v40, %v12046_v46  ;;  %v5455_v3 = vpop.f32.mrb[102].mxu0  ;;  %v9200_v57 = vadd.f32 %v6225_v55, %v12049_v24  ;;  %v6227_v9 = vpop.f32.mrb[102].mxu1 }
 0x52d   :  { %v9137_v12 = vadd.f32 %v5455_v3, %v12040_v23  ;;  %v5457_v42 = vpop.f32.mrb[103].mxu0  ;;  %v9201_v61 = vadd.f32 %v6227_v9, %v12044_v54  ;;  %v6229_v38 = vpop.f32.mrb[103].mxu1  ;;  %v6440_v27 = vmax.f32 %v9135_v14, 0.0  ;;  %v6442_v8 = vmax.f32 %v9199_v50, 0.0 }
 0x52e   :  { %v9138_v33 = vadd.f32 %v5457_v42, %v12046_v46  ;;  %v9202_v17 = vadd.f32 %v6229_v38, %v12049_v24  ;;  %v6441_v15 = vmax.f32 %v9136_v34, 0.0  ;;  %v6443_v52 = vmax.f32 %v9200_v57, 0.0 }
 0x52f   :  { %v6448_v2 = vmax.f32 %v9137_v12, 0.0  ;;  %7582 = vmatmul.mubr.bf16.gmra.mrb[208].mxu0 %v12142_v62  ;;  %v6450_v59 = vmax.f32 %v9201_v61, 0.0  ;;  %7743 = vmatmul.mubr.bf16.gmra.mrb[208].mxu1 %v12145_v16 }
 0x530   :  { %v6449_v32 = vmax.f32 %v9138_v33, 0.0  ;;  %7589 = vmatprep.mubr.bf16.mxu0 %v12167_v6  ;;  %v6451_v1 = vmax.f32 %v9202_v17, 0.0  ;;  %7750 = vmatprep.mubr.bf16.mxu1 %v12169_v37 }
 0x531   :  { %v12242_v7 = vpack.c.bf16 %v6448_v2, %v6440_v27  ;;  %v12245_v21 = vpack.c.bf16 %v6450_v59, %v6442_v8 }
 0x532   :  { %v12247_v47 = vpack.c.bf16 %v6449_v32, %v6441_v15  ;;  %v5461_v5 = vpop.f32.mrb[104].mxu0  ;;  %v12249_v62 = vpack.c.bf16 %v6451_v1, %v6443_v52  ;;  %v6233_v35 = vpop.f32.mrb[104].mxu1 }
 0x533   :  { %v9139_v13 = vadd.f32 %v5461_v5, %v12040_v23  ;;  %v5463_v63 = vpop.f32.mrb[105].mxu0  ;;  %v9203_v16 = vadd.f32 %v6233_v35, %v12044_v54  ;;  %v6235_v48 = vpop.f32.mrb[105].mxu1 }
 0x534   :  { %v9140_v6 = vadd.f32 %v5463_v63, %v12046_v46  ;;  %v5465_v43 = vpop.f32.mrb[106].mxu0  ;;  %v9204_v10 = vadd.f32 %v6235_v48, %v12049_v24  ;;  %v6237_v11 = vpop.f32.mrb[106].mxu1 }
 0x535   :  { %v9141_v37 = vadd.f32 %v5465_v43, %v12040_v23  ;;  %v5467_v45 = vpop.f32.mrb[107].mxu0  ;;  %v9205_v51 = vadd.f32 %v6237_v11, %v12044_v54  ;;  %v6239_v20 = vpop.f32.mrb[107].mxu1  ;;  %v6456_v39 = vmax.f32 %v9139_v13, 0.0  ;;  %v6458_v49 = vmax.f32 %v9203_v16, 0.0 }
 0x536   :  { %v9142_v26 = vadd.f32 %v5467_v45, %v12046_v46  ;;  %v9206_v28 = vadd.f32 %v6239_v20, %v12049_v24  ;;  %v6457_v14 = vmax.f32 %v9140_v6, 0.0  ;;  %v6459_v50 = vmax.f32 %v9204_v10, 0.0 }
 0x537   :  { %v6464_v36 = vmax.f32 %v9141_v37, 0.0  ;;  %7590 = vmatmul.mubr.bf16.gmra.mrb[212].mxu0 %v12162_v18  ;;  %v6466_v44 = vmax.f32 %v9205_v51, 0.0  ;;  %7751 = vmatmul.mubr.bf16.gmra.mrb[212].mxu1 %v12165_v4 }
 0x538   :  { %v6465_v40 = vmax.f32 %v9142_v26, 0.0  ;;  %7597 = vmatprep.mubr.bf16.mxu0 %v12187_v31  ;;  %v6467_v55 = vmax.f32 %v9206_v28, 0.0  ;;  %7758 = vmatprep.mubr.bf16.mxu1 %v12189_v25 }
 0x539   :  { %v12262_v34 = vpack.c.bf16 %v6464_v36, %v6456_v39  ;;  %v12265_v3 = vpack.c.bf16 %v6466_v44, %v6458_v49 }
 0x53a   :  { %v12267_v57 = vpack.c.bf16 %v6465_v40, %v6457_v14  ;;  %v5471_v12 = vpop.f32.mrb[108].mxu0  ;;  %v12269_v18 = vpack.c.bf16 %v6467_v55, %v6459_v50  ;;  %v6243_v42 = vpop.f32.mrb[108].mxu1 }
 0x53b   :  { %v9143_v9 = vadd.f32 %v5471_v12, %v12040_v23  ;;  %v5473_v61 = vpop.f32.mrb[109].mxu0  ;;  %v9207_v4 = vadd.f32 %v6243_v42, %v12044_v54  ;;  %v6245_v33 = vpop.f32.mrb[109].mxu1 }
 0x53c   :  { %v9144_v31 = vadd.f32 %v5473_v61, %v12046_v46  ;;  %v5475_v38 = vpop.f32.mrb[110].mxu0  ;;  %v9208_v27 = vadd.f32 %v6245_v33, %v12049_v24  ;;  %v6247_v2 = vpop.f32.mrb[110].mxu1 }
 0x53d   :  { %v9145_v25 = vadd.f32 %v5475_v38, %v12040_v23  ;;  %v5477_v17 = vpop.f32.mrb[111].mxu0  ;;  %v9209_v8 = vadd.f32 %v6247_v2, %v12044_v54  ;;  %v6249_v59 = vpop.f32.mrb[111].mxu1  ;;  %v6472_v32 = vmax.f32 %v9143_v9, 0.0  ;;  %v6474_v5 = vmax.f32 %v9207_v4, 0.0 }
 0x53e   :  { %v9146_v15 = vadd.f32 %v5477_v17, %v12046_v46  ;;  %v9210_v1 = vadd.f32 %v6249_v59, %v12049_v24  ;;  %v6473_v13 = vmax.f32 %v9144_v31, 0.0  ;;  %v6475_v16 = vmax.f32 %v9208_v27, 0.0 }
 0x53f   :  { %v6480_v52 = vmax.f32 %v9145_v25, 0.0  ;;  %7598 = vmatmul.mubr.bf16.gmra.mrb[216].mxu0 %v12182_v19  ;;  %v6482_v35 = vmax.f32 %v9209_v8, 0.0  ;;  %7759 = vmatmul.mubr.bf16.gmra.mrb[216].mxu1 %v12185_v29 }
 0x540   :  { %v6481_v63 = vmax.f32 %v9146_v15, 0.0  ;;  %7605 = vmatprep.mubr.bf16.mxu0 %v12207_v53  ;;  %v6483_v48 = vmax.f32 %v9210_v1, 0.0  ;;  %7766 = vmatprep.mubr.bf16.mxu1 %v12209_v56 }
 0x541   :  { %v12282_v6 = vpack.c.bf16 %v6480_v52, %v6472_v32  ;;  %v12285_v43 = vpack.c.bf16 %v6482_v35, %v6474_v5 }
 0x542   :  { %v12287_v10 = vpack.c.bf16 %v6481_v63, %v6473_v13  ;;  %v5481_v37 = vpop.f32.mrb[112].mxu0  ;;  %v12289_v19 = vpack.c.bf16 %v6483_v48, %v6475_v16  ;;  %v6253_v45 = vpop.f32.mrb[112].mxu1 }
 0x543   :  { %v9147_v11 = vadd.f32 %v5481_v37, %v12040_v23  ;;  %v5483_v51 = vpop.f32.mrb[113].mxu0  ;;  %v9211_v29 = vadd.f32 %v6253_v45, %v12044_v54  ;;  %v6255_v26 = vpop.f32.mrb[113].mxu1 }
 0x544   :  { %v9148_v53 = vadd.f32 %v5483_v51, %v12046_v46  ;;  %v5485_v20 = vpop.f32.mrb[114].mxu0  ;;  %v9212_v39 = vadd.f32 %v6255_v26, %v12049_v24  ;;  %v6257_v36 = vpop.f32.mrb[114].mxu1 }
 0x545   :  { %v9149_v56 = vadd.f32 %v5485_v20, %v12040_v23  ;;  %v5487_v28 = vpop.f32.mrb[115].mxu0  ;;  %v9213_v49 = vadd.f32 %v6257_v36, %v12044_v54  ;;  %v6259_v44 = vpop.f32.mrb[115].mxu1  ;;  %v6488_v40 = vmax.f32 %v9147_v11, 0.0  ;;  %v6490_v12 = vmax.f32 %v9211_v29, 0.0 }
 0x546   :  { %v9150_v14 = vadd.f32 %v5487_v28, %v12046_v46  ;;  %v9214_v55 = vadd.f32 %v6259_v44, %v12049_v24  ;;  %v6489_v9 = vmax.f32 %v9148_v53, 0.0  ;;  %v6491_v4 = vmax.f32 %v9212_v39, 0.0 }
 0x547   :  { %v6496_v50 = vmax.f32 %v9149_v56, 0.0  ;;  %7606 = vmatmul.mubr.bf16.gmra.mrb[220].mxu0 %v12202_v30  ;;  %v6498_v42 = vmax.f32 %v9213_v49, 0.0  ;;  %7767 = vmatmul.mubr.bf16.gmra.mrb[220].mxu1 %v12205_v41 }
 0x548   :  { %v6497_v61 = vmax.f32 %v9150_v14, 0.0  ;;  %7613 = vmatprep.mubr.bf16.mxu0 %v12227_v22  ;;  %v6499_v33 = vmax.f32 %v9214_v55, 0.0  ;;  %7774 = vmatprep.mubr.bf16.mxu1 %v12229_v60 }
 0x549   :  { %v12302_v31 = vpack.c.bf16 %v6496_v50, %v6488_v40  ;;  %v12305_v38 = vpack.c.bf16 %v6498_v42, %v6490_v12 }
 0x54a   :  { %v12307_v27 = vpack.c.bf16 %v6497_v61, %v6489_v9  ;;  %v5491_v25 = vpop.f32.mrb[116].mxu0  ;;  %v12309_v30 = vpack.c.bf16 %v6499_v33, %v6491_v4  ;;  %v6263_v17 = vpop.f32.mrb[116].mxu1 }
 0x54b   :  { %v9151_v2 = vadd.f32 %v5491_v25, %v12040_v23  ;;  %v5493_v8 = vpop.f32.mrb[117].mxu0  ;;  %v9215_v41 = vadd.f32 %v6263_v17, %v12044_v54  ;;  %v6265_v15 = vpop.f32.mrb[117].mxu1 }
 0x54c   :  { %v9152_v22 = vadd.f32 %v5493_v8, %v12046_v46  ;;  %v5495_v59 = vpop.f32.mrb[118].mxu0  ;;  %v9216_v32 = vadd.f32 %v6265_v15, %v12049_v24  ;;  %v6267_v52 = vpop.f32.mrb[118].mxu1 }
 0x54d   :  { %v9153_v60 = vadd.f32 %v5495_v59, %v12040_v23  ;;  %v5497_v1 = vpop.f32.mrb[119].mxu0  ;;  %v9217_v5 = vadd.f32 %v6267_v52, %v12044_v54  ;;  %v6269_v35 = vpop.f32.mrb[119].mxu1  ;;  %v6504_v63 = vmax.f32 %v9151_v2, 0.0  ;;  %v6506_v37 = vmax.f32 %v9215_v41, 0.0 }
 0x54e   :  { %v9154_v13 = vadd.f32 %v5497_v1, %v12046_v46  ;;  %v9218_v48 = vadd.f32 %v6269_v35, %v12049_v24  ;;  %v6505_v11 = vmax.f32 %v9152_v22, 0.0  ;;  %v6507_v29 = vmax.f32 %v9216_v32, 0.0 }
 0x54f   :  { %v6512_v16 = vmax.f32 %v9153_v60, 0.0  ;;  %7614 = vmatmul.mubr.bf16.gmra.mrb[224].mxu0 %v12222_v0  ;;  %v6514_v45 = vmax.f32 %v9217_v5, 0.0  ;;  %7775 = vmatmul.mubr.bf16.gmra.mrb[224].mxu1 %v12225_v58 }
 0x550   :  { %v6513_v51 = vmax.f32 %v9154_v13, 0.0  ;;  %7621 = vmatprep.mubr.bf16.mxu0 %v12247_v47  ;;  %v6515_v26 = vmax.f32 %v9218_v48, 0.0  ;;  %7782 = vmatprep.mubr.bf16.mxu1 %v12249_v62 }
 0x551   :  { %v12322_v53 = vpack.c.bf16 %v6512_v16, %v6504_v63  ;;  %v12325_v20 = vpack.c.bf16 %v6514_v45, %v6506_v37 }
 0x552   :  { %v12327_v39 = vpack.c.bf16 %v6513_v51, %v6505_v11  ;;  %v5501_v56 = vpop.f32.mrb[120].mxu0  ;;  %v12329_v0 = vpack.c.bf16 %v6515_v26, %v6507_v29  ;;  %v6273_v28 = vpop.f32.mrb[120].mxu1 }
 0x553   :  { %v9155_v36 = vadd.f32 %v5501_v56, %v12040_v23  ;;  %v5503_v49 = vpop.f32.mrb[121].mxu0  ;;  %v9219_v58 = vadd.f32 %v6273_v28, %v12044_v54  ;;  %v6275_v14 = vpop.f32.mrb[121].mxu1 }
 0x554   :  { %v9156_v47 = vadd.f32 %v5503_v49, %v12046_v46  ;;  %v5505_v44 = vpop.f32.mrb[122].mxu0  ;;  %v9220_v40 = vadd.f32 %v6275_v14, %v12049_v24  ;;  %v6277_v50 = vpop.f32.mrb[122].mxu1 }
 0x555   :  { %v9157_v62 = vadd.f32 %v5505_v44, %v12040_v23  ;;  %v5507_v55 = vpop.f32.mrb[123].mxu0  ;;  %v9221_v12 = vadd.f32 %v6277_v50, %v12044_v54  ;;  %v6279_v42 = vpop.f32.mrb[123].mxu1  ;;  %v6520_v61 = vmax.f32 %v9155_v36, 0.0  ;;  %v6522_v25 = vmax.f32 %v9219_v58, 0.0  ;;  %v12371_v44 = vld [vmem:[#allocation8] ss:$0 sm:$0xff] }
 0x556   :  { %v9158_v9 = vadd.f32 %v5507_v55, %v12046_v46  ;;  %v9222_v33 = vadd.f32 %v6279_v42, %v12049_v24  ;;  %v6521_v2 = vmax.f32 %v9156_v47, 0.0  ;;  %v6523_v41 = vmax.f32 %v9220_v40, 0.0 }
 0x557   :  { %v6528_v4 = vmax.f32 %v9157_v62, 0.0  ;;  %7622 = vmatmul.mubr.bf16.gmra.mrb[228].mxu0 %v12242_v7  ;;  %v6530_v17 = vmax.f32 %v9221_v12, 0.0  ;;  %7783 = vmatmul.mubr.bf16.gmra.mrb[228].mxu1 %v12245_v21 }
 0x558   :  { %v6529_v8 = vmax.f32 %v9158_v9, 0.0  ;;  %7629 = vmatprep.mubr.bf16.mxu0 %v12267_v57  ;;  %v6531_v15 = vmax.f32 %v9222_v33, 0.0  ;;  %7790 = vmatprep.mubr.bf16.mxu1 %v12269_v18 }
 0x559   :  { %v12342_v22 = vpack.c.bf16 %v6528_v4, %v6520_v61  ;;  %v12345_v59 = vpack.c.bf16 %v6530_v17, %v6522_v25 }
 0x55a   :  { %v12347_v32 = vpack.c.bf16 %v6529_v8, %v6521_v2  ;;  %v5511_v60 = vpop.f32.mrb[124].mxu0  ;;  %v12349_v7 = vpack.c.bf16 %v6531_v15, %v6523_v41  ;;  %v6283_v1 = vpop.f32.mrb[124].mxu1 }
 0x55b   :  { %v9159_v52 = vadd.f32 %v5511_v60, %v12040_v23  ;;  %v5513_v5 = vpop.f32.mrb[125].mxu0  ;;  %v9223_v21 = vadd.f32 %v6283_v1, %v12044_v54  ;;  %v6285_v13 = vpop.f32.mrb[125].mxu1 }
 0x55c   :  { %v9160_v57 = vadd.f32 %v5513_v5, %v12046_v46  ;;  %v5515_v35 = vpop.f32.mrb[126].mxu0  ;;  %v9224_v63 = vadd.f32 %v6285_v13, %v12049_v24  ;;  %v6287_v16 = vpop.f32.mrb[126].mxu1 }
 0x55d   :  { %v9161_v18 = vadd.f32 %v5515_v35, %v12040_v23  ;;  %v5517_v48 = vpop.f32.mrb[127].mxu0  ;;  %v9225_v37 = vadd.f32 %v6287_v16, %v12044_v54  ;;  %v6289_v45 = vpop.f32.mrb[127].mxu1  ;;  %v6536_v51 = vmax.f32 %v9159_v52, 0.0  ;;  %v6538_v56 = vmax.f32 %v9223_v21, 0.0 }
 0x55e   :  { %v9162_v11 = vadd.f32 %v5517_v48, %v12046_v46  ;;  %v9226_v26 = vadd.f32 %v6289_v45, %v12049_v24  ;;  %v6537_v36 = vmax.f32 %v9160_v57, 0.0  ;;  %v6539_v23 = vmax.f32 %v9224_v63, 0.0 }
 0x55f   :  { %v6544_v29 = vmax.f32 %v9161_v18, 0.0  ;;  %7630 = vmatmul.mubr.bf16.gmra.mrb[232].mxu0 %v12262_v34  ;;  %v6546_v28 = vmax.f32 %v9225_v37, 0.0  ;;  %7791 = vmatmul.mubr.bf16.gmra.mrb[232].mxu1 %v12265_v3 }
 0x560   :  { %v6545_v49 = vmax.f32 %v9162_v11, 0.0  ;;  %7637 = vmatprep.mubr.bf16.mxu0 %v12287_v10  ;;  %v6547_v54 = vmax.f32 %v9226_v26, 0.0  ;;  %7798 = vmatprep.mubr.bf16.mxu1 %v12289_v19 }
 0x561   :  { %v12362_v58 = vpack.c.bf16 %v6544_v29, %v6536_v51  ;;  %v12365_v46 = vpack.c.bf16 %v6546_v28, %v6538_v56 }
 0x562   :  { %v12367_v47 = vpack.c.bf16 %v6545_v49, %v6537_v36  ;;  %v8539_v24 = vpop.f32.mrb[128].mxu0  ;;  %v12369_v34 = vpack.c.bf16 %v6547_v54, %v6539_v23  ;;  %v8651_v14 = vpop.f32.mrb[128].mxu1 }
 0x563   :  { %v8540_v40 = vpop.f32.mrb[129].mxu0  ;;  %v8652_v62 = vpop.f32.mrb[129].mxu1 }
 0x564   :  { %v8541_v3 = vadd.f32 %v8540_v40, %v8539_v24  ;;  %v8542_v10 = vpop.f32.mrb[130].mxu0  ;;  %v8653_v50 = vadd.f32 %v8652_v62, %v8651_v14  ;;  %v8654_v55 = vpop.f32.mrb[130].mxu1 }
 0x565   :  { %v8543_v12 = vpop.f32.mrb[131].mxu0  ;;  %v8655_v42 = vpop.f32.mrb[131].mxu1 }
 0x566   :  { %v7230_v9 = vadd.f32 %v8541_v3, %v12371_v44  ;;  %v8544_v19 = vadd.f32 %v8543_v12, %v8542_v10  ;;  %v8656_v61 = vadd.f32 %v8655_v42, %v8654_v55 }
 0x567   :  { %7638 = vmatmul.mubr.bf16.gmra.mrb[236].mxu0 %v12282_v6  ;;  %7799 = vmatmul.mubr.bf16.gmra.mrb[236].mxu1 %v12285_v43 }
 0x568   :  { %v12375_v4 = vadd.f32 %v8653_v50, %v7230_v9  ;;  %v7233_v33 = vadd.f32 %v8544_v19, %v12371_v44  ;;  %7645 = vmatprep.mubr.bf16.mxu0 %v12307_v27  ;;  %7806 = vmatprep.mubr.bf16.mxu1 %v12309_v30 }
 0x56a   :  { %v12381_v25 = vadd.f32 %v8656_v61, %v7233_v33  ;;  %v8545_v2 = vpop.f32.mrb[132].mxu0  ;;  %v8657_v17 = vpop.f32.mrb[132].mxu1 }
 0x56b   :  { %v8546_v8 = vpop.f32.mrb[133].mxu0  ;;  %v8658_v15 = vpop.f32.mrb[133].mxu1 }
 0x56c   :  { %v8547_v41 = vadd.f32 %v8546_v8, %v8545_v2  ;;  %v8548_v60 = vpop.f32.mrb[134].mxu0  ;;  %v8659_v52 = vadd.f32 %v8658_v15, %v8657_v17  ;;  %v8660_v6 = vpop.f32.mrb[134].mxu1 }
 0x56d   :  { %v8549_v1 = vpop.f32.mrb[135].mxu0  ;;  %v8661_v57 = vpop.f32.mrb[135].mxu1 }
 0x56e   :  { %v7238_v5 = vadd.f32 %v8547_v41, %v12371_v44  ;;  %v8550_v21 = vadd.f32 %v8549_v1, %v8548_v60  ;;  %v8662_v43 = vadd.f32 %v8661_v57, %v8660_v6 }
 0x56f   :  { %7646 = vmatmul.mubr.bf16.gmra.mrb[240].mxu0 %v12302_v31  ;;  %7807 = vmatmul.mubr.bf16.gmra.mrb[240].mxu1 %v12305_v38 }
 0x570   :  { %v12385_v27 = vadd.f32 %v8659_v52, %v7238_v5  ;;  %v7241_v30 = vadd.f32 %v8550_v21, %v12371_v44  ;;  %7653 = vmatprep.mubr.bf16.mxu0 %v12327_v39  ;;  %7814 = vmatprep.mubr.bf16.mxu1 %v12329_v0 }
 0x572   :  { %v12391_v13 = vadd.f32 %v8662_v43, %v7241_v30  ;;  %v8551_v35 = vpop.f32.mrb[136].mxu0  ;;  %v8663_v63 = vpop.f32.mrb[136].mxu1 }
 0x573   :  { %v8552_v18 = vpop.f32.mrb[137].mxu0  ;;  %v8664_v48 = vpop.f32.mrb[137].mxu1 }
 0x574   :  { %v8553_v16 = vadd.f32 %v8552_v18, %v8551_v35  ;;  %v8554_v37 = vpop.f32.mrb[138].mxu0  ;;  %v8665_v11 = vadd.f32 %v8664_v48, %v8663_v63  ;;  %v8666_v31 = vpop.f32.mrb[138].mxu1 }
 0x575   :  { %v8555_v45 = vpop.f32.mrb[139].mxu0  ;;  %v8667_v26 = vpop.f32.mrb[139].mxu1 }
 0x576   :  { %v7246_v51 = vadd.f32 %v8553_v16, %v12371_v44  ;;  %v8556_v29 = vadd.f32 %v8555_v45, %v8554_v37  ;;  %v8668_v38 = vadd.f32 %v8667_v26, %v8666_v31 }
 0x577   :  { %7654 = vmatmul.mubr.bf16.gmra.mrb[244].mxu0 %v12322_v53  ;;  %7815 = vmatmul.mubr.bf16.gmra.mrb[244].mxu1 %v12325_v20 }
 0x578   :  { %v12395_v39 = vadd.f32 %v8665_v11, %v7246_v51  ;;  %v7249_v0 = vadd.f32 %v8556_v29, %v12371_v44  ;;  %7661 = vmatprep.mubr.bf16.mxu0 %v12347_v32  ;;  %7822 = vmatprep.mubr.bf16.mxu1 %v12349_v7 }
 0x57a   :  { %v12401_v56 = vadd.f32 %v8668_v38, %v7249_v0  ;;  %v8557_v36 = vpop.f32.mrb[140].mxu0  ;;  %v8669_v28 = vpop.f32.mrb[140].mxu1 }
 0x57b   :  { %v8558_v49 = vpop.f32.mrb[141].mxu0  ;;  %v8670_v54 = vpop.f32.mrb[141].mxu1 }
 0x57c   :  { %v8559_v23 = vadd.f32 %v8558_v49, %v8557_v36  ;;  %v8560_v24 = vpop.f32.mrb[142].mxu0  ;;  %v8671_v14 = vadd.f32 %v8670_v54, %v8669_v28  ;;  %v8672_v53 = vpop.f32.mrb[142].mxu1 }
 0x57d   :  { %v8561_v40 = vpop.f32.mrb[143].mxu0  ;;  %v8673_v10 = vpop.f32.mrb[143].mxu1 }
 0x57e   :  { %v7254_v3 = vadd.f32 %v8559_v23, %v12371_v44  ;;  %v8562_v62 = vadd.f32 %v8561_v40, %v8560_v24  ;;  %v8674_v20 = vadd.f32 %v8673_v10, %v8672_v53 }
 0x57f   :  { %7662 = vmatmul.mubr.bf16.gmra.mrb[248].mxu0 %v12342_v22  ;;  %7823 = vmatmul.mubr.bf16.gmra.mrb[248].mxu1 %v12345_v59 }
 0x580   :  { %v12405_v32 = vadd.f32 %v8671_v14, %v7254_v3  ;;  %v7257_v7 = vadd.f32 %v8562_v62, %v12371_v44  ;;  %7669 = vmatprep.mubr.bf16.mxu0 %v12367_v47  ;;  %7830 = vmatprep.mubr.bf16.mxu1 %v12369_v34 }
 0x582   :  { %v12411_v50 = vadd.f32 %v8674_v20, %v7257_v7  ;;  %v8563_v55 = vpop.f32.mrb[144].mxu0  ;;  %v8675_v12 = vpop.f32.mrb[144].mxu1 }
 0x583   :  { %v8564_v9 = vpop.f32.mrb[145].mxu0  ;;  %v8676_v42 = vpop.f32.mrb[145].mxu1 }
 0x584   :  { %v8565_v19 = vadd.f32 %v8564_v9, %v8563_v55  ;;  %v8566_v61 = vpop.f32.mrb[146].mxu0  ;;  %v8677_v33 = vadd.f32 %v8676_v42, %v8675_v12  ;;  %v8678_v22 = vpop.f32.mrb[146].mxu1 }
 0x585   :  { %v8567_v2 = vpop.f32.mrb[147].mxu0  ;;  %v8679_v41 = vpop.f32.mrb[147].mxu1 }
 0x586   :  { %v7262_v17 = vadd.f32 %v8565_v19, %v12371_v44  ;;  %v8568_v8 = vadd.f32 %v8567_v2, %v8566_v61  ;;  %v8680_v59 = vadd.f32 %v8679_v41, %v8678_v22 }
 0x587   :  { %7670 = vmatmul.mubr.bf16.gmra.mrb[252].mxu0 %v12362_v58  ;;  %7831 = vmatmul.mubr.bf16.gmra.mrb[252].mxu1 %v12365_v46 }
 0x588   :  { %v12415_v47 = vadd.f32 %v8677_v33, %v7262_v17  ;;  %v7265_v34 = vadd.f32 %v8568_v8, %v12371_v44 }
 0x58a   :  { %v12419_v15 = vadd.f32 %v8680_v59, %v7265_v34  ;;  %v8569_v60 = vpop.f32.mrb[148].mxu0  ;;  %v8681_v52 = vpop.f32.mrb[148].mxu1 }
 0x58b   :  { %v8570_v6 = vpop.f32.mrb[149].mxu0  ;;  %v8682_v5 = vpop.f32.mrb[149].mxu1 }
 0x58c   :  { %v8571_v1 = vadd.f32 %v8570_v6, %v8569_v60  ;;  %v8572_v21 = vpop.f32.mrb[150].mxu0  ;;  %v8683_v57 = vadd.f32 %v8682_v5, %v8681_v52  ;;  %v8684_v43 = vpop.f32.mrb[150].mxu1 }
 0x58d   :  { %v8573_v30 = vpop.f32.mrb[151].mxu0  ;;  %v8685_v63 = vpop.f32.mrb[151].mxu1 }
 0x58e   :  { %v7270_v35 = vadd.f32 %v8571_v1, %v12371_v44  ;;  %v8574_v58 = vadd.f32 %v8573_v30, %v8572_v21  ;;  %v8686_v18 = vadd.f32 %v8685_v63, %v8684_v43 }
 0x590   :  { %v12422_v16 = vadd.f32 %v8683_v57, %v7270_v35  ;;  %v7273_v46 = vadd.f32 %v8574_v58, %v12371_v44 }
 0x592   :  { %v12425_v48 = vadd.f32 %v8686_v18, %v7273_v46  ;;  %v8575_v37 = vpop.f32.mrb[152].mxu0  ;;  %v8687_v11 = vpop.f32.mrb[152].mxu1 }
 0x593   :  { %v8576_v31 = vpop.f32.mrb[153].mxu0  ;;  %v8688_v51 = vpop.f32.mrb[153].mxu1 }
 0x594   :  { %v8577_v45 = vadd.f32 %v8576_v31, %v8575_v37  ;;  %v8578_v29 = vpop.f32.mrb[154].mxu0  ;;  %v8689_v26 = vadd.f32 %v8688_v51, %v8687_v11  ;;  %v8690_v38 = vpop.f32.mrb[154].mxu1 }
 0x595   :  { %v8579_v0 = vpop.f32.mrb[155].mxu0  ;;  %v8691_v49 = vpop.f32.mrb[155].mxu1 }
 0x596   :  { %v7278_v36 = vadd.f32 %v8577_v45, %v12371_v44  ;;  %v8580_v28 = vadd.f32 %v8579_v0, %v8578_v29  ;;  %v8692_v23 = vadd.f32 %v8691_v49, %v8690_v38 }
 0x598   :  { %v12428_v54 = vadd.f32 %v8689_v26, %v7278_v36  ;;  %v7281_v24 = vadd.f32 %v8580_v28, %v12371_v44 }
 0x59a   :  { %v12431_v14 = vadd.f32 %v8692_v23, %v7281_v24  ;;  %v8581_v53 = vpop.f32.mrb[156].mxu0  ;;  %v8693_v40 = vpop.f32.mrb[156].mxu1 }
 0x59b   :  { %v8582_v3 = vpop.f32.mrb[157].mxu0  ;;  %v8694_v10 = vpop.f32.mrb[157].mxu1 }
 0x59c   :  { %v8583_v62 = vadd.f32 %v8582_v3, %v8581_v53  ;;  %v8584_v20 = vpop.f32.mrb[158].mxu0  ;;  %v8695_v7 = vadd.f32 %v8694_v10, %v8693_v40  ;;  %v8696_v55 = vpop.f32.mrb[158].mxu1 }
 0x59d   :  { %v8585_v12 = vpop.f32.mrb[159].mxu0  ;;  %v8697_v42 = vpop.f32.mrb[159].mxu1 }
 0x59e   :  { %v7286_v9 = vadd.f32 %v8583_v62, %v12371_v44  ;;  %v8586_v19 = vadd.f32 %v8585_v12, %v8584_v20  ;;  %v8698_v61 = vadd.f32 %v8697_v42, %v8696_v55 }
 0x5a0   :  { %v12434_v33 = vadd.f32 %v8695_v7, %v7286_v9  ;;  %v7289_v22 = vadd.f32 %v8586_v19, %v12371_v44 }
 0x5a2   :  { %v12437_v2 = vadd.f32 %v8698_v61, %v7289_v22  ;;  %v8587_v17 = vpop.f32.mrb[160].mxu0  ;;  %v8699_v8 = vpop.f32.mrb[160].mxu1 }
 0x5a3   :  { %v8588_v41 = vpop.f32.mrb[161].mxu0  ;;  %v8700_v34 = vpop.f32.mrb[161].mxu1 }
 0x5a4   :  { %v8589_v59 = vadd.f32 %v8588_v41, %v8587_v17  ;;  %v8590_v60 = vpop.f32.mrb[162].mxu0  ;;  %v8701_v52 = vadd.f32 %v8700_v34, %v8699_v8  ;;  %v8702_v6 = vpop.f32.mrb[162].mxu1 }
 0x5a5   :  { %v8591_v1 = vpop.f32.mrb[163].mxu0  ;;  %v8703_v57 = vpop.f32.mrb[163].mxu1 }
 0x5a6   :  { %v7294_v5 = vadd.f32 %v8589_v59, %v12371_v44  ;;  %v8592_v21 = vadd.f32 %v8591_v1, %v8590_v60  ;;  %v8704_v43 = vadd.f32 %v8703_v57, %v8702_v6 }
 0x5a8   :  { %v12440_v30 = vadd.f32 %v8701_v52, %v7294_v5  ;;  %v7297_v35 = vadd.f32 %v8592_v21, %v12371_v44 }
 0x5aa   :  { %v12443_v58 = vadd.f32 %v8704_v43, %v7297_v35  ;;  %v8593_v63 = vpop.f32.mrb[164].mxu0  ;;  %v8705_v18 = vpop.f32.mrb[164].mxu1 }
 0x5ab   :  { %v8594_v46 = vpop.f32.mrb[165].mxu0  ;;  %v8706_v11 = vpop.f32.mrb[165].mxu1 }
 0x5ac   :  { %v8595_v37 = vadd.f32 %v8594_v46, %v8593_v63  ;;  %v8596_v31 = vpop.f32.mrb[166].mxu0  ;;  %v8707_v45 = vadd.f32 %v8706_v11, %v8705_v18  ;;  %v8708_v51 = vpop.f32.mrb[166].mxu1 }
 0x5ad   :  { %v8597_v29 = vpop.f32.mrb[167].mxu0  ;;  %v8709_v0 = vpop.f32.mrb[167].mxu1 }
 0x5ae   :  { %v7302_v26 = vadd.f32 %v8595_v37, %v12371_v44  ;;  %v8598_v38 = vadd.f32 %v8597_v29, %v8596_v31  ;;  %v8710_v36 = vadd.f32 %v8709_v0, %v8708_v51 }
 0x5b0   :  { %v12446_v28 = vadd.f32 %v8707_v45, %v7302_v26  ;;  %v7305_v49 = vadd.f32 %v8598_v38, %v12371_v44 }
 0x5b2   :  { %v12449_v23 = vadd.f32 %v8710_v36, %v7305_v49  ;;  %v8599_v24 = vpop.f32.mrb[168].mxu0  ;;  %v8711_v53 = vpop.f32.mrb[168].mxu1 }
 0x5b3   :  { %v8600_v40 = vpop.f32.mrb[169].mxu0  ;;  %v8712_v62 = vpop.f32.mrb[169].mxu1 }
 0x5b4   :  { %v8601_v3 = vadd.f32 %v8600_v40, %v8599_v24  ;;  %v8602_v10 = vpop.f32.mrb[170].mxu0  ;;  %v8713_v20 = vadd.f32 %v8712_v62, %v8711_v53  ;;  %v8714_v7 = vpop.f32.mrb[170].mxu1 }
 0x5b5   :  { %v8603_v55 = vpop.f32.mrb[171].mxu0  ;;  %v8715_v19 = vpop.f32.mrb[171].mxu1 }
 0x5b6   :  { %v7310_v12 = vadd.f32 %v8601_v3, %v12371_v44  ;;  %v8604_v9 = vadd.f32 %v8603_v55, %v8602_v10  ;;  %v8716_v42 = vadd.f32 %v8715_v19, %v8714_v7 }
 0x5b8   :  { %v12452_v61 = vadd.f32 %v8713_v20, %v7310_v12  ;;  %v7313_v22 = vadd.f32 %v8604_v9, %v12371_v44 }
 0x5ba   :  { %v12455_v17 = vadd.f32 %v8716_v42, %v7313_v22  ;;  %v8605_v8 = vpop.f32.mrb[172].mxu0  ;;  %v8717_v41 = vpop.f32.mrb[172].mxu1 }
 0x5bb   :  { %v8606_v59 = vpop.f32.mrb[173].mxu0  ;;  %v8718_v60 = vpop.f32.mrb[173].mxu1 }
 0x5bc   :  { %v8607_v34 = vadd.f32 %v8606_v59, %v8605_v8  ;;  %v8608_v52 = vpop.f32.mrb[174].mxu0  ;;  %v8719_v6 = vadd.f32 %v8718_v60, %v8717_v41  ;;  %v8720_v1 = vpop.f32.mrb[174].mxu1 }
 0x5bd   :  { %v8609_v5 = vpop.f32.mrb[175].mxu0  ;;  %v8721_v43 = vpop.f32.mrb[175].mxu1 }
 0x5be   :  { %v7318_v21 = vadd.f32 %v8607_v34, %v12371_v44  ;;  %v8610_v57 = vadd.f32 %v8609_v5, %v8608_v52  ;;  %v8722_v35 = vadd.f32 %v8721_v43, %v8720_v1 }
 0x5c0   :  { %v12458_v63 = vadd.f32 %v8719_v6, %v7318_v21  ;;  %v7321_v18 = vadd.f32 %v8610_v57, %v12371_v44 }
 0x5c2   :  { %v12461_v46 = vadd.f32 %v8722_v35, %v7321_v18  ;;  %v8611_v37 = vpop.f32.mrb[176].mxu0  ;;  %v8723_v11 = vpop.f32.mrb[176].mxu1 }
 0x5c3   :  { %v8612_v31 = vpop.f32.mrb[177].mxu0  ;;  %v8724_v51 = vpop.f32.mrb[177].mxu1 }
 0x5c4   :  { %v8613_v45 = vadd.f32 %v8612_v31, %v8611_v37  ;;  %v8614_v29 = vpop.f32.mrb[178].mxu0  ;;  %v8725_v26 = vadd.f32 %v8724_v51, %v8723_v11  ;;  %v8726_v38 = vpop.f32.mrb[178].mxu1 }
 0x5c5   :  { %v8615_v0 = vpop.f32.mrb[179].mxu0  ;;  %v8727_v24 = vpop.f32.mrb[179].mxu1 }
 0x5c6   :  { %v7326_v36 = vadd.f32 %v8613_v45, %v12371_v44  ;;  %v8616_v49 = vadd.f32 %v8615_v0, %v8614_v29  ;;  %v8728_v53 = vadd.f32 %v8727_v24, %v8726_v38 }
 0x5c8   :  { %v12464_v40 = vadd.f32 %v8725_v26, %v7326_v36  ;;  %v7329_v3 = vadd.f32 %v8616_v49, %v12371_v44 }
 0x5ca   :  { %v12467_v62 = vadd.f32 %v8728_v53, %v7329_v3  ;;  %v8617_v10 = vpop.f32.mrb[180].mxu0  ;;  %v8729_v20 = vpop.f32.mrb[180].mxu1 }
 0x5cb   :  { %v8618_v7 = vpop.f32.mrb[181].mxu0  ;;  %v8730_v12 = vpop.f32.mrb[181].mxu1 }
 0x5cc   :  { %v8619_v55 = vadd.f32 %v8618_v7, %v8617_v10  ;;  %v8620_v9 = vpop.f32.mrb[182].mxu0  ;;  %v8731_v19 = vadd.f32 %v8730_v12, %v8729_v20  ;;  %v8732_v42 = vpop.f32.mrb[182].mxu1 }
 0x5cd   :  { %v8621_v22 = vpop.f32.mrb[183].mxu0  ;;  %v8733_v59 = vpop.f32.mrb[183].mxu1 }
 0x5ce   :  { %v7334_v8 = vadd.f32 %v8619_v55, %v12371_v44  ;;  %v8622_v41 = vadd.f32 %v8621_v22, %v8620_v9  ;;  %v8734_v34 = vadd.f32 %v8733_v59, %v8732_v42 }
 0x5d0   :  { %v12470_v60 = vadd.f32 %v8731_v19, %v7334_v8  ;;  %v7337_v52 = vadd.f32 %v8622_v41, %v12371_v44 }
 0x5d2   :  { %v12473_v6 = vadd.f32 %v8734_v34, %v7337_v52  ;;  %v8623_v1 = vpop.f32.mrb[184].mxu0  ;;  %v8735_v5 = vpop.f32.mrb[184].mxu1 }
 0x5d3   :  { %v8624_v21 = vpop.f32.mrb[185].mxu0  ;;  %v8736_v43 = vpop.f32.mrb[185].mxu1 }
 0x5d4   :  { %v8625_v57 = vadd.f32 %v8624_v21, %v8623_v1  ;;  %v8626_v35 = vpop.f32.mrb[186].mxu0  ;;  %v8737_v18 = vadd.f32 %v8736_v43, %v8735_v5  ;;  %v8738_v37 = vpop.f32.mrb[186].mxu1 }
 0x5d5   :  { %v8627_v11 = vpop.f32.mrb[187].mxu0  ;;  %v8739_v51 = vpop.f32.mrb[187].mxu1 }
 0x5d6   :  { %v7342_v31 = vadd.f32 %v8625_v57, %v12371_v44  ;;  %v8628_v45 = vadd.f32 %v8627_v11, %v8626_v35  ;;  %v8740_v29 = vadd.f32 %v8739_v51, %v8738_v37 }
 0x5d8   :  { %v12476_v26 = vadd.f32 %v8737_v18, %v7342_v31  ;;  %v7345_v38 = vadd.f32 %v8628_v45, %v12371_v44 }
 0x5da   :  { %v12479_v0 = vadd.f32 %v8740_v29, %v7345_v38  ;;  %v8629_v36 = vpop.f32.mrb[188].mxu0  ;;  %v8741_v49 = vpop.f32.mrb[188].mxu1 }
 0x5db   :  { %v8630_v24 = vpop.f32.mrb[189].mxu0  ;;  %v8742_v3 = vpop.f32.mrb[189].mxu1 }
 0x5dc   :  { %v8631_v53 = vadd.f32 %v8630_v24, %v8629_v36  ;;  %v8632_v10 = vpop.f32.mrb[190].mxu0  ;;  %v8743_v20 = vadd.f32 %v8742_v3, %v8741_v49  ;;  %v8744_v7 = vpop.f32.mrb[190].mxu1 }
 0x5dd   :  { %v8633_v55 = vpop.f32.mrb[191].mxu0  ;;  %v8745_v19 = vpop.f32.mrb[191].mxu1 }
 0x5de   :  { %v7350_v12 = vadd.f32 %v8631_v53, %v12371_v44  ;;  %v8634_v9 = vadd.f32 %v8633_v55, %v8632_v10  ;;  %v8746_v42 = vadd.f32 %v8745_v19, %v8744_v7 }
 0x5e0   :  { %v12482_v22 = vadd.f32 %v8743_v20, %v7350_v12  ;;  %v7353_v8 = vadd.f32 %v8634_v9, %v12371_v44 }
 0x5e2   :  { %v12485_v41 = vadd.f32 %v8746_v42, %v7353_v8  ;;  %v8763_v59 = vpop.f32.mrb[192].mxu0  ;;  %v8875_v34 = vpop.f32.mrb[192].mxu1 }
 0x5e3   :  { %v8764_v52 = vpop.f32.mrb[193].mxu0  ;;  %v8876_v5 = vpop.f32.mrb[193].mxu1 }
 0x5e4   :  { %v8765_v1 = vadd.f32 %v8764_v52, %v8763_v59  ;;  %v8766_v21 = vpop.f32.mrb[194].mxu0  ;;  %v8877_v57 = vadd.f32 %v8876_v5, %v8875_v34  ;;  %v8878_v43 = vpop.f32.mrb[194].mxu1 }
 0x5e5   :  { %v8767_v35 = vpop.f32.mrb[195].mxu0  ;;  %v8879_v11 = vpop.f32.mrb[195].mxu1 }
 0x5e6   :  { %v7552_v18 = vadd.f32 %v8765_v1, %v12375_v4  ;;  %v8768_v37 = vadd.f32 %v8767_v35, %v8766_v21  ;;  %v8880_v31 = vadd.f32 %v8879_v11, %v8878_v43 }
 0x5e8   :  { %v7713_v45 = vadd.f32 %v8877_v57, %v7552_v18  ;;  %v7555_v51 = vadd.f32 %v8768_v37, %v12381_v25 }
 0x5ea   :  { %7839 = vst [vmem:[#allocation10] sm:$0xff] %v7713_v45  ;;  %v7716_v44 = vadd.f32 %v8880_v31, %v7555_v51  ;;  %v8769_v29 = vpop.f32.mrb[196].mxu0  ;;  %v8881_v38 = vpop.f32.mrb[196].mxu1 }
 0x5eb   :  { %v8770_v36 = vpop.f32.mrb[197].mxu0  ;;  %v8882_v24 = vpop.f32.mrb[197].mxu1 }
 0x5ec   :  { %7840 = vst [vmem:[#allocation10 + $0x8] sm:$0xff] %v7716_v44  ;;  %v8771_v49 = vadd.f32 %v8770_v36, %v8769_v29  ;;  %v8772_v53 = vpop.f32.mrb[198].mxu0  ;;  %v8883_v3 = vadd.f32 %v8882_v24, %v8881_v38  ;;  %v8884_v10 = vpop.f32.mrb[198].mxu1 }
 0x5ed   :  { %v8773_v20 = vpop.f32.mrb[199].mxu0  ;;  %v8885_v55 = vpop.f32.mrb[199].mxu1 }
 0x5ee   :  { %v7560_v4 = vadd.f32 %v8771_v49, %v12385_v27  ;;  %v8774_v7 = vadd.f32 %v8773_v20, %v8772_v53  ;;  %v8886_v12 = vadd.f32 %v8885_v55, %v8884_v10 }
 0x5f0   :  { %v7721_v9 = vadd.f32 %v8883_v3, %v7560_v4  ;;  %v7563_v25 = vadd.f32 %v8774_v7, %v12391_v13 }
 0x5f2   :  { %7841 = vst [vmem:[#allocation10 + $0x10] sm:$0xff] %v7721_v9  ;;  %v7724_v19 = vadd.f32 %v8886_v12, %v7563_v25  ;;  %v8775_v42 = vpop.f32.mrb[200].mxu0  ;;  %v8887_v8 = vpop.f32.mrb[200].mxu1 }
 0x5f3   :  { %v8776_v59 = vpop.f32.mrb[201].mxu0  ;;  %v8888_v52 = vpop.f32.mrb[201].mxu1 }
 0x5f4   :  { %7842 = vst [vmem:[#allocation10 + $0x18] sm:$0xff] %v7724_v19  ;;  %v8777_v34 = vadd.f32 %v8776_v59, %v8775_v42  ;;  %v8778_v1 = vpop.f32.mrb[202].mxu0  ;;  %v8889_v5 = vadd.f32 %v8888_v52, %v8887_v8  ;;  %v8890_v21 = vpop.f32.mrb[202].mxu1 }
 0x5f5   :  { %v8779_v57 = vpop.f32.mrb[203].mxu0  ;;  %v8891_v35 = vpop.f32.mrb[203].mxu1 }
 0x5f6   :  { %v7568_v27 = vadd.f32 %v8777_v34, %v12395_v39  ;;  %v8780_v43 = vadd.f32 %v8779_v57, %v8778_v1  ;;  %v8892_v18 = vadd.f32 %v8891_v35, %v8890_v21 }
 0x5f8   :  { %v7729_v37 = vadd.f32 %v8889_v5, %v7568_v27  ;;  %v7571_v13 = vadd.f32 %v8780_v43, %v12401_v56 }
 0x5fa   :  { %7843 = vst [vmem:[#allocation10 + $0x20] sm:$0xff] %v7729_v37  ;;  %v7732_v11 = vadd.f32 %v8892_v18, %v7571_v13  ;;  %v8781_v31 = vpop.f32.mrb[204].mxu0  ;;  %v8893_v45 = vpop.f32.mrb[204].mxu1 }
 0x5fb   :  { %v8782_v51 = vpop.f32.mrb[205].mxu0  ;;  %v8894_v29 = vpop.f32.mrb[205].mxu1 }
 0x5fc   :  { %7844 = vst [vmem:[#allocation10 + $0x28] sm:$0xff] %v7732_v11  ;;  %v8783_v44 = vadd.f32 %v8782_v51, %v8781_v31  ;;  %v8784_v38 = vpop.f32.mrb[206].mxu0  ;;  %v8895_v36 = vadd.f32 %v8894_v29, %v8893_v45  ;;  %v8896_v49 = vpop.f32.mrb[206].mxu1 }
 0x5fd   :  { %v8785_v24 = vpop.f32.mrb[207].mxu0  ;;  %v8897_v3 = vpop.f32.mrb[207].mxu1 }
 0x5fe   :  { %v7576_v39 = vadd.f32 %v8783_v44, %v12405_v32  ;;  %v8786_v53 = vadd.f32 %v8785_v24, %v8784_v38  ;;  %v8898_v10 = vadd.f32 %v8897_v3, %v8896_v49 }
 0x600   :  { %v7737_v20 = vadd.f32 %v8895_v36, %v7576_v39  ;;  %v7579_v56 = vadd.f32 %v8786_v53, %v12411_v50 }
 0x602   :  { %7845 = vst [vmem:[#allocation10 + $0x30] sm:$0xff] %v7737_v20  ;;  %v7740_v4 = vadd.f32 %v8898_v10, %v7579_v56  ;;  %v8787_v7 = vpop.f32.mrb[208].mxu0  ;;  %v8899_v55 = vpop.f32.mrb[208].mxu1 }
 0x603   :  { %v8788_v12 = vpop.f32.mrb[209].mxu0  ;;  %v8900_v25 = vpop.f32.mrb[209].mxu1 }
 0x604   :  { %7846 = vst [vmem:[#allocation10 + $0x38] sm:$0xff] %v7740_v4  ;;  %v8789_v9 = vadd.f32 %v8788_v12, %v8787_v7  ;;  %v8790_v19 = vpop.f32.mrb[210].mxu0  ;;  %v8901_v42 = vadd.f32 %v8900_v25, %v8899_v55  ;;  %v8902_v8 = vpop.f32.mrb[210].mxu1 }
 0x605   :  { %v8791_v59 = vpop.f32.mrb[211].mxu0  ;;  %v8903_v52 = vpop.f32.mrb[211].mxu1 }
 0x606   :  { %v7584_v32 = vadd.f32 %v8789_v9, %v12415_v47  ;;  %v8792_v34 = vadd.f32 %v8791_v59, %v8790_v19  ;;  %v8904_v1 = vadd.f32 %v8903_v52, %v8902_v8 }
 0x608   :  { %v7745_v5 = vadd.f32 %v8901_v42, %v7584_v32  ;;  %v7587_v50 = vadd.f32 %v8792_v34, %v12419_v15 }
 0x60a   :  { %7847 = vst [vmem:[#allocation10 + $0x40] sm:$0xff] %v7745_v5  ;;  %v7748_v21 = vadd.f32 %v8904_v1, %v7587_v50  ;;  %v8793_v57 = vpop.f32.mrb[212].mxu0  ;;  %v8905_v27 = vpop.f32.mrb[212].mxu1 }
 0x60b   :  { %v8794_v43 = vpop.f32.mrb[213].mxu0  ;;  %v8906_v18 = vpop.f32.mrb[213].mxu1 }
 0x60c   :  { %7848 = vst [vmem:[#allocation10 + $0x48] sm:$0xff] %v7748_v21  ;;  %v8795_v35 = vadd.f32 %v8794_v43, %v8793_v57  ;;  %v8796_v37 = vpop.f32.mrb[214].mxu0  ;;  %v8907_v13 = vadd.f32 %v8906_v18, %v8905_v27  ;;  %v8908_v11 = vpop.f32.mrb[214].mxu1 }
 0x60d   :  { %v8797_v31 = vpop.f32.mrb[215].mxu0  ;;  %v8909_v51 = vpop.f32.mrb[215].mxu1 }
 0x60e   :  { %v7592_v47 = vadd.f32 %v8795_v35, %v12422_v16  ;;  %v8798_v45 = vadd.f32 %v8797_v31, %v8796_v37  ;;  %v8910_v44 = vadd.f32 %v8909_v51, %v8908_v11 }
 0x610   :  { %v7753_v29 = vadd.f32 %v8907_v13, %v7592_v47  ;;  %v7595_v15 = vadd.f32 %v8798_v45, %v12425_v48 }
 0x612   :  { %7849 = vst [vmem:[#allocation10 + $0x50] sm:$0xff] %v7753_v29  ;;  %v7756_v38 = vadd.f32 %v8910_v44, %v7595_v15  ;;  %v8799_v36 = vpop.f32.mrb[216].mxu0  ;;  %v8911_v49 = vpop.f32.mrb[216].mxu1 }
 0x613   :  { %v8800_v24 = vpop.f32.mrb[217].mxu0  ;;  %v8912_v53 = vpop.f32.mrb[217].mxu1 }
 0x614   :  { %7850 = vst [vmem:[#allocation10 + $0x58] sm:$0xff] %v7756_v38  ;;  %v8801_v39 = vadd.f32 %v8800_v24, %v8799_v36  ;;  %v8802_v3 = vpop.f32.mrb[218].mxu0  ;;  %v8913_v10 = vadd.f32 %v8912_v53, %v8911_v49  ;;  %v8914_v20 = vpop.f32.mrb[218].mxu1 }
 0x615   :  { %v8803_v56 = vpop.f32.mrb[219].mxu0  ;;  %v8915_v7 = vpop.f32.mrb[219].mxu1 }
 0x616   :  { %v7600_v16 = vadd.f32 %v8801_v39, %v12428_v54  ;;  %v8804_v4 = vadd.f32 %v8803_v56, %v8802_v3  ;;  %v8916_v55 = vadd.f32 %v8915_v7, %v8914_v20 }
 0x618   :  { %v7761_v12 = vadd.f32 %v8913_v10, %v7600_v16  ;;  %v7603_v48 = vadd.f32 %v8804_v4, %v12431_v14 }
 0x61a   :  { %7851 = vst [vmem:[#allocation10 + $0x60] sm:$0xff] %v7761_v12  ;;  %v7764_v9 = vadd.f32 %v8916_v55, %v7603_v48  ;;  %v8805_v25 = vpop.f32.mrb[220].mxu0  ;;  %v8917_v19 = vpop.f32.mrb[220].mxu1 }
 0x61b   :  { %v8806_v42 = vpop.f32.mrb[221].mxu0  ;;  %v8918_v59 = vpop.f32.mrb[221].mxu1 }
 0x61c   :  { %7852 = vst [vmem:[#allocation10 + $0x68] sm:$0xff] %v7764_v9  ;;  %v8807_v8 = vadd.f32 %v8806_v42, %v8805_v25  ;;  %v8808_v32 = vpop.f32.mrb[222].mxu0  ;;  %v8919_v34 = vadd.f32 %v8918_v59, %v8917_v19  ;;  %v8920_v52 = vpop.f32.mrb[222].mxu1 }
 0x61d   :  { %v8809_v1 = vpop.f32.mrb[223].mxu0  ;;  %v8921_v50 = vpop.f32.mrb[223].mxu1 }
 0x61e   :  { %v7608_v54 = vadd.f32 %v8807_v8, %v12434_v33  ;;  %v8810_v5 = vadd.f32 %v8809_v1, %v8808_v32  ;;  %v8922_v21 = vadd.f32 %v8921_v50, %v8920_v52 }
 0x620   :  { %v7769_v57 = vadd.f32 %v8919_v34, %v7608_v54  ;;  %v7611_v14 = vadd.f32 %v8810_v5, %v12437_v2 }
 0x622   :  { %7853 = vst [vmem:[#allocation10 + $0x70] sm:$0xff] %v7769_v57  ;;  %v7772_v27 = vadd.f32 %v8922_v21, %v7611_v14  ;;  %v8811_v43 = vpop.f32.mrb[224].mxu0  ;;  %v8923_v35 = vpop.f32.mrb[224].mxu1 }
 0x623   :  { %v8812_v18 = vpop.f32.mrb[225].mxu0  ;;  %v8924_v13 = vpop.f32.mrb[225].mxu1 }
 0x624   :  { %7854 = vst [vmem:[#allocation10 + $0x78] sm:$0xff] %v7772_v27  ;;  %v8813_v37 = vadd.f32 %v8812_v18, %v8811_v43  ;;  %v8814_v11 = vpop.f32.mrb[226].mxu0  ;;  %v8925_v31 = vadd.f32 %v8924_v13, %v8923_v35  ;;  %v8926_v47 = vpop.f32.mrb[226].mxu1 }
 0x625   :  { %v8815_v45 = vpop.f32.mrb[227].mxu0  ;;  %v8927_v44 = vpop.f32.mrb[227].mxu1 }
 0x626   :  { %v7616_v33 = vadd.f32 %v8813_v37, %v12440_v30  ;;  %v8816_v51 = vadd.f32 %v8815_v45, %v8814_v11  ;;  %v8928_v29 = vadd.f32 %v8927_v44, %v8926_v47 }
 0x628   :  { %v7777_v15 = vadd.f32 %v8925_v31, %v7616_v33  ;;  %v7619_v2 = vadd.f32 %v8816_v51, %v12443_v58 }
 0x62a   :  { %7855 = vst [vmem:[#allocation10 + $0x80] sm:$0xff] %v7777_v15  ;;  %v7780_v38 = vadd.f32 %v8928_v29, %v7619_v2  ;;  %v8817_v36 = vpop.f32.mrb[228].mxu0  ;;  %v8929_v49 = vpop.f32.mrb[228].mxu1 }
 0x62b   :  { %v8818_v24 = vpop.f32.mrb[229].mxu0  ;;  %v8930_v53 = vpop.f32.mrb[229].mxu1 }
 0x62c   :  { %7856 = vst [vmem:[#allocation10 + $0x88] sm:$0xff] %v7780_v38  ;;  %v8819_v39 = vadd.f32 %v8818_v24, %v8817_v36  ;;  %v8820_v3 = vpop.f32.mrb[230].mxu0  ;;  %v8931_v10 = vadd.f32 %v8930_v53, %v8929_v49  ;;  %v8932_v20 = vpop.f32.mrb[230].mxu1 }
 0x62d   :  { %v8821_v56 = vpop.f32.mrb[231].mxu0  ;;  %v8933_v4 = vpop.f32.mrb[231].mxu1 }
 0x62e   :  { %v7624_v30 = vadd.f32 %v8819_v39, %v12446_v28  ;;  %v8822_v16 = vadd.f32 %v8821_v56, %v8820_v3  ;;  %v8934_v7 = vadd.f32 %v8933_v4, %v8932_v20 }
 0x630   :  { %v7785_v55 = vadd.f32 %v8931_v10, %v7624_v30  ;;  %v7627_v58 = vadd.f32 %v8822_v16, %v12449_v23 }
 0x632   :  { %7857 = vst [vmem:[#allocation10 + $0x90] sm:$0xff] %v7785_v55  ;;  %v7788_v12 = vadd.f32 %v8934_v7, %v7627_v58  ;;  %v8823_v48 = vpop.f32.mrb[232].mxu0  ;;  %v8935_v9 = vpop.f32.mrb[232].mxu1 }
 0x633   :  { %v8824_v25 = vpop.f32.mrb[233].mxu0  ;;  %v8936_v42 = vpop.f32.mrb[233].mxu1 }
 0x634   :  { %7858 = vst [vmem:[#allocation10 + $0x98] sm:$0xff] %v7788_v12  ;;  %v8825_v19 = vadd.f32 %v8824_v25, %v8823_v48  ;;  %v8826_v8 = vpop.f32.mrb[234].mxu0  ;;  %v8937_v59 = vadd.f32 %v8936_v42, %v8935_v9  ;;  %v8938_v32 = vpop.f32.mrb[234].mxu1 }
 0x635   :  { %v8827_v34 = vpop.f32.mrb[235].mxu0  ;;  %v8939_v1 = vpop.f32.mrb[235].mxu1 }
 0x636   :  { %v7632_v28 = vadd.f32 %v8825_v19, %v12452_v61  ;;  %v8828_v52 = vadd.f32 %v8827_v34, %v8826_v8  ;;  %v8940_v54 = vadd.f32 %v8939_v1, %v8938_v32 }
 0x638   :  { %v7793_v5 = vadd.f32 %v8937_v59, %v7632_v28  ;;  %v7635_v23 = vadd.f32 %v8828_v52, %v12455_v17 }
 0x63a   :  { %7859 = vst [vmem:[#allocation10 + $0xa0] sm:$0xff] %v7793_v5  ;;  %v7796_v50 = vadd.f32 %v8940_v54, %v7635_v23  ;;  %v8829_v21 = vpop.f32.mrb[236].mxu0  ;;  %v8941_v57 = vpop.f32.mrb[236].mxu1 }
 0x63b   :  { %v8830_v14 = vpop.f32.mrb[237].mxu0  ;;  %v8942_v43 = vpop.f32.mrb[237].mxu1 }
 0x63c   :  { %7860 = vst [vmem:[#allocation10 + $0xa8] sm:$0xff] %v7796_v50  ;;  %v8831_v27 = vadd.f32 %v8830_v14, %v8829_v21  ;;  %v8832_v35 = vpop.f32.mrb[238].mxu0  ;;  %v8943_v18 = vadd.f32 %v8942_v43, %v8941_v57  ;;  %v8944_v37 = vpop.f32.mrb[238].mxu1 }
 0x63d   :  { %v8833_v13 = vpop.f32.mrb[239].mxu0  ;;  %v8945_v31 = vpop.f32.mrb[239].mxu1 }
 0x63e   :  { %v7640_v61 = vadd.f32 %v8831_v27, %v12458_v63  ;;  %v8834_v11 = vadd.f32 %v8833_v13, %v8832_v35  ;;  %v8946_v47 = vadd.f32 %v8945_v31, %v8944_v37 }
 0x640   :  { %v7801_v45 = vadd.f32 %v8943_v18, %v7640_v61  ;;  %v7643_v17 = vadd.f32 %v8834_v11, %v12461_v46 }
 0x642   :  { %7861 = vst [vmem:[#allocation10 + $0xb0] sm:$0xff] %v7801_v45  ;;  %v7804_v33 = vadd.f32 %v8946_v47, %v7643_v17  ;;  %v8835_v51 = vpop.f32.mrb[240].mxu0  ;;  %v8947_v44 = vpop.f32.mrb[240].mxu1 }
 0x643   :  { %v8836_v29 = vpop.f32.mrb[241].mxu0  ;;  %v8948_v2 = vpop.f32.mrb[241].mxu1 }
 0x644   :  { %7862 = vst [vmem:[#allocation10 + $0xb8] sm:$0xff] %v7804_v33  ;;  %v8837_v15 = vadd.f32 %v8836_v29, %v8835_v51  ;;  %v8838_v38 = vpop.f32.mrb[242].mxu0  ;;  %v8949_v36 = vadd.f32 %v8948_v2, %v8947_v44  ;;  %v8950_v49 = vpop.f32.mrb[242].mxu1 }
 0x645   :  { %v8839_v24 = vpop.f32.mrb[243].mxu0  ;;  %v8951_v53 = vpop.f32.mrb[243].mxu1 }
 0x646   :  { %v7648_v63 = vadd.f32 %v8837_v15, %v12464_v40  ;;  %v8840_v39 = vadd.f32 %v8839_v24, %v8838_v38  ;;  %v8952_v3 = vadd.f32 %v8951_v53, %v8950_v49 }
 0x648   :  { %v7809_v10 = vadd.f32 %v8949_v36, %v7648_v63  ;;  %v7651_v46 = vadd.f32 %v8840_v39, %v12467_v62 }
 0x64a   :  { %7863 = vst [vmem:[#allocation10 + $0xc0] sm:$0xff] %v7809_v10  ;;  %v7812_v20 = vadd.f32 %v8952_v3, %v7651_v46  ;;  %v8841_v56 = vpop.f32.mrb[244].mxu0  ;;  %v8953_v30 = vpop.f32.mrb[244].mxu1 }
 0x64b   :  { %v8842_v16 = vpop.f32.mrb[245].mxu0  ;;  %v8954_v7 = vpop.f32.mrb[245].mxu1 }
 0x64c   :  { %7864 = vst [vmem:[#allocation10 + $0xc8] sm:$0xff] %v7812_v20  ;;  %v8843_v4 = vadd.f32 %v8842_v16, %v8841_v56  ;;  %v8844_v55 = vpop.f32.mrb[246].mxu0  ;;  %v8955_v58 = vadd.f32 %v8954_v7, %v8953_v30  ;;  %v8956_v12 = vpop.f32.mrb[246].mxu1 }
 0x64d   :  { %v8845_v48 = vpop.f32.mrb[247].mxu0  ;;  %v8957_v25 = vpop.f32.mrb[247].mxu1 }
 0x64e   :  { %v7656_v40 = vadd.f32 %v8843_v4, %v12470_v60  ;;  %v8846_v9 = vadd.f32 %v8845_v48, %v8844_v55  ;;  %v8958_v19 = vadd.f32 %v8957_v25, %v8956_v12 }
 0x650   :  { %v7817_v42 = vadd.f32 %v8955_v58, %v7656_v40  ;;  %v7659_v62 = vadd.f32 %v8846_v9, %v12473_v6 }
 0x652   :  { %7865 = vst [vmem:[#allocation10 + $0xd0] sm:$0xff] %v7817_v42  ;;  %v7820_v8 = vadd.f32 %v8958_v19, %v7659_v62  ;;  %v8847_v59 = vpop.f32.mrb[248].mxu0  ;;  %v8959_v32 = vpop.f32.mrb[248].mxu1 }
 0x653   :  { %v8848_v34 = vpop.f32.mrb[249].mxu0  ;;  %v8960_v52 = vpop.f32.mrb[249].mxu1 }
 0x654   :  { %7866 = vst [vmem:[#allocation10 + $0xd8] sm:$0xff] %v7820_v8  ;;  %v8849_v28 = vadd.f32 %v8848_v34, %v8847_v59  ;;  %v8850_v1 = vpop.f32.mrb[250].mxu0  ;;  %v8961_v54 = vadd.f32 %v8960_v52, %v8959_v32  ;;  %v8962_v5 = vpop.f32.mrb[250].mxu1 }
 0x655   :  { %v8851_v23 = vpop.f32.mrb[251].mxu0  ;;  %v8963_v21 = vpop.f32.mrb[251].mxu1 }
 0x656   :  { %v7664_v60 = vadd.f32 %v8849_v28, %v12476_v26  ;;  %v8852_v50 = vadd.f32 %v8851_v23, %v8850_v1  ;;  %v8964_v57 = vadd.f32 %v8963_v21, %v8962_v5 }
 0x658   :  { %v7825_v14 = vadd.f32 %v8961_v54, %v7664_v60  ;;  %v7667_v6 = vadd.f32 %v8852_v50, %v12479_v0 }
 0x65a   :  { %7867 = vst [vmem:[#allocation10 + $0xe0] sm:$0xff] %v7825_v14  ;;  %v7828_v27 = vadd.f32 %v8964_v57, %v7667_v6  ;;  %v8853_v43 = vpop.f32.mrb[252].mxu0  ;;  %v8965_v35 = vpop.f32.mrb[252].mxu1 }
 0x65b   :  { %v8854_v18 = vpop.f32.mrb[253].mxu0  ;;  %v8966_v13 = vpop.f32.mrb[253].mxu1 }
 0x65c   :  { %7868 = vst [vmem:[#allocation10 + $0xe8] sm:$0xff] %v7828_v27  ;;  %v8855_v37 = vadd.f32 %v8854_v18, %v8853_v43  ;;  %v8856_v61 = vpop.f32.mrb[254].mxu0  ;;  %v8967_v11 = vadd.f32 %v8966_v13, %v8965_v35  ;;  %v8968_v31 = vpop.f32.mrb[254].mxu1 }
 0x65d   :  { %v8857_v47 = vpop.f32.mrb[255].mxu0  ;;  %v8969_v17 = vpop.f32.mrb[255].mxu1 }
 0x65e   :  { %v7672_v26 = vadd.f32 %v8855_v37, %v12482_v22  ;;  %v8858_v45 = vadd.f32 %v8857_v47, %v8856_v61  ;;  %v8970_v33 = vadd.f32 %v8969_v17, %v8968_v31 }
 0x660   :  { %v7833_v0 = vadd.f32 %v8967_v11, %v7672_v26  ;;  %v7675_v51 = vadd.f32 %v8858_v45, %v12485_v41 }
 0x662   :  { %7869 = vst [vmem:[#allocation10 + $0xf0] sm:$0xff] %v7833_v0  ;;  %v7836_v44 = vadd.f32 %v8970_v33, %v7675_v51 }
 0x664   :  { %7870 = vst [vmem:[#allocation10 + $0xf8] sm:$0xff] %v7836_v44 }
 0x665   :  { %10443 = shalt.err (!%p10440_p8)
}
 0x666   :  { %s10444_s7 = scalar_lea.hbm %s12536_s5, 4096 }
 0x667   :  { %p10445_p9 = scmp.ne.s32.totalorder %s12536_s5, %s10444_s7  ;;  %p10448_p10 = scmp.lt.u32.totalorder %s10444_s7, %s12536_s5 }
 0x669   :  { %p10450_p11 = pnand %p10448_p10, %p10445_p9 }
 0x66b   :  { %10453 = shalt.err (!%p10450_p11)
}
 0x66c   :  { %s10472_s12 = smov 128   ;;  %s10473_s13 = smov 8  }
 0x66d   :  { %7882 = dma.vmem_to_hbm [thread:$0]  %s7877_s21, 4096, %s12536_s5, [#allocation4], %s10472_s12, %s10472_s12, %s10473_s13  }
 0x66e   :  { %10460 = dma.done.wait [#allocation4], 4096  }
 0x66f   :  { %10461 = vsyncadd [#allocation4], 4294963200 }
 0x670   :  { %7886 = vsyncpa [#allocation3], 1 }
 0x671   :  { %7887 = vsyncpa [#allocation6], 1 }
 0x672   :  { %7888 = vsyncpa [#allocation9], 1 }
 0x673   :  { %7889 = vsyncpa [#allocation4], 1 }

</bundles_post_ra>
